<compile_context>
chip_gen: v7x
topology: tpu7x:2x2x1
jax: 0.10.0
libtpu: 0.0.40
codegen_flags: <defaults>
</compile_context>

<pallas_src>
import functools
import math

import jax
import jax.numpy as jnp
from jax.experimental import pallas as pl
from jax.experimental.pallas import tpu as pltpu

EPS = 1e-5
VMEM_LIMIT = 48 * 1024 * 1024      # < 64 MiB (v7x physical), fine on v5e/v6e too
_PADL = 15                         # left zero shim so the interior store is 16-sublane aligned


def _pick_tile(m, target=1024):
    """Largest sublane-friendly divisor of m (>=2 grid steps when possible)."""
    hi = min(target, max(m // 2, 1))
    for t in range(hi, 0, -1):
        if m % t == 0 and (t % 8 == 0 or t == m):
            return t
    return m


def _pick_rows(ho, wo, target=256):
    """Output-row tile: largest divisor of ho with th*wo <= target, >=2 steps if possible."""
    cands = [t for t in range(1, ho) if ho % t == 0 and t * wo <= target]
    if not cands:
        cands = [t for t in range(1, ho + 1) if ho % t == 0 and t * wo <= target] or [1]
    return max(cands)


# --------------------------------------------------------------------------
# BatchNorm statistics (training-mode batch stats, matching a fresh PyTorch
# module in train mode): tiled sum / sum-of-squares reduction.
# --------------------------------------------------------------------------
def _bn_stats_kernel(x_ref, sum_ref, sq_ref):
    @pl.when(pl.program_id(0) == 0)
    def _init():
        sum_ref[...] = jnp.zeros_like(sum_ref)
        sq_ref[...] = jnp.zeros_like(sq_ref)

    x = x_ref[...].astype(jnp.float32)
    sum_ref[...] += jnp.sum(x, axis=0, keepdims=True)
    sq_ref[...] += jnp.sum(x * x, axis=0, keepdims=True)


def pallas_bn_stats(x2d):
    m, c = x2d.shape
    tm = _pick_tile(m)
    return pl.pallas_call(
        _bn_stats_kernel,
        grid=(m // tm,),
        in_specs=[pl.BlockSpec((tm, c), lambda i: (i, 0))],
        out_specs=[pl.BlockSpec((1, c), lambda i: (0, 0)),
                   pl.BlockSpec((1, c), lambda i: (0, 0))],
        out_shape=[jax.ShapeDtypeStruct((1, c), jnp.float32),
                   jax.ShapeDtypeStruct((1, c), jnp.float32)],
        compiler_params=pltpu.CompilerParams(
            dimension_semantics=("arbitrary",), vmem_limit_bytes=VMEM_LIMIT),
    )(x2d)


def bn_scale_shift(ssum, ssq, gamma, beta, count):
    """Per-channel (1, C) scale/shift from batch statistics (tiny, plain JAX)."""
    # TODO(synk): E[x^2]-E[x]^2 is cancellation-prone at very large counts; switch to a
    # centered second pass for production-scale batches.
    inv_n = 1.0 / float(count)
    mean = ssum * inv_n
    var = ssq * inv_n - mean * mean            # biased variance (train mode)
    scale = gamma.reshape(1, -1) * jax.lax.rsqrt(var + EPS)
    shift = beta.reshape(1, -1) - mean * scale
    return scale, shift


# --------------------------------------------------------------------------
# Standalone BN apply + ReLU (only used ahead of the stride>1 conv path,
# where padding must happen after activation).
# --------------------------------------------------------------------------
def _bn_apply_relu_kernel(x_ref, scale_ref, shift_ref, o_ref):
    y = x_ref[...].astype(jnp.float32) * scale_ref[...] + shift_ref[...]
    o_ref[...] = jnp.maximum(y, 0.0).astype(o_ref.dtype)


def pallas_bn_apply_relu(x2d, scale, shift, out_dtype=jnp.bfloat16):
    m, c = x2d.shape
    tm = _pick_tile(m)
    vec = pl.BlockSpec((1, c), lambda i: (0, 0))
    return pl.pallas_call(
        _bn_apply_relu_kernel,
        grid=(m // tm,),
        in_specs=[pl.BlockSpec((tm, c), lambda i: (i, 0)), vec, vec],
        out_specs=pl.BlockSpec((tm, c), lambda i: (i, 0)),
        out_shape=jax.ShapeDtypeStruct((m, c), out_dtype),
        compiler_params=pltpu.CompilerParams(
            dimension_semantics=("parallel",), vmem_limit_bytes=VMEM_LIMIT),
    )(x2d, scale, shift)


# --------------------------------------------------------------------------
# Fused 3x3 stride-1 pad-1 conv: relu(x*scale+shift) -> conv [-> + residual].
# Padding, activation staging and fp32 accumulation all stay in VMEM.
# --------------------------------------------------------------------------
def _make_conv3x3_s1_kernel(H, W, cin, cout, th, has_res):
    def kernel(x_ref, scale_ref, shift_ref, w_ref, *rest):
        if has_res:
            res_ref, o_ref, ap_ref, b_ref, acc_ref = rest
        else:
            o_ref, ap_ref, b_ref, acc_ref = rest
        j = pl.program_id(1)

        # Build the BN+ReLU'd, zero-padded image ONCE per image (j == 0); the
        # activation never round-trips through HBM.  Image lands at column
        # offset _PADL+1 == 16 so the store is sublane-tile aligned.
        @pl.when(j == 0)
        def _build():
            ap_ref[...] = jnp.zeros_like(ap_ref)
            a = x_ref[...].astype(jnp.float32) * scale_ref[...] + shift_ref[...]
            ap_ref[1:H + 1, _PADL + 1:_PADL + 1 + W, :] = (
                jnp.maximum(a, 0.0).astype(ap_ref.dtype))

        # Stage the three column-shifted windows once each (3 relayouts, not 9)
        # into a ((th+2)*W, 3*cin) LHS buffer.
        r0 = j * th
        for dj in range(3):
            win = ap_ref[pl.ds(r0, th + 2), _PADL + dj:_PADL + dj + W, :]
            b_ref[:, dj * cin:(dj + 1) * cin] = win.reshape((th + 2) * W, cin)

        # One K=3*cin matmul per kernel row; row shifts are contiguous sublane
        # slices of the staging buffer; fp32 accumulation in VMEM scratch.
        for di in range(3):
            lhs = b_ref[di * W:di * W + th * W, :]
            d = jnp.dot(lhs, w_ref[di], preferred_element_type=jnp.float32)
            if di == 0:
                acc_ref[...] = d
            else:
                acc_ref[...] += d

        out = acc_ref[...].reshape(th, W, cout)
        if has_res:
            out = out + res_ref[...].astype(jnp.float32)
        o_ref[...] = out.astype(o_ref.dtype)

    return kernel


def conv3x3_s1_bnrelu(x_nhwc, scale, shift, w_oihw, residual=None,
                      out_dtype=jnp.bfloat16):
    """y = conv3x3_s1_p1(relu(x*scale+shift)) [+ residual]."""
    cout, cin, kh, kw = w_oihw.shape
    assert (kh, kw) == (3, 3) and cin == x_nhwc.shape[-1]
    n, H, W, _ = x_nhwc.shape
    th = _pick_rows(H, W)

    # Weights: PyTorch (cout, cin, 3, 3) -> (3 kernel rows, 3*cin, cout) bf16.
    wmat = jnp.transpose(w_oihw, (2, 3, 1, 0)).reshape(kh, kw * cin, cout)
    wmat = wmat.astype(jnp.bfloat16)

    vec = pl.BlockSpec((1, cin), lambda i, j: (0, 0))
    in_specs = [pl.BlockSpec((None, H, W, cin), lambda i, j: (i, 0, 0, 0)),
                vec, vec,
                pl.BlockSpec((kh, kw * cin, cout), lambda i, j: (0, 0, 0))]
    args = [x_nhwc, scale, shift, wmat]
    if residual is not None:
        in_specs.append(pl.BlockSpec((None, th, W, cout), lambda i, j: (i, j, 0, 0)))
        args.append(residual)

    return pl.pallas_call(
        _make_conv3x3_s1_kernel(H, W, cin, cout, th, residual is not None),
        grid=(n, H // th),
        in_specs=in_specs,
        out_specs=pl.BlockSpec((None, th, W, cout), lambda i, j: (i, j, 0, 0)),
        out_shape=jax.ShapeDtypeStruct((n, H, W, cout), out_dtype),
        scratch_shapes=[pltpu.VMEM((H + 2, W + _PADL + 2, cin), jnp.bfloat16),
                        pltpu.VMEM(((th + 2) * W, kw * cin), jnp.bfloat16),
                        pltpu.VMEM((th * W, cout), jnp.float32)],
        compiler_params=pltpu.CompilerParams(
            dimension_semantics=("parallel", "arbitrary"),
            vmem_limit_bytes=VMEM_LIMIT),
    )(*args)


# --------------------------------------------------------------------------
# Strided (stride>1) 3x3 conv: parity-split padded activation, per-tap bf16
# matmuls with fp32 VMEM-scratch accumulation.  Rare path (first block of a
# down-sampling stage); input is already BN+ReLU'd so pads stay zero.
# --------------------------------------------------------------------------
def _make_conv_strided_kernel(kh, kw, s, hs, ho, wo, cin, cout):
    def kernel(ap_ref, w_ref, o_ref, acc_ref):
        first = True
        for di in range(kh):
            for dj in range(kw):
                sub = (di % s) * s + (dj % s)
                r0 = sub * hs + di // s
                c0 = dj // s
                a = ap_ref[r0:r0 + ho, c0:c0 + wo, :].reshape(ho * wo, cin)
                d = jnp.dot(a, w_ref[di * kw + dj],
                            preferred_element_type=jnp.float32)
                if first:
                    acc_ref[...] = d
                    first = False
                else:
                    acc_ref[...] += d
        o_ref[...] = acc_ref[...].reshape(ho, wo, cout).astype(o_ref.dtype)

    return kernel


def conv2d_strided(a_nhwc, w_oihw, stride, pad, out_dtype=jnp.bfloat16):
    """Bias-free strided conv on an already-activated bf16 NHWC input."""
    cout, cin, kh, kw = w_oihw.shape
    n, h, w, _ = a_nhwc.shape
    s = stride
    ho = (h + 2 * pad - kh) // s + 1
    wo = (w + 2 * pad - kw) // s + 1
    hp, wp = h + 2 * pad, w + 2 * pad
    hp2 = s * ((hp + s - 1) // s)
    wp2 = s * ((wp + s - 1) // s)
    hs, ws = hp2 // s, wp2 // s
    ap = jnp.pad(a_nhwc.astype(jnp.bfloat16),
                 ((0, 0), (pad, pad + hp2 - hp), (pad, pad + wp2 - wp), (0, 0)))
    if s > 1:
        ap = (ap.reshape(n, hs, s, ws, s, cin)
                .transpose(0, 2, 4, 1, 3, 5)
                .reshape(n, s * s * hs, ws, cin))
    wmat = jnp.transpose(w_oihw, (2, 3, 1, 0)).reshape(kh * kw, cin, cout)
    wmat = wmat.astype(jnp.bfloat16)

    return pl.pallas_call(
        _make_conv_strided_kernel(kh, kw, s, hs, ho, wo, cin, cout),
        grid=(n,),
        in_specs=[pl.BlockSpec((None, s * s * hs, ws, cin), lambda i: (i, 0, 0, 0)),
                  pl.BlockSpec((kh * kw, cin, cout), lambda i: (0, 0, 0))],
        out_specs=pl.BlockSpec((None, ho, wo, cout), lambda i: (i, 0, 0, 0)),
        out_shape=jax.ShapeDtypeStruct((n, ho, wo, cout), out_dtype),
        scratch_shapes=[pltpu.VMEM((ho * wo, cout), jnp.float32)],
        compiler_params=pltpu.CompilerParams(
            dimension_semantics=("parallel",), vmem_limit_bytes=VMEM_LIMIT),
    )(ap, wmat)


# --------------------------------------------------------------------------
# 1x1 projection shortcut: tiled matmul, optional fused BN+ReLU prologue.
# --------------------------------------------------------------------------
def _make_matmul_kernel(fuse_bn):
    def kernel(*refs):
        if fuse_bn:
            x_ref, scale_ref, shift_ref, w_ref, o_ref = refs
            a = x_ref[...].astype(jnp.float32) * scale_ref[...] + shift_ref[...]
            a = jnp.maximum(a, 0.0).astype(jnp.bfloat16)
        else:
            x_ref, w_ref, o_ref = refs
            a = x_ref[...].astype(jnp.bfloat16)
        o_ref[...] = jnp.dot(a, w_ref[...],
                             preferred_element_type=jnp.float32).astype(o_ref.dtype)

    return kernel


def pallas_matmul(x2d, w_cin_cout, scale=None, shift=None, out_dtype=jnp.float32):
    m, cin = x2d.shape
    cout = w_cin_cout.shape[1]
    tm = _pick_tile(m, target=512)
    fuse_bn = scale is not None
    in_specs = [pl.BlockSpec((tm, cin), lambda i: (i, 0))]
    args = [x2d]
    if fuse_bn:
        vec = pl.BlockSpec((1, cin), lambda i: (0, 0))
        in_specs += [vec, vec]
        args += [scale, shift]
    in_specs.append(pl.BlockSpec((cin, cout), lambda i: (0, 0)))
    args.append(w_cin_cout.astype(jnp.bfloat16))
    return pl.pallas_call(
        _make_matmul_kernel(fuse_bn),
        grid=(m // tm,),
        in_specs=in_specs,
        out_specs=pl.BlockSpec((tm, cout), lambda i: (i, 0)),
        out_shape=jax.ShapeDtypeStruct((m, cout), out_dtype),
        compiler_params=pltpu.CompilerParams(
            dimension_semantics=("parallel",), vmem_limit_bytes=VMEM_LIMIT),
    )(*args)


# --------------------------------------------------------------------------
# BasicBlock: parameters + forward (mirrors the PyTorch module)
# --------------------------------------------------------------------------
def _init_conv(key, cout, cin, kh, kw):
    fan_out = cout * kh * kw
    std = math.sqrt(2.0 / fan_out)
    return jax.random.normal(key, (cout, cin, kh, kw), jnp.float32) * std


def init_basic_block(key, in_planes, out_planes):
    k1, k2, k3 = jax.random.split(key, 3)
    p = {
        "bn1_g": jnp.ones((in_planes,), jnp.float32),
        "bn1_b": jnp.zeros((in_planes,), jnp.float32),
        "conv1": _init_conv(k1, out_planes, in_planes, 3, 3),
        "bn2_g": jnp.ones((out_planes,), jnp.float32),
        "bn2_b": jnp.zeros((out_planes,), jnp.float32),
        "conv2": _init_conv(k2, out_planes, out_planes, 3, 3),
    }
    if in_planes != out_planes:
        p["shortcut"] = _init_conv(k3, out_planes, in_planes, 1, 1)
    return p


def basic_block_forward(params, x_nchw, *, stride, drop_rate=0.0):
    # TODO(synk): F.dropout not implemented; default dropRate=0.0 makes it a no-op.
    assert drop_rate == 0.0

    # TODO(synk): NCHW<->NHWC relayouts kept at the block boundary to match the
    # PyTorch interface; hoist to the network boundary when chaining blocks.
    x = jnp.transpose(x_nchw, (0, 2, 3, 1)).astype(jnp.float32)
    n, h, w, cin = x.shape
    cout = params["conv1"].shape[0]
    equal = (cin == cout)            # PyTorch: equalInOut = (in_planes == out_planes)
    if equal:
        assert stride == 1, "identity shortcut requires stride 1"

    # bn1 batch statistics -> per-channel scale/shift.
    x2d = x.reshape(n * h * w, cin)
    s1, q1 = pallas_bn_stats(x2d)
    scale1, shift1 = bn_scale_shift(s1, q1, params["bn1_g"], params["bn1_b"], n * h * w)

    if stride == 1:
        # conv1 with BN1+ReLU fused into its prologue (no activation HBM pass).
        c1 = conv3x3_s1_bnrelu(x, scale1, shift1, params["conv1"],
                               out_dtype=jnp.bfloat16)
        ho, wo = h, w
        if equal:
            res = x
        else:
            w_sc = params["shortcut"].reshape(cout, cin).T
            res = pallas_matmul(x2d, w_sc, scale=scale1, shift=shift1).reshape(n, h, w, cout)
    else:
        # stride > 1: materialize a = relu(bn1(x)) once (bf16) and reuse it for
        # the strided conv1 and the 1x1 projection shortcut.
        a2d = pallas_bn_apply_relu(x2d, scale1, shift1)
        a = a2d.reshape(n, h, w, cin)
        c1 = conv2d_strided(a, params["conv1"], stride, 1, out_dtype=jnp.bfloat16)
        _, ho, wo, _ = c1.shape
        a_dec = a[:, ::stride, ::stride, :].reshape(n * ho * wo, cin)
        w_sc = params["shortcut"].reshape(cout, cin).T
        res = pallas_matmul(a_dec, w_sc).reshape(n, ho, wo, cout)

    # bn2 stats on conv1 output; conv2 (3x3, stride 1) with BN2+ReLU fused in its
    # prologue and the residual add fused into its epilogue.
    c1_2d = c1.reshape(n * ho * wo, cout)
    s2, q2 = pallas_bn_stats(c1_2d)
    scale2, shift2 = bn_scale_shift(s2, q2, params["bn2_g"], params["bn2_b"], n * ho * wo)
    y = conv3x3_s1_bnrelu(c1, scale2, shift2, params["conv2"],
                          residual=res, out_dtype=jnp.float32)
    return jnp.transpose(y, (0, 3, 1, 2))     # NHWC -> NCHW


# --------------------------------------------------------------------------
# Plain-JAX fp32 reference for a loose correctness check
# --------------------------------------------------------------------------
def reference_basic_block(params, x_nchw, stride):
    x = x_nchw.astype(jnp.float32)
    equal = (x.shape[1] == params["conv1"].shape[0])

    def bn_relu(v, g, b):
        mean = jnp.mean(v, axis=(0, 2, 3), keepdims=True)
        var = jnp.mean(jnp.square(v - mean), axis=(0, 2, 3), keepdims=True)
        y = (v - mean) * jax.lax.rsqrt(var + EPS)
        y = y * g.reshape(1, -1, 1, 1) + b.reshape(1, -1, 1, 1)
        return jnp.maximum(y, 0.0)

    def conv(v, wgt, s, p):
        return jax.lax.conv_general_dilated(
            v, wgt, (s, s), [(p, p), (p, p)],
            dimension_numbers=("NCHW", "OIHW", "NCHW"))

    a = bn_relu(x, params["bn1_g"], params["bn1_b"])
    h2 = bn_relu(conv(a, params["conv1"], stride, 1),
                 params["bn2_g"], params["bn2_b"])
    y = conv(h2, params["conv2"], 1, 1)
    res = x if equal else conv(a, params["shortcut"], stride, 0)
    return res + y


# --------------------------------------------------------------------------
if __name__ == "__main__":
    root = jax.random.PRNGKey(0)
    kp1, kp2, kx1, kx2 = jax.random.split(root, 4)

    # Case 1: equalInOut path (identity shortcut): in=out=128, stride 1, 16x16.
    p1 = init_basic_block(kp1, 128, 128)
    x1 = jax.random.normal(kx1, (2, 128, 16, 16), jnp.float32)
    fwd1 = jax.jit(functools.partial(basic_block_forward, stride=1))
    out1 = jax.block_until_ready(fwd1(p1, x1))
    assert out1.shape == (2, 128, 16, 16) and out1.dtype == jnp.float32

    # Case 2: projection-shortcut path (1x1 conv): in=64 -> out=128, stride 2, 32x32.
    p2 = init_basic_block(kp2, 64, 128)
    x2 = jax.random.normal(kx2, (2, 64, 32, 32), jnp.float32)
    fwd2 = jax.jit(functools.partial(basic_block_forward, stride=2))
    out2 = jax.block_until_ready(fwd2(p2, x2))
    assert out2.shape == (2, 128, 16, 16) and out2.dtype == jnp.float32

    # Loose correctness check vs fp32 reference (bf16 MXU inputs -> ~1e-2 rel err).
    def rel_err(got, ref):
        return float(jnp.linalg.norm(got - ref) / (jnp.linalg.norm(ref) + 1e-12))

    r1 = reference_basic_block(p1, x1, 1)
    r2 = reference_basic_block(p2, x2, 2)
    assert rel_err(out1, r1) < 5e-2, rel_err(out1, r1)
    assert rel_err(out2, r2) < 5e-2, rel_err(out2, r2)

    print("KERNEL_OK")
</pallas_src>

<mosaic_0001>
module attributes {stable_mosaic.version = 11 : i64} {
  func.func @_bn_stats_kernel(%arg0: i32, %arg1: memref<256x128xf32, #tpu.memory_space<vmem>>, %arg2: memref<1x128xf32, #tpu.memory_space<vmem>>, %arg3: memref<1x128xf32, #tpu.memory_space<vmem>>) attributes {dimension_semantics = [#tpu.dimension_semantics<arbitrary>], iteration_bounds = array<i64: 2>, scalar_prefetch = 0 : i64, scratch_operands = 0 : i64, tpu.core_type = #tpu.core_type<tc>, window_params = [{transform_indices = @transform_0, window_bounds = array<i64: 256, 128>}, {pipeline_mode = #tpu.pipeline_mode<synchronous>, transform_indices = @transform_1, window_bounds = array<i64: 1, 128>}, {pipeline_mode = #tpu.pipeline_mode<synchronous>, transform_indices = @transform_2, window_bounds = array<i64: 1, 128>}]} {
    %c0_i32 = arith.constant 0 : i32
    %0 = arith.cmpi eq, %arg0, %c0_i32 : i32
    %1 = arith.extui %0 : i1 to i32
    %c0_i32_0 = arith.constant 0 : i32
    %2 = arith.cmpi ne, %1, %c0_i32_0 : i32
    scf.if %2 {
      %cst_11 = arith.constant 0.000000e+00 : f32
      %15 = vector.broadcast %cst_11 : f32 to vector<1x128xf32>
      %c0_12 = arith.constant 0 : index
      %c0_13 = arith.constant 0 : index
      %16 = vector.load %arg2[%c0_12, %c0_13] : memref<1x128xf32, #tpu.memory_space<vmem>>, vector<1x128xf32>
      tpu.vector_store %arg2[%c0_12, %c0_13], %15 {strides = array<i32>} : memref<1x128xf32, #tpu.memory_space<vmem>>, vector<1x128xf32>,
      %cst_14 = arith.constant 0.000000e+00 : f32
      %17 = vector.broadcast %cst_14 : f32 to vector<1x128xf32>
      %c0_15 = arith.constant 0 : index
      %c0_16 = arith.constant 0 : index
      %18 = vector.load %arg3[%c0_15, %c0_16] : memref<1x128xf32, #tpu.memory_space<vmem>>, vector<1x128xf32>
      tpu.vector_store %arg3[%c0_15, %c0_16], %17 {strides = array<i32>} : memref<1x128xf32, #tpu.memory_space<vmem>>, vector<1x128xf32>,
    } else {
    }
    %c0 = arith.constant 0 : index
    %c0_1 = arith.constant 0 : index
    %3 = vector.load %arg1[%c0, %c0_1] : memref<256x128xf32, #tpu.memory_space<vmem>>, vector<256x128xf32>
    %c0_2 = arith.constant 0 : index
    %c0_3 = arith.constant 0 : index
    %4 = vector.load %arg2[%c0_2, %c0_3] : memref<1x128xf32, #tpu.memory_space<vmem>>, vector<1x128xf32>
    %cst = arith.constant dense<0.000000e+00> : vector<128xf32>
    %5 = vector.multi_reduction <add>, %3, %cst [0] : vector<256x128xf32> to vector<128xf32>
    %6 = vector.shape_cast %5 : vector<128xf32> to vector<1x128xf32>
    %7 = arith.addf %4, %6 : vector<1x128xf32>
    %c0_4 = arith.constant 0 : index
    %c0_5 = arith.constant 0 : index
    %8 = vector.load %arg2[%c0_4, %c0_5] : memref<1x128xf32, #tpu.memory_space<vmem>>, vector<1x128xf32>
    tpu.vector_store %arg2[%c0_4, %c0_5], %7 {strides = array<i32>} : memref<1x128xf32, #tpu.memory_space<vmem>>, vector<1x128xf32>,
    %c0_6 = arith.constant 0 : index
    %c0_7 = arith.constant 0 : index
    %9 = vector.load %arg3[%c0_6, %c0_7] : memref<1x128xf32, #tpu.memory_space<vmem>>, vector<1x128xf32>
    %10 = arith.mulf %3, %3 : vector<256x128xf32>
    %cst_8 = arith.constant dense<0.000000e+00> : vector<128xf32>
    %11 = vector.multi_reduction <add>, %10, %cst_8 [0] : vector<256x128xf32> to vector<128xf32>
    %12 = vector.shape_cast %11 : vector<128xf32> to vector<1x128xf32>
    %13 = arith.addf %9, %12 : vector<1x128xf32>
    %c0_9 = arith.constant 0 : index
    %c0_10 = arith.constant 0 : index
    %14 = vector.load %arg3[%c0_9, %c0_10] : memref<1x128xf32, #tpu.memory_space<vmem>>, vector<1x128xf32>
    tpu.vector_store %arg3[%c0_9, %c0_10], %13 {strides = array<i32>} : memref<1x128xf32, #tpu.memory_space<vmem>>, vector<1x128xf32>,
    return
  }
  func.func @transform_0(%arg0: i32) -> (i32, i32) {
    %c0_i32 = arith.constant 0 : i32
    %c0_i32_0 = arith.constant 0 : i32
    return %arg0, %c0_i32 : i32, i32
  }
  func.func @transform_1(%arg0: i32) -> (i32, i32) {
    %c0_i32 = arith.constant 0 : i32
    %c0_i32_0 = arith.constant 0 : i32
    %c0_i32_1 = arith.constant 0 : i32
    return %c0_i32, %c0_i32_0 : i32, i32
  }
  func.func @transform_2(%arg0: i32) -> (i32, i32) {
    %c0_i32 = arith.constant 0 : i32
    %c0_i32_0 = arith.constant 0 : i32
    %c0_i32_1 = arith.constant 0 : i32
    return %c0_i32, %c0_i32_0 : i32, i32
  }
}

module attributes {stable_mosaic.version = 11 : i64} {
  func.func @kernel(%arg0: i32, %arg1: i32, %arg2: memref<1x16x16x128xf32, #tpu.memory_space<vmem>>, %arg3: memref<1x128xf32, #tpu.memory_space<vmem>>, %arg4: memref<1x128xf32, #tpu.memory_space<vmem>>, %arg5: memref<3x384x128xbf16, #tpu.memory_space<vmem>>, %arg6: memref<1x8x16x128xbf16, #tpu.memory_space<vmem>>, %arg7: memref<18x33x128xbf16, #tpu.memory_space<vmem>>, %arg8: memref<160x384xbf16, #tpu.memory_space<vmem>>, %arg9: memref<128x128xf32, #tpu.memory_space<vmem>>) attributes {dimension_semantics = [#tpu.dimension_semantics<parallel>, #tpu.dimension_semantics<arbitrary>], iteration_bounds = array<i64: 2, 2>, scalar_prefetch = 0 : i64, scratch_operands = 3 : i64, tpu.core_type = #tpu.core_type<tc>, window_params = [{transform_indices = @transform_0, window_bounds = array<i64: 1, 16, 16, 128>}, {pipeline_mode = #tpu.pipeline_mode<synchronous>, transform_indices = @transform_1, window_bounds = array<i64: 1, 128>}, {pipeline_mode = #tpu.pipeline_mode<synchronous>, transform_indices = @transform_2, window_bounds = array<i64: 1, 128>}, {pipeline_mode = #tpu.pipeline_mode<synchronous>, transform_indices = @transform_3, window_bounds = array<i64: 3, 384, 128>}, {transform_indices = @transform_4, window_bounds = array<i64: 1, 8, 16, 128>}]} {
    %c0_i32 = arith.constant 0 : i32
    %0 = arith.cmpi eq, %arg1, %c0_i32 : i32
    %1 = arith.extui %0 : i1 to i32
    %c0_i32_0 = arith.constant 0 : i32
    %2 = arith.cmpi ne, %1, %c0_i32_0 : i32
    scf.if %2 {
      %cst_37 = arith.constant 0.000000e+00 : bf16
      %41 = vector.broadcast %cst_37 : bf16 to vector<18x33x128xbf16>
      %c0_38 = arith.constant 0 : index
      %c0_39 = arith.constant 0 : index
      %c0_40 = arith.constant 0 : index
      %42 = vector.load %arg7[%c0_38, %c0_39, %c0_40] : memref<18x33x128xbf16, #tpu.memory_space<vmem>>, vector<18x33x128xbf16>
      tpu.vector_store %arg7[%c0_38, %c0_39, %c0_40], %41 {strides = array<i32>} : memref<18x33x128xbf16, #tpu.memory_space<vmem>>, vector<18x33x128xbf16>,
      %c0_41 = arith.constant 0 : index
      %c0_42 = arith.constant 0 : index
      %c0_43 = arith.constant 0 : index
      %c0_44 = arith.constant 0 : index
      %43 = vector.load %arg2[%c0_41, %c0_42, %c0_43, %c0_44] : memref<1x16x16x128xf32, #tpu.memory_space<vmem>>, vector<1x16x16x128xf32>
      %44 = vector.shape_cast %43 : vector<1x16x16x128xf32> to vector<16x16x128xf32>
      %c0_45 = arith.constant 0 : index
      %c0_46 = arith.constant 0 : index
      %45 = vector.load %arg3[%c0_45, %c0_46] : memref<1x128xf32, #tpu.memory_space<vmem>>, vector<1x128xf32>
      %46 = vector.shape_cast %45 : vector<1x128xf32> to vector<1x1x128xf32>
      %47 = vector.broadcast %46 : vector<1x1x128xf32> to vector<16x16x128xf32>
      %48 = arith.mulf %44, %47 : vector<16x16x128xf32>
      %c0_47 = arith.constant 0 : index
      %c0_48 = arith.constant 0 : index
      %49 = vector.load %arg4[%c0_47, %c0_48] : memref<1x128xf32, #tpu.memory_space<vmem>>, vector<1x128xf32>
      %50 = vector.shape_cast %49 : vector<1x128xf32> to vector<1x1x128xf32>
      %51 = vector.broadcast %50 : vector<1x1x128xf32> to vector<16x16x128xf32>
      %52 = arith.addf %48, %51 : vector<16x16x128xf32>
      %cst_49 = arith.constant 0.000000e+00 : f32
      %53 = vector.broadcast %cst_49 : f32 to vector<16x16x128xf32>
      %54 = arith.maximumf %52, %53 : vector<16x16x128xf32>
      %55 = arith.truncf %54 : vector<16x16x128xf32> to vector<16x16x128xbf16>
      %c1_50 = arith.constant 1 : index
      %c16_51 = arith.constant 16 : index
      %c0_52 = arith.constant 0 : index
      %56 = vector.load %arg7[%c1_50, %c16_51, %c0_52] : memref<18x33x128xbf16, #tpu.memory_space<vmem>>, vector<16x16x128xbf16>
      tpu.vector_store %arg7[%c1_50, %c16_51, %c0_52], %55 {strides = array<i32>} : memref<18x33x128xbf16, #tpu.memory_space<vmem>>, vector<16x16x128xbf16>,
    } else {
    }
    %c8_i32 = arith.constant 8 : i32
    %3 = arith.muli %arg1, %c8_i32 : i32
    %4 = arith.index_cast %3 : i32 to index
    %c15 = arith.constant 15 : index
    %c0 = arith.constant 0 : index
    %5 = vector.load %arg7[%4, %c15, %c0] : memref<18x33x128xbf16, #tpu.memory_space<vmem>>, vector<10x16x128xbf16>
    %6 = vector.shape_cast %5 : vector<10x16x128xbf16> to vector<160x128xbf16>
    %c0_1 = arith.constant 0 : index
    %c0_2 = arith.constant 0 : index
    %7 = vector.load %arg8[%c0_1, %c0_2] : memref<160x384xbf16, #tpu.memory_space<vmem>>, vector<160x128xbf16>
    tpu.vector_store %arg8[%c0_1, %c0_2], %6 {strides = array<i32>} : memref<160x384xbf16, #tpu.memory_space<vmem>>, vector<160x128xbf16>,
    %8 = arith.index_cast %3 : i32 to index
    %c16 = arith.constant 16 : index
    %c0_3 = arith.constant 0 : index
    %9 = vector.load %arg7[%8, %c16, %c0_3] : memref<18x33x128xbf16, #tpu.memory_space<vmem>>, vector<10x16x128xbf16>
    %10 = vector.shape_cast %9 : vector<10x16x128xbf16> to vector<160x128xbf16>
    %c0_4 = arith.constant 0 : index
    %c128 = arith.constant 128 : index
    %11 = vector.load %arg8[%c0_4, %c128] : memref<160x384xbf16, #tpu.memory_space<vmem>>, vector<160x128xbf16>
    tpu.vector_store %arg8[%c0_4, %c128], %10 {strides = array<i32>} : memref<160x384xbf16, #tpu.memory_space<vmem>>, vector<160x128xbf16>,
    %12 = arith.index_cast %3 : i32 to index
    %c17 = arith.constant 17 : index
    %c0_5 = arith.constant 0 : index
    %13 = vector.load %arg7[%12, %c17, %c0_5] : memref<18x33x128xbf16, #tpu.memory_space<vmem>>, vector<10x16x128xbf16>
    %14 = vector.shape_cast %13 : vector<10x16x128xbf16> to vector<160x128xbf16>
    %c0_6 = arith.constant 0 : index
    %c256 = arith.constant 256 : index
    %15 = vector.load %arg8[%c0_6, %c256] : memref<160x384xbf16, #tpu.memory_space<vmem>>, vector<160x128xbf16>
    tpu.vector_store %arg8[%c0_6, %c256], %14 {strides = array<i32>} : memref<160x384xbf16, #tpu.memory_space<vmem>>, vector<160x128xbf16>,
    %c0_7 = arith.constant 0 : index
    %c0_8 = arith.constant 0 : index
    %16 = vector.load %arg8[%c0_7, %c0_8] : memref<160x384xbf16, #tpu.memory_space<vmem>>, vector<128x384xbf16>
    %c0_9 = arith.constant 0 : index
    %c0_10 = arith.constant 0 : index
    %c0_11 = arith.constant 0 : index
    %17 = vector.load %arg5[%c0_9, %c0_10, %c0_11] : memref<3x384x128xbf16, #tpu.memory_space<vmem>>, vector<1x384x128xbf16>
    %18 = vector.shape_cast %17 : vector<1x384x128xbf16> to vector<384x128xbf16>
    %cst = arith.constant dense<0.000000e+00> : vector<128x128xf32>
    %19 = tpu.matmul %16, %18, %cst {dimension_numbers = #tpu.dot_dimension_numbers<[1], [0], [0], [1], [0, 0, 1, 1], [], []>} : vector<128x384xbf16>, vector<384x128xbf16>, vector<128x128xf32> -> vector<128x128xf32>
    %c0_12 = arith.constant 0 : index
    %c0_13 = arith.constant 0 : index
    %20 = vector.load %arg9[%c0_12, %c0_13] : memref<128x128xf32, #tpu.memory_space<vmem>>, vector<128x128xf32>
    tpu.vector_store %arg9[%c0_12, %c0_13], %19 {strides = array<i32>} : memref<128x128xf32, #tpu.memory_space<vmem>>, vector<128x128xf32>,
    %c16_14 = arith.constant 16 : index
    %c0_15 = arith.constant 0 : index
    %21 = vector.load %arg8[%c16_14, %c0_15] : memref<160x384xbf16, #tpu.memory_space<vmem>>, vector<128x384xbf16>
    %c1 = arith.constant 1 : index
    %c0_16 = arith.constant 0 : index
    %c0_17 = arith.constant 0 : index
    %22 = vector.load %arg5[%c1, %c0_16, %c0_17] : memref<3x384x128xbf16, #tpu.memory_space<vmem>>, vector<1x384x128xbf16>
    %23 = vector.shape_cast %22 : vector<1x384x128xbf16> to vector<384x128xbf16>
    %cst_18 = arith.constant dense<0.000000e+00> : vector<128x128xf32>
    %24 = tpu.matmul %21, %23, %cst_18 {dimension_numbers = #tpu.dot_dimension_numbers<[1], [0], [0], [1], [0, 0, 1, 1], [], []>} : vector<128x384xbf16>, vector<384x128xbf16>, vector<128x128xf32> -> vector<128x128xf32>
    %c0_19 = arith.constant 0 : index
    %c0_20 = arith.constant 0 : index
    %25 = vector.load %arg9[%c0_19, %c0_20] : memref<128x128xf32, #tpu.memory_space<vmem>>, vector<128x128xf32>
    %26 = arith.addf %25, %24 : vector<128x128xf32>
    %c0_21 = arith.constant 0 : index
    %c0_22 = arith.constant 0 : index
    %27 = vector.load %arg9[%c0_21, %c0_22] : memref<128x128xf32, #tpu.memory_space<vmem>>, vector<128x128xf32>
    tpu.vector_store %arg9[%c0_21, %c0_22], %26 {strides = array<i32>} : memref<128x128xf32, #tpu.memory_space<vmem>>, vector<128x128xf32>,
    %c32 = arith.constant 32 : index
    %c0_23 = arith.constant 0 : index
    %28 = vector.load %arg8[%c32, %c0_23] : memref<160x384xbf16, #tpu.memory_space<vmem>>, vector<128x384xbf16>
    %c2 = arith.constant 2 : index
    %c0_24 = arith.constant 0 : index
    %c0_25 = arith.constant 0 : index
    %29 = vector.load %arg5[%c2, %c0_24, %c0_25] : memref<3x384x128xbf16, #tpu.memory_space<vmem>>, vector<1x384x128xbf16>
    %30 = vector.shape_cast %29 : vector<1x384x128xbf16> to vector<384x128xbf16>
    %cst_26 = arith.constant dense<0.000000e+00> : vector<128x128xf32>
    %31 = tpu.matmul %28, %30, %cst_26 {dimension_numbers = #tpu.dot_dimension_numbers<[1], [0], [0], [1], [0, 0, 1, 1], [], []>} : vector<128x384xbf16>, vector<384x128xbf16>, vector<128x128xf32> -> vector<128x128xf32>
    %c0_27 = arith.constant 0 : index
    %c0_28 = arith.constant 0 : index
    %32 = vector.load %arg9[%c0_27, %c0_28] : memref<128x128xf32, #tpu.memory_space<vmem>>, vector<128x128xf32>
    %33 = arith.addf %32, %31 : vector<128x128xf32>
    %c0_29 = arith.constant 0 : index
    %c0_30 = arith.constant 0 : index
    %34 = vector.load %arg9[%c0_29, %c0_30] : memref<128x128xf32, #tpu.memory_space<vmem>>, vector<128x128xf32>
    tpu.vector_store %arg9[%c0_29, %c0_30], %33 {strides = array<i32>} : memref<128x128xf32, #tpu.memory_space<vmem>>, vector<128x128xf32>,
    %c0_31 = arith.constant 0 : index
    %c0_32 = arith.constant 0 : index
    %35 = vector.load %arg9[%c0_31, %c0_32] : memref<128x128xf32, #tpu.memory_space<vmem>>, vector<128x128xf32>
    %36 = vector.shape_cast %35 : vector<128x128xf32> to vector<8x16x128xf32>
    %37 = arith.truncf %36 : vector<8x16x128xf32> to vector<8x16x128xbf16>
    %c0_33 = arith.constant 0 : index
    %c0_34 = arith.constant 0 : index
    %c0_35 = arith.constant 0 : index
    %c0_36 = arith.constant 0 : index
    %38 = vector.load %arg6[%c0_33, %c0_34, %c0_35, %c0_36] : memref<1x8x16x128xbf16, #tpu.memory_space<vmem>>, vector<1x8x16x128xbf16>
    %39 = vector.shape_cast %38 : vector<1x8x16x128xbf16> to vector<8x16x128xbf16>
    %40 = vector.shape_cast %37 : vector<8x16x128xbf16> to vector<1x8x16x128xbf16>
    tpu.vector_store %arg6[%c0_33, %c0_34, %c0_35, %c0_36], %40 {strides = array<i32>} : memref<1x8x16x128xbf16, #tpu.memory_space<vmem>>, vector<1x8x16x128xbf16>,
    return
  }
  func.func @transform_0(%arg0: i32, %arg1: i32) -> (i32, i32, i32, i32) {
    %c0_i32 = arith.constant 0 : i32
    %c0_i32_0 = arith.constant 0 : i32
    %c0_i32_1 = arith.constant 0 : i32
    %c0_i32_2 = arith.constant 0 : i32
    return %arg0, %c0_i32, %c0_i32_0, %c0_i32_1 : i32, i32, i32, i32
  }
  func.func @transform_1(%arg0: i32, %arg1: i32) -> (i32, i32) {
    %c0_i32 = arith.constant 0 : i32
    %c0_i32_0 = arith.constant 0 : i32
    %c0_i32_1 = arith.constant 0 : i32
    return %c0_i32, %c0_i32_0 : i32, i32
  }
  func.func @transform_2(%arg0: i32, %arg1: i32) -> (i32, i32) {
    %c0_i32 = arith.constant 0 : i32
    %c0_i32_0 = arith.constant 0 : i32
    %c0_i32_1 = arith.constant 0 : i32
    return %c0_i32, %c0_i32_0 : i32, i32
  }
  func.func @transform_3(%arg0: i32, %arg1: i32) -> (i32, i32, i32) {
    %c0_i32 = arith.constant 0 : i32
    %c0_i32_0 = arith.constant 0 : i32
    %c0_i32_1 = arith.constant 0 : i32
    %c0_i32_2 = arith.constant 0 : i32
    return %c0_i32, %c0_i32_0, %c0_i32_1 : i32, i32, i32
  }
  func.func @transform_4(%arg0: i32, %arg1: i32) -> (i32, i32, i32, i32) {
    %c0_i32 = arith.constant 0 : i32
    %c0_i32_0 = arith.constant 0 : i32
    %c0_i32_1 = arith.constant 0 : i32
    return %arg0, %arg1, %c0_i32, %c0_i32_0 : i32, i32, i32, i32
  }
}

module attributes {stable_mosaic.version = 11 : i64} {
  func.func @_bn_stats_kernel(%arg0: i32, %arg1: memref<256x128xbf16, #tpu.memory_space<vmem>>, %arg2: memref<1x128xf32, #tpu.memory_space<vmem>>, %arg3: memref<1x128xf32, #tpu.memory_space<vmem>>) attributes {dimension_semantics = [#tpu.dimension_semantics<arbitrary>], iteration_bounds = array<i64: 2>, scalar_prefetch = 0 : i64, scratch_operands = 0 : i64, tpu.core_type = #tpu.core_type<tc>, window_params = [{transform_indices = @transform_0, window_bounds = array<i64: 256, 128>}, {pipeline_mode = #tpu.pipeline_mode<synchronous>, transform_indices = @transform_1, window_bounds = array<i64: 1, 128>}, {pipeline_mode = #tpu.pipeline_mode<synchronous>, transform_indices = @transform_2, window_bounds = array<i64: 1, 128>}]} {
    %c0_i32 = arith.constant 0 : i32
    %0 = arith.cmpi eq, %arg0, %c0_i32 : i32
    %1 = arith.extui %0 : i1 to i32
    %c0_i32_0 = arith.constant 0 : i32
    %2 = arith.cmpi ne, %1, %c0_i32_0 : i32
    scf.if %2 {
      %cst_11 = arith.constant 0.000000e+00 : f32
      %16 = vector.broadcast %cst_11 : f32 to vector<1x128xf32>
      %c0_12 = arith.constant 0 : index
      %c0_13 = arith.constant 0 : index
      %17 = vector.load %arg2[%c0_12, %c0_13] : memref<1x128xf32, #tpu.memory_space<vmem>>, vector<1x128xf32>
      tpu.vector_store %arg2[%c0_12, %c0_13], %16 {strides = array<i32>} : memref<1x128xf32, #tpu.memory_space<vmem>>, vector<1x128xf32>,
      %cst_14 = arith.constant 0.000000e+00 : f32
      %18 = vector.broadcast %cst_14 : f32 to vector<1x128xf32>
      %c0_15 = arith.constant 0 : index
      %c0_16 = arith.constant 0 : index
      %19 = vector.load %arg3[%c0_15, %c0_16] : memref<1x128xf32, #tpu.memory_space<vmem>>, vector<1x128xf32>
      tpu.vector_store %arg3[%c0_15, %c0_16], %18 {strides = array<i32>} : memref<1x128xf32, #tpu.memory_space<vmem>>, vector<1x128xf32>,
    } else {
    }
    %c0 = arith.constant 0 : index
    %c0_1 = arith.constant 0 : index
    %3 = vector.load %arg1[%c0, %c0_1] : memref<256x128xbf16, #tpu.memory_space<vmem>>, vector<256x128xbf16>
    %4 = arith.extf %3 : vector<256x128xbf16> to vector<256x128xf32>
    %c0_2 = arith.constant 0 : index
    %c0_3 = arith.constant 0 : index
    %5 = vector.load %arg2[%c0_2, %c0_3] : memref<1x128xf32, #tpu.memory_space<vmem>>, vector<1x128xf32>
    %cst = arith.constant dense<0.000000e+00> : vector<128xf32>
    %6 = vector.multi_reduction <add>, %4, %cst [0] : vector<256x128xf32> to vector<128xf32>
    %7 = vector.shape_cast %6 : vector<128xf32> to vector<1x128xf32>
    %8 = arith.addf %5, %7 : vector<1x128xf32>
    %c0_4 = arith.constant 0 : index
    %c0_5 = arith.constant 0 : index
    %9 = vector.load %arg2[%c0_4, %c0_5] : memref<1x128xf32, #tpu.memory_space<vmem>>, vector<1x128xf32>
    tpu.vector_store %arg2[%c0_4, %c0_5], %8 {strides = array<i32>} : memref<1x128xf32, #tpu.memory_space<vmem>>, vector<1x128xf32>,
    %c0_6 = arith.constant 0 : index
    %c0_7 = arith.constant 0 : index
    %10 = vector.load %arg3[%c0_6, %c0_7] : memref<1x128xf32, #tpu.memory_space<vmem>>, vector<1x128xf32>
    %11 = arith.mulf %4, %4 : vector<256x128xf32>
    %cst_8 = arith.constant dense<0.000000e+00> : vector<128xf32>
    %12 = vector.multi_reduction <add>, %11, %cst_8 [0] : vector<256x128xf32> to vector<128xf32>
    %13 = vector.shape_cast %12 : vector<128xf32> to vector<1x128xf32>
    %14 = arith.addf %10, %13 : vector<1x128xf32>
    %c0_9 = arith.constant 0 : index
    %c0_10 = arith.constant 0 : index
    %15 = vector.load %arg3[%c0_9, %c0_10] : memref<1x128xf32, #tpu.memory_space<vmem>>, vector<1x128xf32>
    tpu.vector_store %arg3[%c0_9, %c0_10], %14 {strides = array<i32>} : memref<1x128xf32, #tpu.memory_space<vmem>>, vector<1x128xf32>,
    return
  }
  func.func @transform_0(%arg0: i32) -> (i32, i32) {
    %c0_i32 = arith.constant 0 : i32
    %c0_i32_0 = arith.constant 0 : i32
    return %arg0, %c0_i32 : i32, i32
  }
  func.func @transform_1(%arg0: i32) -> (i32, i32) {
    %c0_i32 = arith.constant 0 : i32
    %c0_i32_0 = arith.constant 0 : i32
    %c0_i32_1 = arith.constant 0 : i32
    return %c0_i32, %c0_i32_0 : i32, i32
  }
  func.func @transform_2(%arg0: i32) -> (i32, i32) {
    %c0_i32 = arith.constant 0 : i32
    %c0_i32_0 = arith.constant 0 : i32
    %c0_i32_1 = arith.constant 0 : i32
    return %c0_i32, %c0_i32_0 : i32, i32
  }
}

module attributes {stable_mosaic.version = 11 : i64} {
  func.func @kernel(%arg0: i32, %arg1: i32, %arg2: memref<1x16x16x128xbf16, #tpu.memory_space<vmem>>, %arg3: memref<1x128xf32, #tpu.memory_space<vmem>>, %arg4: memref<1x128xf32, #tpu.memory_space<vmem>>, %arg5: memref<3x384x128xbf16, #tpu.memory_space<vmem>>, %arg6: memref<1x8x16x128xf32, #tpu.memory_space<vmem>>, %arg7: memref<1x8x16x128xf32, #tpu.memory_space<vmem>>, %arg8: memref<18x33x128xbf16, #tpu.memory_space<vmem>>, %arg9: memref<160x384xbf16, #tpu.memory_space<vmem>>, %arg10: memref<128x128xf32, #tpu.memory_space<vmem>>) attributes {dimension_semantics = [#tpu.dimension_semantics<parallel>, #tpu.dimension_semantics<arbitrary>], iteration_bounds = array<i64: 2, 2>, scalar_prefetch = 0 : i64, scratch_operands = 3 : i64, tpu.core_type = #tpu.core_type<tc>, window_params = [{transform_indices = @transform_0, window_bounds = array<i64: 1, 16, 16, 128>}, {pipeline_mode = #tpu.pipeline_mode<synchronous>, transform_indices = @transform_1, window_bounds = array<i64: 1, 128>}, {pipeline_mode = #tpu.pipeline_mode<synchronous>, transform_indices = @transform_2, window_bounds = array<i64: 1, 128>}, {pipeline_mode = #tpu.pipeline_mode<synchronous>, transform_indices = @transform_3, window_bounds = array<i64: 3, 384, 128>}, {transform_indices = @transform_4, window_bounds = array<i64: 1, 8, 16, 128>}, {transform_indices = @transform_5, window_bounds = array<i64: 1, 8, 16, 128>}]} {
    %c0_i32 = arith.constant 0 : i32
    %0 = arith.cmpi eq, %arg1, %c0_i32 : i32
    %1 = arith.extui %0 : i1 to i32
    %c0_i32_0 = arith.constant 0 : i32
    %2 = arith.cmpi ne, %1, %c0_i32_0 : i32
    scf.if %2 {
      %cst_41 = arith.constant 0.000000e+00 : bf16
      %43 = vector.broadcast %cst_41 : bf16 to vector<18x33x128xbf16>
      %c0_42 = arith.constant 0 : index
      %c0_43 = arith.constant 0 : index
      %c0_44 = arith.constant 0 : index
      %44 = vector.load %arg8[%c0_42, %c0_43, %c0_44] : memref<18x33x128xbf16, #tpu.memory_space<vmem>>, vector<18x33x128xbf16>
      tpu.vector_store %arg8[%c0_42, %c0_43, %c0_44], %43 {strides = array<i32>} : memref<18x33x128xbf16, #tpu.memory_space<vmem>>, vector<18x33x128xbf16>,
      %c0_45 = arith.constant 0 : index
      %c0_46 = arith.constant 0 : index
      %c0_47 = arith.constant 0 : index
      %c0_48 = arith.constant 0 : index
      %45 = vector.load %arg2[%c0_45, %c0_46, %c0_47, %c0_48] : memref<1x16x16x128xbf16, #tpu.memory_space<vmem>>, vector<1x16x16x128xbf16>
      %46 = vector.shape_cast %45 : vector<1x16x16x128xbf16> to vector<16x16x128xbf16>
      %47 = arith.extf %46 : vector<16x16x128xbf16> to vector<16x16x128xf32>
      %c0_49 = arith.constant 0 : index
      %c0_50 = arith.constant 0 : index
      %48 = vector.load %arg3[%c0_49, %c0_50] : memref<1x128xf32, #tpu.memory_space<vmem>>, vector<1x128xf32>
      %49 = vector.shape_cast %48 : vector<1x128xf32> to vector<1x1x128xf32>
      %50 = vector.broadcast %49 : vector<1x1x128xf32> to vector<16x16x128xf32>
      %51 = arith.mulf %47, %50 : vector<16x16x128xf32>
      %c0_51 = arith.constant 0 : index
      %c0_52 = arith.constant 0 : index
      %52 = vector.load %arg4[%c0_51, %c0_52] : memref<1x128xf32, #tpu.memory_space<vmem>>, vector<1x128xf32>
      %53 = vector.shape_cast %52 : vector<1x128xf32> to vector<1x1x128xf32>
      %54 = vector.broadcast %53 : vector<1x1x128xf32> to vector<16x16x128xf32>
      %55 = arith.addf %51, %54 : vector<16x16x128xf32>
      %cst_53 = arith.constant 0.000000e+00 : f32
      %56 = vector.broadcast %cst_53 : f32 to vector<16x16x128xf32>
      %57 = arith.maximumf %55, %56 : vector<16x16x128xf32>
      %58 = arith.truncf %57 : vector<16x16x128xf32> to vector<16x16x128xbf16>
      %c1_54 = arith.constant 1 : index
      %c16_55 = arith.constant 16 : index
      %c0_56 = arith.constant 0 : index
      %59 = vector.load %arg8[%c1_54, %c16_55, %c0_56] : memref<18x33x128xbf16, #tpu.memory_space<vmem>>, vector<16x16x128xbf16>
      tpu.vector_store %arg8[%c1_54, %c16_55, %c0_56], %58 {strides = array<i32>} : memref<18x33x128xbf16, #tpu.memory_space<vmem>>, vector<16x16x128xbf16>,
    } else {
    }
    %c8_i32 = arith.constant 8 : i32
    %3 = arith.muli %arg1, %c8_i32 : i32
    %4 = arith.index_cast %3 : i32 to index
    %c15 = arith.constant 15 : index
    %c0 = arith.constant 0 : index
    %5 = vector.load %arg8[%4, %c15, %c0] : memref<18x33x128xbf16, #tpu.memory_space<vmem>>, vector<10x16x128xbf16>
    %6 = vector.shape_cast %5 : vector<10x16x128xbf16> to vector<160x128xbf16>
    %c0_1 = arith.constant 0 : index
    %c0_2 = arith.constant 0 : index
    %7 = vector.load %arg9[%c0_1, %c0_2] : memref<160x384xbf16, #tpu.memory_space<vmem>>, vector<160x128xbf16>
    tpu.vector_store %arg9[%c0_1, %c0_2], %6 {strides = array<i32>} : memref<160x384xbf16, #tpu.memory_space<vmem>>, vector<160x128xbf16>,
    %8 = arith.index_cast %3 : i32 to index
    %c16 = arith.constant 16 : index
    %c0_3 = arith.constant 0 : index
    %9 = vector.load %arg8[%8, %c16, %c0_3] : memref<18x33x128xbf16, #tpu.memory_space<vmem>>, vector<10x16x128xbf16>
    %10 = vector.shape_cast %9 : vector<10x16x128xbf16> to vector<160x128xbf16>
    %c0_4 = arith.constant 0 : index
    %c128 = arith.constant 128 : index
    %11 = vector.load %arg9[%c0_4, %c128] : memref<160x384xbf16, #tpu.memory_space<vmem>>, vector<160x128xbf16>
    tpu.vector_store %arg9[%c0_4, %c128], %10 {strides = array<i32>} : memref<160x384xbf16, #tpu.memory_space<vmem>>, vector<160x128xbf16>,
    %12 = arith.index_cast %3 : i32 to index
    %c17 = arith.constant 17 : index
    %c0_5 = arith.constant 0 : index
    %13 = vector.load %arg8[%12, %c17, %c0_5] : memref<18x33x128xbf16, #tpu.memory_space<vmem>>, vector<10x16x128xbf16>
    %14 = vector.shape_cast %13 : vector<10x16x128xbf16> to vector<160x128xbf16>
    %c0_6 = arith.constant 0 : index
    %c256 = arith.constant 256 : index
    %15 = vector.load %arg9[%c0_6, %c256] : memref<160x384xbf16, #tpu.memory_space<vmem>>, vector<160x128xbf16>
    tpu.vector_store %arg9[%c0_6, %c256], %14 {strides = array<i32>} : memref<160x384xbf16, #tpu.memory_space<vmem>>, vector<160x128xbf16>,
    %c0_7 = arith.constant 0 : index
    %c0_8 = arith.constant 0 : index
    %16 = vector.load %arg9[%c0_7, %c0_8] : memref<160x384xbf16, #tpu.memory_space<vmem>>, vector<128x384xbf16>
    %c0_9 = arith.constant 0 : index
    %c0_10 = arith.constant 0 : index
    %c0_11 = arith.constant 0 : index
    %17 = vector.load %arg5[%c0_9, %c0_10, %c0_11] : memref<3x384x128xbf16, #tpu.memory_space<vmem>>, vector<1x384x128xbf16>
    %18 = vector.shape_cast %17 : vector<1x384x128xbf16> to vector<384x128xbf16>
    %cst = arith.constant dense<0.000000e+00> : vector<128x128xf32>
    %19 = tpu.matmul %16, %18, %cst {dimension_numbers = #tpu.dot_dimension_numbers<[1], [0], [0], [1], [0, 0, 1, 1], [], []>} : vector<128x384xbf16>, vector<384x128xbf16>, vector<128x128xf32> -> vector<128x128xf32>
    %c0_12 = arith.constant 0 : index
    %c0_13 = arith.constant 0 : index
    %20 = vector.load %arg10[%c0_12, %c0_13] : memref<128x128xf32, #tpu.memory_space<vmem>>, vector<128x128xf32>
    tpu.vector_store %arg10[%c0_12, %c0_13], %19 {strides = array<i32>} : memref<128x128xf32, #tpu.memory_space<vmem>>, vector<128x128xf32>,
    %c16_14 = arith.constant 16 : index
    %c0_15 = arith.constant 0 : index
    %21 = vector.load %arg9[%c16_14, %c0_15] : memref<160x384xbf16, #tpu.memory_space<vmem>>, vector<128x384xbf16>
    %c1 = arith.constant 1 : index
    %c0_16 = arith.constant 0 : index
    %c0_17 = arith.constant 0 : index
    %22 = vector.load %arg5[%c1, %c0_16, %c0_17] : memref<3x384x128xbf16, #tpu.memory_space<vmem>>, vector<1x384x128xbf16>
    %23 = vector.shape_cast %22 : vector<1x384x128xbf16> to vector<384x128xbf16>
    %cst_18 = arith.constant dense<0.000000e+00> : vector<128x128xf32>
    %24 = tpu.matmul %21, %23, %cst_18 {dimension_numbers = #tpu.dot_dimension_numbers<[1], [0], [0], [1], [0, 0, 1, 1], [], []>} : vector<128x384xbf16>, vector<384x128xbf16>, vector<128x128xf32> -> vector<128x128xf32>
    %c0_19 = arith.constant 0 : index
    %c0_20 = arith.constant 0 : index
    %25 = vector.load %arg10[%c0_19, %c0_20] : memref<128x128xf32, #tpu.memory_space<vmem>>, vector<128x128xf32>
    %26 = arith.addf %25, %24 : vector<128x128xf32>
    %c0_21 = arith.constant 0 : index
    %c0_22 = arith.constant 0 : index
    %27 = vector.load %arg10[%c0_21, %c0_22] : memref<128x128xf32, #tpu.memory_space<vmem>>, vector<128x128xf32>
    tpu.vector_store %arg10[%c0_21, %c0_22], %26 {strides = array<i32>} : memref<128x128xf32, #tpu.memory_space<vmem>>, vector<128x128xf32>,
    %c32 = arith.constant 32 : index
    %c0_23 = arith.constant 0 : index
    %28 = vector.load %arg9[%c32, %c0_23] : memref<160x384xbf16, #tpu.memory_space<vmem>>, vector<128x384xbf16>
    %c2 = arith.constant 2 : index
    %c0_24 = arith.constant 0 : index
    %c0_25 = arith.constant 0 : index
    %29 = vector.load %arg5[%c2, %c0_24, %c0_25] : memref<3x384x128xbf16, #tpu.memory_space<vmem>>, vector<1x384x128xbf16>
    %30 = vector.shape_cast %29 : vector<1x384x128xbf16> to vector<384x128xbf16>
    %cst_26 = arith.constant dense<0.000000e+00> : vector<128x128xf32>
    %31 = tpu.matmul %28, %30, %cst_26 {dimension_numbers = #tpu.dot_dimension_numbers<[1], [0], [0], [1], [0, 0, 1, 1], [], []>} : vector<128x384xbf16>, vector<384x128xbf16>, vector<128x128xf32> -> vector<128x128xf32>
    %c0_27 = arith.constant 0 : index
    %c0_28 = arith.constant 0 : index
    %32 = vector.load %arg10[%c0_27, %c0_28] : memref<128x128xf32, #tpu.memory_space<vmem>>, vector<128x128xf32>
    %33 = arith.addf %32, %31 : vector<128x128xf32>
    %c0_29 = arith.constant 0 : index
    %c0_30 = arith.constant 0 : index
    %34 = vector.load %arg10[%c0_29, %c0_30] : memref<128x128xf32, #tpu.memory_space<vmem>>, vector<128x128xf32>
    tpu.vector_store %arg10[%c0_29, %c0_30], %33 {strides = array<i32>} : memref<128x128xf32, #tpu.memory_space<vmem>>, vector<128x128xf32>,
    %c0_31 = arith.constant 0 : index
    %c0_32 = arith.constant 0 : index
    %35 = vector.load %arg10[%c0_31, %c0_32] : memref<128x128xf32, #tpu.memory_space<vmem>>, vector<128x128xf32>
    %36 = vector.shape_cast %35 : vector<128x128xf32> to vector<8x16x128xf32>
    %c0_33 = arith.constant 0 : index
    %c0_34 = arith.constant 0 : index
    %c0_35 = arith.constant 0 : index
    %c0_36 = arith.constant 0 : index
    %37 = vector.load %arg6[%c0_33, %c0_34, %c0_35, %c0_36] : memref<1x8x16x128xf32, #tpu.memory_space<vmem>>, vector<1x8x16x128xf32>
    %38 = vector.shape_cast %37 : vector<1x8x16x128xf32> to vector<8x16x128xf32>
    %39 = arith.addf %36, %38 : vector<8x16x128xf32>
    %c0_37 = arith.constant 0 : index
    %c0_38 = arith.constant 0 : index
    %c0_39 = arith.constant 0 : index
    %c0_40 = arith.constant 0 : index
    %40 = vector.load %arg7[%c0_37, %c0_38, %c0_39, %c0_40] : memref<1x8x16x128xf32, #tpu.memory_space<vmem>>, vector<1x8x16x128xf32>
    %41 = vector.shape_cast %40 : vector<1x8x16x128xf32> to vector<8x16x128xf32>
    %42 = vector.shape_cast %39 : vector<8x16x128xf32> to vector<1x8x16x128xf32>
    tpu.vector_store %arg7[%c0_37, %c0_38, %c0_39, %c0_40], %42 {strides = array<i32>} : memref<1x8x16x128xf32, #tpu.memory_space<vmem>>, vector<1x8x16x128xf32>,
    return
  }
  func.func @transform_0(%arg0: i32, %arg1: i32) -> (i32, i32, i32, i32) {
    %c0_i32 = arith.constant 0 : i32
    %c0_i32_0 = arith.constant 0 : i32
    %c0_i32_1 = arith.constant 0 : i32
    %c0_i32_2 = arith.constant 0 : i32
    return %arg0, %c0_i32, %c0_i32_0, %c0_i32_1 : i32, i32, i32, i32
  }
  func.func @transform_1(%arg0: i32, %arg1: i32) -> (i32, i32) {
    %c0_i32 = arith.constant 0 : i32
    %c0_i32_0 = arith.constant 0 : i32
    %c0_i32_1 = arith.constant 0 : i32
    return %c0_i32, %c0_i32_0 : i32, i32
  }
  func.func @transform_2(%arg0: i32, %arg1: i32) -> (i32, i32) {
    %c0_i32 = arith.constant 0 : i32
    %c0_i32_0 = arith.constant 0 : i32
    %c0_i32_1 = arith.constant 0 : i32
    return %c0_i32, %c0_i32_0 : i32, i32
  }
  func.func @transform_3(%arg0: i32, %arg1: i32) -> (i32, i32, i32) {
    %c0_i32 = arith.constant 0 : i32
    %c0_i32_0 = arith.constant 0 : i32
    %c0_i32_1 = arith.constant 0 : i32
    %c0_i32_2 = arith.constant 0 : i32
    return %c0_i32, %c0_i32_0, %c0_i32_1 : i32, i32, i32
  }
  func.func @transform_4(%arg0: i32, %arg1: i32) -> (i32, i32, i32, i32) {
    %c0_i32 = arith.constant 0 : i32
    %c0_i32_0 = arith.constant 0 : i32
    %c0_i32_1 = arith.constant 0 : i32
    return %arg0, %arg1, %c0_i32, %c0_i32_0 : i32, i32, i32, i32
  }
  func.func @transform_5(%arg0: i32, %arg1: i32) -> (i32, i32, i32, i32) {
    %c0_i32 = arith.constant 0 : i32
    %c0_i32_0 = arith.constant 0 : i32
    %c0_i32_1 = arith.constant 0 : i32
    return %arg0, %arg1, %c0_i32, %c0_i32_0 : i32, i32, i32, i32
  }
}

</mosaic_0001>

<bundles_post_ra>
// kernel: basic_block_forward.4
= control target key start
LH: loop header
LB: loop body
LE: loop exit
PB: predicated region body
PF: predicated region fallthrough
CT: control target
= control target key end

     0   :  { %8 = vsyncpa [#allocation3], 0  ;;  %s638_s0 = inlined_call_operand.hbm [shape: f32[512,128], index: 0, kind: input, shape index: {}]   ;;  %s639_s1 = inlined_call_operand.vmem [shape: f32[1,128], index: 1, kind: output, shape index: {0}]   ;;  %s640_s2 = inlined_call_operand.vmem [shape: f32[1,128], index: 2, kind: output, shape index: {1}]  }
   0x1   :  { %10 = vsyncpa [#allocation3 + $0x1], 0  ;;  %s482_s9 = smov 0   ;;  %s484_s10 = smov 0  }
   0x2   :  { %s486_s11 = smov 0   ;;  %s488_s12 = smov 0  }
   0x3 LB: > { %s343_s13 = sadd.s32 4294967295, %s461_s12   ;;  %s502_s14 = sadd.s32 1, %s461_s12   ;;  %s461_s12 = sphi %s488_s12, %s647_s12   ;;  %s457_s11 = sphi %s486_s11, %s646_s11   ;;  %s453_s10 = sphi %s484_s10, %s645_s10   ;;  %s449_s9 = sphi %s482_s9, %s644_s9  }
   0x4   : > { %s20_s15 = ssub.s32 %s461_s12, %s502_s14  ;;  %s23_s16 = sadd.s32 1, %s457_s11 }
   0x5   : > { %p21_p0 = scmp.eq.s32.totalorder %s20_s15, 0  ;;  %p30_p1 = scmp.ne.s32.totalorder %s457_s11, %s453_s10 }
   0x6   : > { %p31_p2 = scmp.eq.s32.totalorder %s461_s12, 0  ;;  %p36_p3 = scmp.ne.s32.totalorder %s453_s10, %s449_s9 }
   0x7   : > { %s512_s17 = scalar_select %p21_p0, %s457_s11, %s23_s16  }
   0x8   : > { %p32_p4 = por %p31_p2, %p30_p1  ;;  %p37_p5 = scmp.eq.s32.totalorder %s343_s13, 0 }
   0x9   : > { %p361_p6 = scmp.lt.s32.totalorder %s461_s12, 2  ;;  %s102_s19 = sand.u32 1, %s457_s11  }
   0xa   : > { %p517_p7 = por %p37_p5, %p36_p3  ;;  %s346_s20 = sshll.u32 %s102_s19, 8 }
   0xb   : > { %s354_s21 = sshll.u32 %s461_s12, 12  ;;  %s106_s25 = scalar_lea.vmem [#allocation2], %s346_s20 }
   0xc   : > { %s526_s24 = scalar_lea.hbm %s638_s0, %s354_s21  ;;  %s113_s26 = sshll.u32 %s106_s25, 4  ;;  %s528_s26 = int_to_ptr.vmem [resolvable:$true] %s113_s26 }
   0xd   : > { %p530_p8 = pnand %p361_p6, %p32_p4  ;;  %s535_s28 = scalar_lea.sflag [#allocation3], %s102_s19 }
   0xe   : > { %s397_s29 = scalar_lea.hbm %s526_s24, 4096  ;;  %s402_s4 = scalar_lea.hbm %s638_s0, 8192 }
   0xf   : > { %p398_p10 = scmp.ne.s32.totalorder %s526_s24, %s397_s29  ;;  %p399_p11 = pneg %p530_p8 }
  0x10   : > { %p403_p0 = scmp.lt.u32.totalorder %s526_s24, %s638_s0  ;;  %p404_p1 = scmp.lt.u32.totalorder %s402_s4, %s397_s29 }
  0x11   : > { %p400_p12 = pnand %p399_p11, %p398_p10  ;;  %p406_p3 = scmp.lt.u32.totalorder %s397_s29, %s526_s24 }
  0x12   : > { %p405_p2 = por %p404_p1, %p403_p0 }
  0x13   : > { %p401_p13 = pneg %p400_p12 }
  0x14   : > { %p407_p4 = por %p406_p3, %p405_p2 }
  0x16   : > { %p408_p5 = pnand %p407_p4, %p401_p13 }
  0x18   : > { %411 = shalt.err (!%p408_p5)
}
  0x19   : > { %s412_s7 = scalar_lea.vmem %s528_s26, 4096  ;;  %s463_s8 = smov [#allocation2]  }
  0x1a   : > { %p413_p6 = scmp.ne.s32.totalorder %s528_s26, %s412_s7  ;;  %s417_s9 = sshll.u32 %s463_s8, 4  ;;  %s418_s9 = int_to_ptr.vmem [resolvable:$false] %s417_s9 }
  0x1b   : > { %s419_s15 = scalar_lea.vmem %s418_s9, 8192  ;;  %p420_p9 = scmp.lt.s32.totalorder %s528_s26, %s418_s9 }
  0x1c   : > { %p415_p10 = pnand %p413_p6, %p399_p11  ;;  %p421_p0 = scmp.lt.s32.totalorder %s419_s15, %s412_s7 }
  0x1e   : > { %p416_p12 = pneg %p415_p10  ;;  %p422_p1 = por %p421_p0, %p420_p9 }
  0x20   : > { %p423_p2 = pnand %p422_p1, %p416_p12 }
  0x22   : > { %426 = shalt.err (!%p423_p2)
}
  0x23   : > { %s464_s16 = smov 128   ;;  %s465_s19 = smov 8  }
  0x24   : > { %360 = dma.hbm_to_vmem [thread:$0]  (!%p530_p8), %s526_s24, 4096, %s528_s26, %s535_s28, %s464_s16, %s464_s16, %s465_s19  }
  0x25   : > { %p121_p11 = scmp.lt.s32.totalorder %s461_s12, 3  ;;  %p643_p13 = scmp.ge.s32.totalorder %s461_s12, 1 }
  0x27   : > { %p122_p3 = pnand %p643_p13, %p121_p11 }
  0x28   : > { %s127_s20 = sand.u32 (!%p122_p3), 1, %s453_s10  }
  0x29   : > { %125 = sbr.rel (%p122_p3) target bundleno = 138 (0x8a), region = 24  ;;  %s350_s21 = sshll.u32 (!%p122_p3), %s127_s20, 8 }
  0x2a   : > { %s128_s22 = scalar_lea.sflag (!%p122_p3), [#allocation3], %s127_s20  ;;  %s567_s23 = scalar_lea.vmem (!%p122_p3), [#allocation2], %s350_s21 }
  0x30   : > { %444 = dma.done.wait (%p517_p7), %s128_s22, 4096  }
  0x31   : > { %446 = vsyncadd (%p517_p7), %s128_s22, 4294963200  ;;  %p351_p9 = scmp.ne.s32.totalorder %s343_s13, 0 }
  0x32   : > { %v466_v0 = vmov (!%p351_p9), 0.0  }
  0x33   : > { %151 = sbr.rel (%p351_p9) target bundleno = 58 (0x3a), region = 32  ;;  %152 = vst [vmem:[%s639_s1] sm:$0x1] (!%p351_p9), %v466_v0  ;;  %153 = vst [vmem:[%s640_s2] sm:$0x1] (!%p351_p9), %v466_v0 }
  0x3a PF: > { %v154_v1 = vld [vmem:[%s567_s23] sm:$0xff]  ;;  %v155_v2 = vld [vmem:[%s567_s23 + $0x8] sm:$0xff]  ;;  %v156_v3 = vld [vmem:[%s567_s23 + $0x10] sm:$0xff] }
  0x3b   : > { %v157_v4 = vld [vmem:[%s567_s23 + $0x18] sm:$0xff]  ;;  %v187_v5 = vadd.f32 %v155_v2, %v154_v1  ;;  %v227_v6 = vmul.f32 %v154_v1, %v154_v1  ;;  %v228_v7 = vmul.f32 %v155_v2, %v155_v2  ;;  %v229_v8 = vmul.f32 %v156_v3, %v156_v3  ;;  %v158_v9 = vld [vmem:[%s567_s23 + $0x20] sm:$0xff]  ;;  %v159_v13 = vld [vmem:[%s567_s23 + $0x28] sm:$0xff] }
  0x3c   : > { %v230_v11 = vmul.f32 %v157_v4, %v157_v4  ;;  %v231_v15 = vmul.f32 %v158_v9, %v158_v9  ;;  %v160_v17 = vld [vmem:[%s567_s23 + $0x30] sm:$0xff]  ;;  %v232_v19 = vmul.f32 %v159_v13, %v159_v13  ;;  %v161_v21 = vld [vmem:[%s567_s23 + $0x38] sm:$0xff]  ;;  %v162_v25 = vld [vmem:[%s567_s23 + $0x40] sm:$0xff] }
  0x3d   : > { %v188_v10 = vadd.f32 %v187_v5, %v156_v3  ;;  %v259_v12 = vadd.f32 %v228_v7, %v227_v6  ;;  %v233_v23 = vmul.f32 %v160_v17, %v160_v17  ;;  %v234_v27 = vmul.f32 %v161_v21, %v161_v21  ;;  %v163_v29 = vld [vmem:[%s567_s23 + $0x48] sm:$0xff]  ;;  %v164_v33 = vld [vmem:[%s567_s23 + $0x50] sm:$0xff]  ;;  %v165_v37 = vld [vmem:[%s567_s23 + $0x58] sm:$0xff] }
  0x3e   : > { %v235_v31 = vmul.f32 %v162_v25, %v162_v25  ;;  %v236_v35 = vmul.f32 %v163_v29, %v163_v29  ;;  %v237_v39 = vmul.f32 %v164_v33, %v164_v33  ;;  %v166_v41 = vld [vmem:[%s567_s23 + $0x60] sm:$0xff]  ;;  %v238_v43 = vmul.f32 %v165_v37, %v165_v37  ;;  %v167_v45 = vld [vmem:[%s567_s23 + $0x68] sm:$0xff]  ;;  %v168_v49 = vld [vmem:[%s567_s23 + $0x70] sm:$0xff] }
  0x3f   : > { %v189_v14 = vadd.f32 %v188_v10, %v157_v4  ;;  %v260_v16 = vadd.f32 %v259_v12, %v229_v8  ;;  %v239_v47 = vmul.f32 %v166_v41, %v166_v41  ;;  %v240_v51 = vmul.f32 %v167_v45, %v167_v45  ;;  %v169_v53 = vld [vmem:[%s567_s23 + $0x78] sm:$0xff]  ;;  %v170_v57 = vld [vmem:[%s567_s23 + $0x80] sm:$0xff]  ;;  %v171_v61 = vld [vmem:[%s567_s23 + $0x88] sm:$0xff] }
  0x40   : > { %v241_v55 = vmul.f32 %v168_v49, %v168_v49  ;;  %v242_v59 = vmul.f32 %v169_v53, %v169_v53  ;;  %v243_v63 = vmul.f32 %v170_v57, %v170_v57  ;;  %v172_v1 = vld [vmem:[%s567_s23 + $0x90] sm:$0xff]  ;;  %v244_v3 = vmul.f32 %v171_v61, %v171_v61  ;;  %v173_v5 = vld [vmem:[%s567_s23 + $0x98] sm:$0xff] }
  0x41   : > { %v190_v18 = vadd.f32 %v189_v14, %v158_v9  ;;  %v261_v20 = vadd.f32 %v260_v16, %v230_v11  ;;  %v245_v7 = vmul.f32 %v172_v1, %v172_v1  ;;  %v174_v9 = vld [vmem:[%s567_s23 + $0xa0] sm:$0xff]  ;;  %v246_v11 = vmul.f32 %v173_v5, %v173_v5 }
  0x43   : > { %v191_v22 = vadd.f32 %v190_v18, %v159_v13  ;;  %v262_v24 = vadd.f32 %v261_v20, %v231_v15  ;;  %v175_v13 = vld [vmem:[%s567_s23 + $0xa8] sm:$0xff]  ;;  %v247_v15 = vmul.f32 %v174_v9, %v174_v9 }
  0x45   : > { %v192_v26 = vadd.f32 %v191_v22, %v160_v17  ;;  %v263_v28 = vadd.f32 %v262_v24, %v232_v19  ;;  %v176_v17 = vld [vmem:[%s567_s23 + $0xb0] sm:$0xff]  ;;  %v248_v19 = vmul.f32 %v175_v13, %v175_v13 }
  0x47   : > { %v193_v30 = vadd.f32 %v192_v26, %v161_v21  ;;  %v264_v32 = vadd.f32 %v263_v28, %v233_v23  ;;  %v177_v21 = vld [vmem:[%s567_s23 + $0xb8] sm:$0xff]  ;;  %v249_v23 = vmul.f32 %v176_v17, %v176_v17 }
  0x49   : > { %v194_v34 = vadd.f32 %v193_v30, %v162_v25  ;;  %v265_v36 = vadd.f32 %v264_v32, %v234_v27  ;;  %v178_v25 = vld [vmem:[%s567_s23 + $0xc0] sm:$0xff]  ;;  %v250_v27 = vmul.f32 %v177_v21, %v177_v21 }
  0x4b   : > { %v195_v38 = vadd.f32 %v194_v34, %v163_v29  ;;  %v266_v40 = vadd.f32 %v265_v36, %v235_v31  ;;  %v179_v29 = vld [vmem:[%s567_s23 + $0xc8] sm:$0xff]  ;;  %v251_v31 = vmul.f32 %v178_v25, %v178_v25 }
  0x4d   : > { %v196_v42 = vadd.f32 %v195_v38, %v164_v33  ;;  %v267_v44 = vadd.f32 %v266_v40, %v236_v35  ;;  %v180_v33 = vld [vmem:[%s567_s23 + $0xd0] sm:$0xff]  ;;  %v252_v35 = vmul.f32 %v179_v29, %v179_v29 }
  0x4f   : > { %v197_v46 = vadd.f32 %v196_v42, %v165_v37  ;;  %v268_v48 = vadd.f32 %v267_v44, %v237_v39  ;;  %v181_v37 = vld [vmem:[%s567_s23 + $0xd8] sm:$0xff]  ;;  %v253_v39 = vmul.f32 %v180_v33, %v180_v33 }
  0x51   : > { %v198_v50 = vadd.f32 %v197_v46, %v166_v41  ;;  %v269_v52 = vadd.f32 %v268_v48, %v238_v43  ;;  %v182_v41 = vld [vmem:[%s567_s23 + $0xe0] sm:$0xff]  ;;  %v254_v43 = vmul.f32 %v181_v37, %v181_v37 }
  0x53   : > { %v199_v54 = vadd.f32 %v198_v50, %v167_v45  ;;  %v270_v56 = vadd.f32 %v269_v52, %v239_v47  ;;  %v183_v45 = vld [vmem:[%s567_s23 + $0xe8] sm:$0xff]  ;;  %v255_v47 = vmul.f32 %v182_v41, %v182_v41 }
  0x55   : > { %v200_v58 = vadd.f32 %v199_v54, %v168_v49  ;;  %v271_v60 = vadd.f32 %v270_v56, %v240_v51  ;;  %v184_v49 = vld [vmem:[%s567_s23 + $0xf0] sm:$0xff]  ;;  %v256_v51 = vmul.f32 %v183_v45, %v183_v45 }
  0x57   : > { %v201_v62 = vadd.f32 %v200_v58, %v169_v53  ;;  %v272_v0 = vadd.f32 %v271_v60, %v241_v55  ;;  %v185_v53 = vld [vmem:[%s567_s23 + $0xf8] sm:$0xff]  ;;  %v257_v55 = vmul.f32 %v184_v49, %v184_v49 }
  0x58   : > { %v258_v58 = vmul.f32 %v185_v53, %v185_v53 }
  0x59   : > { %v202_v2 = vadd.f32 %v201_v62, %v170_v57  ;;  %v273_v4 = vadd.f32 %v272_v0, %v242_v59 }
  0x5b   : > { %v203_v6 = vadd.f32 %v202_v2, %v171_v61  ;;  %v274_v8 = vadd.f32 %v273_v4, %v243_v63 }
  0x5d   : > { %v204_v10 = vadd.f32 %v203_v6, %v172_v1  ;;  %v275_v12 = vadd.f32 %v274_v8, %v244_v3 }
  0x5f   : > { %v205_v14 = vadd.f32 %v204_v10, %v173_v5  ;;  %v276_v16 = vadd.f32 %v275_v12, %v245_v7  ;;  %v186_v7 = vld [vmem:[%s639_s1] sm:$0x1] }
  0x60   : > { %v226_v12 = vld [vmem:[%s640_s2] sm:$0x1] }
  0x61   : > { %v206_v18 = vadd.f32 %v205_v14, %v174_v9  ;;  %v277_v20 = vadd.f32 %v276_v16, %v246_v11 }
  0x63   : > { %v207_v22 = vadd.f32 %v206_v18, %v175_v13  ;;  %v278_v24 = vadd.f32 %v277_v20, %v247_v15 }
  0x65   : > { %v208_v26 = vadd.f32 %v207_v22, %v176_v17  ;;  %v279_v28 = vadd.f32 %v278_v24, %v248_v19 }
  0x67   : > { %v209_v30 = vadd.f32 %v208_v26, %v177_v21  ;;  %v280_v32 = vadd.f32 %v279_v28, %v249_v23 }
  0x69   : > { %v210_v34 = vadd.f32 %v209_v30, %v178_v25  ;;  %v281_v36 = vadd.f32 %v280_v32, %v250_v27 }
  0x6b   : > { %v211_v38 = vadd.f32 %v210_v34, %v179_v29  ;;  %v282_v40 = vadd.f32 %v281_v36, %v251_v31 }
  0x6d   : > { %v212_v42 = vadd.f32 %v211_v38, %v180_v33  ;;  %v283_v44 = vadd.f32 %v282_v40, %v252_v35 }
  0x6f   : > { %v213_v46 = vadd.f32 %v212_v42, %v181_v37  ;;  %v284_v48 = vadd.f32 %v283_v44, %v253_v39 }
  0x71   : > { %v214_v50 = vadd.f32 %v213_v46, %v182_v41  ;;  %v285_v52 = vadd.f32 %v284_v48, %v254_v43 }
  0x73   : > { %v215_v54 = vadd.f32 %v214_v50, %v183_v45  ;;  %v286_v56 = vadd.f32 %v285_v52, %v255_v47 }
  0x75   : > { %v216_v57 = vadd.f32 %v215_v54, %v184_v49  ;;  %v287_v59 = vadd.f32 %v286_v56, %v256_v51 }
  0x77   : > { %v217_v60 = vadd.f32 %v216_v57, %v185_v53  ;;  %v288_v61 = vadd.f32 %v287_v59, %v257_v55 }
  0x79   : > { %v218_v62 = vrot.slane %v217_v60, 4  ;;  %v289_v63 = vadd.f32 %v288_v61, %v258_v58 }
  0x7b   : > { %v219_v0 = vadd.f32 %v218_v62, %v217_v60  ;;  %v290_v1 = vrot.slane %v289_v63, 4 }
  0x7d   : > { %v220_v2 = vrot.slane %v219_v0, 2  ;;  %v291_v3 = vadd.f32 %v290_v1, %v289_v63 }
  0x7f   : > { %v221_v4 = vadd.f32 %v220_v2, %v219_v0  ;;  %v292_v5 = vrot.slane %v291_v3, 2 }
  0x81   : > { %v222_v6 = vrot.slane %v221_v4, 1  ;;  %v293_v8 = vadd.f32 %v292_v5, %v291_v3 }
  0x83   : > { %v223_v9 = vadd.f32 %v222_v6, %v221_v4  ;;  %v294_v10 = vrot.slane %v293_v8, 1 }
  0x85   : > { %v224_v11 = vadd.f32 %v223_v9, %v186_v7  ;;  %v295_v13 = vadd.f32 %v294_v10, %v293_v8 }
  0x87   : > { %225 = vst [vmem:[%s639_s1] sm:$0x1] %v224_v11  ;;  %v296_v14 = vadd.f32 %v295_v13, %v226_v12 }
  0x89   : > { %297 = vst [vmem:[%s640_s2] sm:$0x1] %v296_v14 }
  0x8a PF: > { %p13_p7 = scmp.ge.s32.totalorder %s502_s14, 4   ;;  %s644_s9 = smov %s453_s10 }
  0x8b   : > { %s645_s10 = smov %s457_s11  ;;  %s646_s11 = smov %s512_s17 }
  0x8c   : > { %s647_s12 = smov %s502_s14  ;;  %15 = sbr.rel (!%p13_p7) target bundleno = 3 (0x3), region = 72 }
  0x93   :  { %315 = vsyncpa [#allocation3], 1 }
  0x94   :  { %317 = vsyncpa [#allocation3 + $0x1], 1 }

// kernel: basic_block_forward.6
= control target key start
LH: loop header
LB: loop body
LE: loop exit
PB: predicated region body
PF: predicated region fallthrough
CT: control target
= control target key end

     0   :  { %s466_s9 = smov 0   ;;  %s516_s0 = inlined_call_operand.vmem [shape: bf16[512,128], index: 0, kind: input, shape index: {}]   ;;  %s517_s1 = inlined_call_operand.vmem [shape: f32[1,128], index: 1, kind: output, shape index: {0}]   ;;  %s518_s2 = inlined_call_operand.vmem [shape: f32[1,128], index: 2, kind: output, shape index: {1}]  }
   0x1 LB: > { %s345_s10 = sadd.s32 4294967295, %s448_s9   ;;  %p348_p0 = scmp.ge.s32.totalorder %s448_s9, 1  ;;  %s448_s9 = sphi %s466_s9, %s13_s9  }
   0x2   : > { %p106_p1 = scmp.lt.s32.totalorder %s448_s9, 3 }
   0x4   : > { %p107_p2 = pnand %p348_p0, %p106_p1 }
   0x5   : > { %s349_s11 = sshll.u32 (!%p107_p2), %s345_s10, 5  ;;  %p351_p4 = scmp.ne.s32.totalorder (!%p107_p2), %s345_s10, 0 }
   0x6   : > { %110 = sbr.rel (%p107_p2) target bundleno = 102 (0x66), region = 24  ;;  %p124_p3 = scmp.lt.s32.totalorder (!%p107_p2), %s349_s11, 63 }
   0xd   : > { %s520_s11 = smov (!%p124_p3, %s349_s11), 63  ;;  %132 = sbr.rel (%p351_p4) target bundleno = 20 (0x14), region = 28 }
   0xe   : > { %s350_s12 = sshll.u32 %s520_s11, 2  ;;  %v450_v0 = vmov (!%p351_p4), 0.0  }
   0xf   : > { %s477_s15 = scalar_lea.vmem %s516_s0, %s350_s12  ;;  %133 = vst [vmem:[%s517_s1] sm:$0x1] (!%p351_p4), %v450_v0  ;;  %134 = vst [vmem:[%s518_s2] sm:$0x1] (!%p351_p4), %v450_v0 }
  0x14 PF: > { %v355_v1 = vld [vmem:[%s477_s15] sm:$0xff]   ;;  %v418_v2 = vld [vmem:[%s477_s15 + $0x8] sm:$0xff]   ;;  %v419_v7 = vld [vmem:[%s477_s15 + $0x10] sm:$0xff]  }
  0x15   : > { %v356_v3 = vunpack.c.l.bf16 %v355_v1  ;;  %v357_v4 = vunpack.c.h.bf16 %v355_v1  ;;  %v360_v5 = vunpack.c.l.bf16 %v418_v2  ;;  %v361_v8 = vunpack.c.h.bf16 %v418_v2  ;;  %v420_v12 = vld [vmem:[%s477_s15 + $0x18] sm:$0xff]   ;;  %v421_v20 = vld [vmem:[%s477_s15 + $0x20] sm:$0xff]   ;;  %v422_v29 = vld [vmem:[%s477_s15 + $0x28] sm:$0xff]  }
  0x16   : > { %v364_v10 = vunpack.c.l.bf16 %v419_v7  ;;  %v365_v15 = vunpack.c.h.bf16 %v419_v7  ;;  %v368_v18 = vunpack.c.l.bf16 %v420_v12  ;;  %v369_v23 = vunpack.c.h.bf16 %v420_v12  ;;  %v423_v38 = vld [vmem:[%s477_s15 + $0x30] sm:$0xff]   ;;  %v424_v47 = vld [vmem:[%s477_s15 + $0x38] sm:$0xff]   ;;  %v425_v56 = vld [vmem:[%s477_s15 + $0x40] sm:$0xff]  }
  0x17   : > { %v200_v6 = vadd.f32 %v357_v4, %v356_v3  ;;  %v240_v13 = vmul.f32 %v356_v3, %v356_v3  ;;  %v241_v14 = vmul.f32 %v357_v4, %v357_v4  ;;  %v242_v17 = vmul.f32 %v360_v5, %v360_v5  ;;  %v426_v1 = vld [vmem:[%s477_s15 + $0x48] sm:$0xff]  }
  0x18   : > { %v243_v21 = vmul.f32 %v361_v8, %v361_v8  ;;  %v244_v25 = vmul.f32 %v364_v10, %v364_v10  ;;  %v372_v27 = vunpack.c.l.bf16 %v421_v20  ;;  %v245_v30 = vmul.f32 %v365_v15, %v365_v15 }
  0x19   : > { %v201_v9 = vadd.f32 %v360_v5, %v200_v6  ;;  %v272_v22 = vadd.f32 %v241_v14, %v240_v13  ;;  %v373_v32 = vunpack.c.h.bf16 %v421_v20  ;;  %v246_v34 = vmul.f32 %v368_v18, %v368_v18 }
  0x1a   : > { %v376_v36 = vunpack.c.l.bf16 %v422_v29  ;;  %v247_v39 = vmul.f32 %v369_v23, %v369_v23  ;;  %v377_v41 = vunpack.c.h.bf16 %v422_v29  ;;  %v248_v43 = vmul.f32 %v372_v27, %v372_v27 }
  0x1b   : > { %v202_v11 = vadd.f32 %v361_v8, %v201_v9  ;;  %v273_v26 = vadd.f32 %v272_v22, %v242_v17  ;;  %v380_v45 = vunpack.c.l.bf16 %v423_v38  ;;  %v249_v48 = vmul.f32 %v373_v32, %v373_v32 }
  0x1c   : > { %v381_v50 = vunpack.c.h.bf16 %v423_v38  ;;  %v250_v52 = vmul.f32 %v376_v36, %v376_v36  ;;  %v384_v54 = vunpack.c.l.bf16 %v424_v47  ;;  %v251_v57 = vmul.f32 %v377_v41, %v377_v41 }
  0x1d   : > { %v203_v16 = vadd.f32 %v364_v10, %v202_v11  ;;  %v274_v31 = vadd.f32 %v273_v26, %v243_v21  ;;  %v385_v59 = vunpack.c.h.bf16 %v424_v47  ;;  %v252_v61 = vmul.f32 %v380_v45, %v380_v45  ;;  %v427_v10 = vld [vmem:[%s477_s15 + $0x50] sm:$0xff]  }
  0x1e   : > { %v388_v63 = vunpack.c.l.bf16 %v425_v56  ;;  %v253_v2 = vmul.f32 %v381_v50, %v381_v50  ;;  %v389_v4 = vunpack.c.h.bf16 %v425_v56  ;;  %v254_v6 = vmul.f32 %v384_v54, %v384_v54 }
  0x1f   : > { %v204_v19 = vadd.f32 %v365_v15, %v203_v16  ;;  %v275_v35 = vadd.f32 %v274_v31, %v244_v25  ;;  %v392_v8 = vunpack.c.l.bf16 %v426_v1  ;;  %v255_v11 = vmul.f32 %v385_v59, %v385_v59 }
  0x20   : > { %v393_v13 = vunpack.c.h.bf16 %v426_v1  ;;  %v256_v15 = vmul.f32 %v388_v63, %v388_v63  ;;  %v396_v17 = vunpack.c.l.bf16 %v427_v10  ;;  %v257_v20 = vmul.f32 %v389_v4, %v389_v4 }
  0x21   : > { %v205_v24 = vadd.f32 %v368_v18, %v204_v19  ;;  %v276_v40 = vadd.f32 %v275_v35, %v245_v30  ;;  %v428_v19 = vld [vmem:[%s477_s15 + $0x58] sm:$0xff]   ;;  %v397_v22 = vunpack.c.h.bf16 %v427_v10 }
  0x22   : > { %v400_v26 = vunpack.c.l.bf16 %v428_v19  ;;  %v259_v29 = vmul.f32 %v393_v13, %v393_v13  ;;  %v401_v31 = vunpack.c.h.bf16 %v428_v19 }
  0x23   : > { %v206_v28 = vadd.f32 %v369_v23, %v205_v24  ;;  %v277_v44 = vadd.f32 %v276_v40, %v246_v34  ;;  %v258_v24 = vmul.f32 %v392_v8, %v392_v8  ;;  %v261_v38 = vmul.f32 %v397_v22, %v397_v22 }
  0x24   : > { %v263_v47 = vmul.f32 %v401_v31, %v401_v31 }
  0x25   : > { %v207_v33 = vadd.f32 %v372_v27, %v206_v28  ;;  %v278_v49 = vadd.f32 %v277_v44, %v247_v39  ;;  %v429_v28 = vld [vmem:[%s477_s15 + $0x60] sm:$0xff]  }
  0x26   : > { %v404_v35 = vunpack.c.l.bf16 %v429_v28  ;;  %v405_v40 = vunpack.c.h.bf16 %v429_v28  ;;  %v239_v28 = vld [vmem:[%s518_s2] sm:$0x1] }
  0x27   : > { %v208_v37 = vadd.f32 %v373_v32, %v207_v33  ;;  %v279_v53 = vadd.f32 %v278_v49, %v248_v43  ;;  %v260_v33 = vmul.f32 %v396_v17, %v396_v17 }
  0x28   : > { %v265_v56 = vmul.f32 %v405_v40, %v405_v40 }
  0x29   : > { %v209_v42 = vadd.f32 %v376_v36, %v208_v37  ;;  %v280_v58 = vadd.f32 %v279_v53, %v249_v48  ;;  %v430_v37 = vld [vmem:[%s477_s15 + $0x68] sm:$0xff]  }
  0x2a   : > { %v408_v44 = vunpack.c.l.bf16 %v430_v37  ;;  %v409_v49 = vunpack.c.h.bf16 %v430_v37 }
  0x2b   : > { %v210_v46 = vadd.f32 %v377_v41, %v209_v42  ;;  %v281_v62 = vadd.f32 %v280_v58, %v250_v52  ;;  %v262_v42 = vmul.f32 %v400_v26, %v400_v26 }
  0x2d   : > { %v211_v51 = vadd.f32 %v380_v45, %v210_v46  ;;  %v282_v3 = vadd.f32 %v281_v62, %v251_v57  ;;  %v431_v46 = vld [vmem:[%s477_s15 + $0x70] sm:$0xff]  }
  0x2e   : > { %v412_v53 = vunpack.c.l.bf16 %v431_v46  ;;  %v413_v58 = vunpack.c.h.bf16 %v431_v46 }
  0x2f   : > { %v212_v55 = vadd.f32 %v381_v50, %v211_v51  ;;  %v283_v7 = vadd.f32 %v282_v3, %v252_v61  ;;  %v264_v51 = vmul.f32 %v404_v35, %v404_v35 }
  0x31   : > { %v213_v60 = vadd.f32 %v384_v54, %v212_v55  ;;  %v284_v12 = vadd.f32 %v283_v7, %v253_v2  ;;  %v432_v55 = vld [vmem:[%s477_s15 + $0x78] sm:$0xff]   ;;  %v269_v7 = vmul.f32 %v413_v58, %v413_v58 }
  0x32   : > { %v416_v62 = vunpack.c.l.bf16 %v432_v55  ;;  %v417_v2 = vunpack.c.h.bf16 %v432_v55 }
  0x33   : > { %v214_v0 = vadd.f32 %v385_v59, %v213_v60  ;;  %v285_v16 = vadd.f32 %v284_v12, %v254_v6  ;;  %v266_v60 = vmul.f32 %v408_v44, %v408_v44 }
  0x34   : > { %v270_v10 = vmul.f32 %v416_v62, %v416_v62 }
  0x35   : > { %v215_v5 = vadd.f32 %v388_v63, %v214_v0  ;;  %v286_v21 = vadd.f32 %v285_v16, %v255_v11  ;;  %v267_v0 = vmul.f32 %v409_v49, %v409_v49 }
  0x37   : > { %v216_v9 = vadd.f32 %v389_v4, %v215_v5  ;;  %v287_v25 = vadd.f32 %v286_v21, %v256_v15  ;;  %v268_v4 = vmul.f32 %v412_v53, %v412_v53 }
  0x39   : > { %v217_v14 = vadd.f32 %v392_v8, %v216_v9  ;;  %v288_v30 = vadd.f32 %v287_v25, %v257_v20  ;;  %v199_v20 = vld [vmem:[%s517_s1] sm:$0x1] }
  0x3b   : > { %v218_v18 = vadd.f32 %v393_v13, %v217_v14  ;;  %v289_v34 = vadd.f32 %v288_v30, %v258_v24  ;;  %v271_v13 = vmul.f32 %v417_v2, %v417_v2 }
  0x3d   : > { %v219_v23 = vadd.f32 %v396_v17, %v218_v18  ;;  %v290_v39 = vadd.f32 %v289_v34, %v259_v29 }
  0x3f   : > { %v220_v27 = vadd.f32 %v397_v22, %v219_v23  ;;  %v291_v43 = vadd.f32 %v290_v39, %v260_v33 }
  0x41   : > { %v221_v32 = vadd.f32 %v400_v26, %v220_v27  ;;  %v292_v48 = vadd.f32 %v291_v43, %v261_v38 }
  0x43   : > { %v222_v36 = vadd.f32 %v401_v31, %v221_v32  ;;  %v293_v52 = vadd.f32 %v292_v48, %v262_v42 }
  0x45   : > { %v223_v41 = vadd.f32 %v404_v35, %v222_v36  ;;  %v294_v57 = vadd.f32 %v293_v52, %v263_v47 }
  0x47   : > { %v224_v45 = vadd.f32 %v405_v40, %v223_v41  ;;  %v295_v61 = vadd.f32 %v294_v57, %v264_v51 }
  0x49   : > { %v225_v50 = vadd.f32 %v408_v44, %v224_v45  ;;  %v296_v1 = vadd.f32 %v295_v61, %v265_v56 }
  0x4b   : > { %v226_v54 = vadd.f32 %v409_v49, %v225_v50  ;;  %v297_v5 = vadd.f32 %v296_v1, %v266_v60 }
  0x4d   : > { %v227_v59 = vadd.f32 %v412_v53, %v226_v54  ;;  %v298_v8 = vadd.f32 %v297_v5, %v267_v0 }
  0x4f   : > { %v228_v63 = vadd.f32 %v413_v58, %v227_v59  ;;  %v299_v11 = vadd.f32 %v298_v8, %v268_v4 }
  0x51   : > { %v229_v3 = vadd.f32 %v416_v62, %v228_v63  ;;  %v300_v14 = vadd.f32 %v299_v11, %v269_v7 }
  0x53   : > { %v230_v6 = vadd.f32 %v417_v2, %v229_v3  ;;  %v301_v16 = vadd.f32 %v300_v14, %v270_v10 }
  0x55   : > { %v231_v9 = vrot.slane %v230_v6, 4  ;;  %v302_v18 = vadd.f32 %v301_v16, %v271_v13 }
  0x57   : > { %v232_v12 = vadd.f32 %v231_v9, %v230_v6  ;;  %v303_v21 = vrot.slane %v302_v18, 4 }
  0x59   : > { %v233_v15 = vrot.slane %v232_v12, 2  ;;  %v304_v23 = vadd.f32 %v303_v21, %v302_v18 }
  0x5b   : > { %v234_v17 = vadd.f32 %v233_v15, %v232_v12  ;;  %v305_v25 = vrot.slane %v304_v23, 2 }
  0x5d   : > { %v235_v19 = vrot.slane %v234_v17, 1  ;;  %v306_v26 = vadd.f32 %v305_v25, %v304_v23 }
  0x5f   : > { %v236_v22 = vadd.f32 %v235_v19, %v234_v17  ;;  %v307_v27 = vrot.slane %v306_v26, 1 }
  0x61   : > { %v237_v24 = vadd.f32 %v236_v22, %v199_v20  ;;  %v308_v29 = vadd.f32 %v307_v27, %v306_v26 }
  0x63   : > { %238 = vst [vmem:[%s517_s1] sm:$0x1] %v237_v24  ;;  %v309_v30 = vadd.f32 %v308_v29, %v239_v28 }
  0x65   : > { %310 = vst [vmem:[%s518_s2] sm:$0x1] %v309_v30 }
  0x66 PF: > { %s13_s9 = sadd.s32 1, %s448_s9  }
  0x67   : > { %p10_p5 = scmp.ge.s32.totalorder %s13_s9, 4  }
  0x69   :  { %12 = sbr.rel (!%p10_p5) target bundleno = 1 (0x1), region = 62 }

// kernel: basic_block_forward.5
= control target key start
LH: loop header
LB: loop body
LE: loop exit
PB: predicated region body
PF: predicated region fallthrough
CT: control target
= control target key end

     0   :  { %s3953_s15 = smov 0   ;;  %s3955_s16 = smov 0   ;;  %s4829_s0 = inlined_call_operand.vmem [shape: f32[2,16,16,128], index: 0, kind: input, shape index: {}]   ;;  %s4830_s1 = inlined_call_operand.vmem [shape: f32[1,128], index: 1, kind: input, shape index: {}]   ;;  %s4831_s2 = inlined_call_operand.vmem [shape: f32[1,128], index: 2, kind: input, shape index: {}]   ;;  %s4832_s3 = inlined_call_operand.vmem [shape: bf16[3,384,128], index: 3, kind: input, shape index: {}]   ;;  %s4833_s4 = inlined_call_operand.vmem [shape: bf16[2,16,16,128], index: 4, kind: output, shape index: {}]  }
   0x1   :  { %s3957_s17 = smov 0   ;;  %s3959_s18 = smov 0  }
   0x2   :  { %s3961_s19 = smov 0  }
   0x3 LB: > { %s23_s20 = sadd.s32 1, %s3917_s17  ;;  %s26_s21 = sadd.s32 1, %s3921_s18  ;;  %s3925_s19 = sphi %s3961_s19, %s14_s19   ;;  %s3921_s18 = sphi %s3959_s18, %s4843_s18   ;;  %s3917_s17 = sphi %s3957_s17, %s4842_s17   ;;  %s3913_s16 = sphi %s3955_s16, %s4841_s16   ;;  %s3909_s15 = sphi %s3953_s15, %s4840_s15  }
   0x4   : > { %p24_p0 = scmp.ge.s32.totalorder %s23_s20, 2  ;;  %p2916_p1 = scmp.ge.s32.totalorder %s3925_s19, 1 }
   0x5   : > { %p176_p2 = scmp.lt.s32.totalorder %s3925_s19, 5 }
   0x6   : > { %s4845_s20 = smov (%p24_p0, %s23_s20), 0  ;;  %s4847_s21 = smov (!%p24_p0, %s26_s21), %s3921_s18 }
   0x7   : > { %p177_p3 = pnand %p2916_p1, %p176_p2  ;;  %p28_p4 = scmp.ge.s32.totalorder %s4847_s21, 2 }
   0x8   : > { %p207_p5 = scmp.lt.s32.totalorder (!%p177_p3), %s3913_s16, 1  ;;  %s2919_s22 = sshll.u32 (!%p177_p3), %s3909_s15, 3 }
   0x9   : > { %s4849_s21 = smov (%p28_p4, %s4847_s21), 0  ;;  %180 = sbr.rel (%p177_p3) target bundleno = 486 (0x1e6), region = 36 }
   0xa   : > { %p215_p6 = scmp.lt.s32.totalorder (!%p177_p3), %s2919_s22, 15  ;;  %p2923_p7 = scmp.ne.s32.totalorder (!%p177_p3), %s3909_s15, 0 }
  0x10   : > { %s4851_s16 = smov (!%p207_p5, %s3913_s16), 1  ;;  %s4853_s22 = smov (!%p215_p6, %s2919_s22), 15 }
  0x11   : > { %s3187_s23 = sshll.u32 %s4851_s16, 8  ;;  %s2921_s24 = sshll.u32 %s4851_s16, 5  ;;  %vm232_vm0 = vcmask (!%p2923_p7), 1040384   ;;  %vm233_vm1 = vsmask.f32 (!%p2923_p7), 256  ;;  %v3927_v1 = vmov (!%p2923_p7), 0  }
  0x12   : > { %s3989_s27 = scalar_lea.vmem %s4829_s0, %s3187_s23  ;;  %s2920_s28 = sshll.u32 %s4853_s22, 1  ;;  %v3997_v0 = vld [vmem:[#allocation2 + $0x10] sm:$0x1] (!%p2923_p7)  ;;  %240 = vst [vmem:[#allocation2 + $0x1c] sm:$0xf] (!%p2923_p7), %v3927_v1  ;;  %vm4073_vm2 = vmand (!%p2923_p7), %vm232_vm0, %vm233_vm1 }
  0x13   : > { %s219_s29 = sadd.s32 %s2921_s24, %s2920_s28  ;;  %227 = sbr.rel (%p2923_p7) target bundleno = 87 (0x57), region = 40  ;;  %228 = vst [vmem:[#allocation2] sm:$0xf] (!%p2923_p7), %v3927_v1  ;;  %229 = vst [vmem:[#allocation2 + $0x4] sm:$0xf] (!%p2923_p7), %v3927_v1  ;;  %v236_v5 = vsel (!%p2923_p7), %vm4073_vm2, 0, %v3997_v0 }
  0x14   : > { %s2922_s30 = sshll.u32 %s219_s29, 2  ;;  %230 = vst [vmem:[#allocation2 + $0x8] sm:$0xf] (!%p2923_p7), %v3927_v1  ;;  %231 = vst [vmem:[#allocation2 + $0xc] sm:$0xf] (!%p2923_p7), %v3927_v1  ;;  %v357_v24 = vld [vmem:[%s3989_s27] sm:$0xff] (!%p2923_p7) }
  0x15   : > { %s3994_s7 = scalar_lea.vmem %s4833_s4, %s2922_s30  ;;  %238 = vst [vmem:[#allocation2 + $0x14] sm:$0xf] (!%p2923_p7), %v3927_v1  ;;  %239 = vst [vmem:[#allocation2 + $0x18] sm:$0xf] (!%p2923_p7), %v3927_v1  ;;  %v242_v3 = vld [vmem:[#allocation2 + $0x24] sm:$0x1] (!%p2923_p7) }
  0x16   : > { %241 = vst [vmem:[#allocation2 + $0x20] sm:$0xf] (!%p2923_p7), %v3927_v1  ;;  %245 = vst [vmem:[#allocation2 + $0x28] sm:$0xf] (!%p2923_p7), %v3927_v1  ;;  %v249_v4 = vld [vmem:[#allocation2 + $0x38] sm:$0x1] (!%p2923_p7) }
  0x17   : > { %246 = vst [vmem:[#allocation2 + $0x2c] sm:$0xf] (!%p2923_p7), %v3927_v1  ;;  %247 = vst [vmem:[#allocation2 + $0x30] sm:$0xf] (!%p2923_p7), %v3927_v1  ;;  %v243_v6 = vsel (!%p2923_p7), %vm4073_vm2, 0, %v242_v3  ;;  %v250_v7 = vsel (!%p2923_p7), %vm4073_vm2, 0, %v249_v4 }
  0x18   : > { %248 = vst [vmem:[#allocation2 + $0x34] sm:$0xf] (!%p2923_p7), %v3927_v1  ;;  %252 = vst [vmem:[#allocation2 + $0x3c] sm:$0xf] (!%p2923_p7), %v3927_v1  ;;  %v256_v8 = vld [vmem:[#allocation2 + $0x4c] sm:$0x1] (!%p2923_p7) }
  0x19   : > { %253 = vst [vmem:[#allocation2 + $0x40] sm:$0xf] (!%p2923_p7), %v3927_v1  ;;  %254 = vst [vmem:[#allocation2 + $0x44] sm:$0xf] (!%p2923_p7), %v3927_v1  ;;  %v257_v9 = vsel (!%p2923_p7), %vm4073_vm2, 0, %v256_v8  ;;  %v358_v25 = vld [vmem:[%s3989_s27 + $0x8] sm:$0xff] (!%p2923_p7) }
  0x1a   : > { %255 = vst [vmem:[#allocation2 + $0x48] sm:$0xf] %v3927_v1  ;;  %259 = vst [vmem:[#allocation2 + $0x50] sm:$0xf] %v3927_v1  ;;  %v263_v10 = vld [vmem:[#allocation2 + $0x60] sm:$0x1] }
  0x1b   : > { %260 = vst [vmem:[#allocation2 + $0x54] sm:$0xf] %v3927_v1  ;;  %261 = vst [vmem:[#allocation2 + $0x58] sm:$0xf] %v3927_v1  ;;  %v270_v11 = vld [vmem:[#allocation2 + $0x74] sm:$0x1] }
  0x1c   : > { %262 = vst [vmem:[#allocation2 + $0x5c] sm:$0xf] %v3927_v1  ;;  %266 = vst [vmem:[#allocation2 + $0x64] sm:$0xf] %v3927_v1  ;;  %v264_v12 = vsel %vm4073_vm2, 0, %v263_v10  ;;  %v271_v13 = vsel %vm4073_vm2, 0, %v270_v11 }
  0x1d   : > { %267 = vst [vmem:[#allocation2 + $0x68] sm:$0xf] %v3927_v1  ;;  %268 = vst [vmem:[#allocation2 + $0x6c] sm:$0xf] %v3927_v1  ;;  %v277_v14 = vld [vmem:[#allocation2 + $0x88] sm:$0x1] }
  0x1e   : > { %269 = vst [vmem:[#allocation2 + $0x70] sm:$0xf] %v3927_v1  ;;  %273 = vst [vmem:[#allocation2 + $0x78] sm:$0xf] %v3927_v1  ;;  %v284_v15 = vld [vmem:[#allocation2 + $0x9c] sm:$0x1] }
  0x1f   : > { %274 = vst [vmem:[#allocation2 + $0x7c] sm:$0xf] %v3927_v1  ;;  %275 = vst [vmem:[#allocation2 + $0x80] sm:$0xf] %v3927_v1  ;;  %v278_v16 = vsel %vm4073_vm2, 0, %v277_v14  ;;  %v285_v17 = vsel %vm4073_vm2, 0, %v284_v15 }
  0x20   : > { %276 = vst [vmem:[#allocation2 + $0x84] sm:$0xf] %v3927_v1  ;;  %280 = vst [vmem:[#allocation2 + $0x8c] sm:$0xf] %v3927_v1  ;;  %v291_v18 = vld [vmem:[#allocation2 + $0xb0] sm:$0x1] }
  0x21   : > { %281 = vst [vmem:[#allocation2 + $0x90] sm:$0xf] %v3927_v1  ;;  %282 = vst [vmem:[#allocation2 + $0x94] sm:$0xf] %v3927_v1  ;;  %v298_v19 = vld [vmem:[#allocation2 + $0xc4] sm:$0x1] }
  0x22   : > { %283 = vst [vmem:[#allocation2 + $0x98] sm:$0xf] %v3927_v1  ;;  %287 = vst [vmem:[#allocation2 + $0xa0] sm:$0xf] %v3927_v1  ;;  %v292_v20 = vsel %vm4073_vm2, 0, %v291_v18  ;;  %v299_v21 = vsel %vm4073_vm2, 0, %v298_v19 }
  0x23   : > { %288 = vst [vmem:[#allocation2 + $0xa4] sm:$0xf] %v3927_v1  ;;  %289 = vst [vmem:[#allocation2 + $0xa8] sm:$0xf] %v3927_v1  ;;  %v305_v22 = vld [vmem:[#allocation2 + $0xd8] sm:$0x1] }
  0x24   : > { %290 = vst [vmem:[#allocation2 + $0xac] sm:$0xf] %v3927_v1  ;;  %294 = vst [vmem:[#allocation2 + $0xb4] sm:$0xf] %v3927_v1  ;;  %v312_v23 = vld [vmem:[#allocation2 + $0xec] sm:$0x1] }
  0x25   : > { %295 = vst [vmem:[#allocation2 + $0xb8] sm:$0xf] %v3927_v1  ;;  %296 = vst [vmem:[#allocation2 + $0xbc] sm:$0xf] %v3927_v1  ;;  %v306_v26 = vsel %vm4073_vm2, 0, %v305_v22  ;;  %v313_v27 = vsel %vm4073_vm2, 0, %v312_v23 }
  0x26   : > { %297 = vst [vmem:[#allocation2 + $0xc0] sm:$0xf] %v3927_v1  ;;  %301 = vst [vmem:[#allocation2 + $0xc8] sm:$0xf] %v3927_v1  ;;  %v319_v28 = vld [vmem:[#allocation2 + $0x100] sm:$0x1] }
  0x27   : > { %302 = vst [vmem:[#allocation2 + $0xcc] sm:$0xf] %v3927_v1  ;;  %303 = vst [vmem:[#allocation2 + $0xd0] sm:$0xf] %v3927_v1  ;;  %v326_v29 = vld [vmem:[#allocation2 + $0x114] sm:$0x1] }
  0x28   : > { %304 = vst [vmem:[#allocation2 + $0xd4] sm:$0xf] %v3927_v1  ;;  %308 = vst [vmem:[#allocation2 + $0xdc] sm:$0xf] %v3927_v1  ;;  %v320_v30 = vsel %vm4073_vm2, 0, %v319_v28  ;;  %v327_v31 = vsel %vm4073_vm2, 0, %v326_v29 }
  0x29   : > { %309 = vst [vmem:[#allocation2 + $0xe0] sm:$0xf] %v3927_v1  ;;  %310 = vst [vmem:[#allocation2 + $0xe4] sm:$0xf] %v3927_v1  ;;  %v333_v32 = vld [vmem:[#allocation2 + $0x128] sm:$0x1] }
  0x2a   : > { %311 = vst [vmem:[#allocation2 + $0xe8] sm:$0xf] %v3927_v1  ;;  %315 = vst [vmem:[#allocation2 + $0xf0] sm:$0xf] %v3927_v1  ;;  %v340_v33 = vld [vmem:[#allocation2 + $0x13c] sm:$0x1] }
  0x2b   : > { %316 = vst [vmem:[#allocation2 + $0xf4] sm:$0xf] %v3927_v1  ;;  %317 = vst [vmem:[#allocation2 + $0xf8] sm:$0xf] %v3927_v1  ;;  %v334_v34 = vsel %vm4073_vm2, 0, %v333_v32  ;;  %v341_v35 = vsel %vm4073_vm2, 0, %v340_v33 }
  0x2c   : > { %318 = vst [vmem:[#allocation2 + $0xfc] sm:$0xf] %v3927_v1  ;;  %322 = vst [vmem:[#allocation2 + $0x104] sm:$0xf] %v3927_v1  ;;  %v347_v36 = vld [vmem:[#allocation2 + $0x150] sm:$0x1] }
  0x2d   : > { %323 = vst [vmem:[#allocation2 + $0x108] sm:$0xf] %v3927_v1  ;;  %324 = vst [vmem:[#allocation2 + $0x10c] sm:$0xf] %v3927_v1  ;;  %v354_v37 = vld [vmem:[#allocation2 + $0x164] sm:$0x1] }
  0x2e   : > { %325 = vst [vmem:[#allocation2 + $0x110] sm:$0xf] %v3927_v1  ;;  %329 = vst [vmem:[#allocation2 + $0x118] sm:$0xf] %v3927_v1  ;;  %v348_v38 = vsel %vm4073_vm2, 0, %v347_v36  ;;  %v355_v39 = vsel %vm4073_vm2, 0, %v354_v37 }
  0x2f   : > { %330 = vst [vmem:[#allocation2 + $0x11c] sm:$0xf] %v3927_v1  ;;  %331 = vst [vmem:[#allocation2 + $0x120] sm:$0xf] %v3927_v1  ;;  %v4119_v40 = vld [vmem:[%s4830_s1] ss:$0 sm:$0xff] }
  0x30   : > { %332 = vst [vmem:[#allocation2 + $0x124] sm:$0xf] %v3927_v1  ;;  %336 = vst [vmem:[#allocation2 + $0x12c] sm:$0xf] %v3927_v1  ;;  %v4124_v41 = vld [vmem:[%s4831_s2] ss:$0 sm:$0xff]  ;;  %v396_v42 = vmul.f32 %v4119_v40, %v357_v24  ;;  %v397_v43 = vmul.f32 %v4119_v40, %v358_v25 }
  0x31   : > { %337 = vst [vmem:[#allocation2 + $0x130] sm:$0xf] %v3927_v1  ;;  %338 = vst [vmem:[#allocation2 + $0x134] sm:$0xf] %v3927_v1  ;;  %v359_v44 = vld [vmem:[%s3989_s27 + $0x10] sm:$0xff]  ;;  %v360_v45 = vld [vmem:[%s3989_s27 + $0x18] sm:$0xff] }
  0x32   : > { %339 = vst [vmem:[#allocation2 + $0x138] sm:$0xf] %v3927_v1  ;;  %343 = vst [vmem:[#allocation2 + $0x140] sm:$0xf] %v3927_v1  ;;  %v361_v46 = vld [vmem:[%s3989_s27 + $0x20] sm:$0xff]  ;;  %v398_v47 = vmul.f32 %v4119_v40, %v359_v44  ;;  %v399_v48 = vmul.f32 %v4119_v40, %v360_v45  ;;  %v362_v50 = vld [vmem:[%s3989_s27 + $0x28] sm:$0xff]  ;;  %v435_v53 = vadd.f32 %v4124_v41, %v396_v42 }
  0x33   : > { %344 = vst [vmem:[#allocation2 + $0x144] sm:$0xf] %v3927_v1  ;;  %345 = vst [vmem:[#allocation2 + $0x148] sm:$0xf] %v3927_v1  ;;  %v400_v49 = vmul.f32 %v4119_v40, %v361_v46  ;;  %v363_v51 = vld [vmem:[%s3989_s27 + $0x30] sm:$0xff]  ;;  %v364_v52 = vld [vmem:[%s3989_s27 + $0x38] sm:$0xff]  ;;  %v436_v54 = vadd.f32 %v4124_v41, %v397_v43  ;;  %v401_v55 = vmul.f32 %v4119_v40, %v362_v50 }
  0x34   : > { %346 = vst [vmem:[#allocation2 + $0x14c] sm:$0xf] %v3927_v1  ;;  %350 = vst [vmem:[#allocation2 + $0x154] sm:$0xf] %v3927_v1  ;;  %v402_v56 = vmul.f32 %v4119_v40, %v363_v51  ;;  %v437_v57 = vadd.f32 %v4124_v41, %v398_v47  ;;  %v438_v58 = vadd.f32 %v4124_v41, %v399_v48  ;;  %v467_v61 = vmax.f32 %v435_v53, 0.0  ;;  %v368_v8 = vld [vmem:[%s3989_s27 + $0x58] sm:$0xff] }
  0x35   : > { %351 = vst [vmem:[#allocation2 + $0x158] sm:$0xf] %v3927_v1  ;;  %352 = vst [vmem:[#allocation2 + $0x15c] sm:$0xf] %v3927_v1  ;;  %v439_v59 = vadd.f32 %v4124_v41, %v400_v49  ;;  %v403_v60 = vmul.f32 %v4119_v40, %v364_v52  ;;  %v468_v62 = vmax.f32 %v436_v54, 0.0  ;;  %v440_v63 = vadd.f32 %v4124_v41, %v401_v55  ;;  %v370_v14 = vld [vmem:[%s3989_s27 + $0x68] sm:$0xff] }
  0x36   : > { %353 = vst [vmem:[#allocation2 + $0x160] sm:$0xf] %v3927_v1  ;;  %237 = vst [vmem:[#allocation2 + $0x10] sm:$0x1] %v236_v5  ;;  %v441_v0 = vadd.f32 %v4124_v41, %v402_v56  ;;  %v365_v1 = vld [vmem:[%s3989_s27 + $0x40] sm:$0xff]  ;;  %v469_v2 = vmax.f32 %v437_v57, 0.0  ;;  %v407_v23 = vmul.f32 %v4119_v40, %v368_v8  ;;  %v409_v28 = vmul.f32 %v4119_v40, %v370_v14 }
  0x37   : > { %244 = vst [vmem:[#allocation2 + $0x24] sm:$0x1] %v243_v6  ;;  %251 = vst [vmem:[#allocation2 + $0x38] sm:$0x1] %v250_v7  ;;  %v470_v3 = vmax.f32 %v438_v58, 0.0  ;;  %v471_v4 = vmax.f32 %v439_v59, 0.0  ;;  %v442_v5 = vadd.f32 %v4124_v41, %v403_v60  ;;  %v3189_v10 = vpack.c.bf16 %v468_v62, %v468_v62 }
  0x38   : > { %258 = vst [vmem:[#allocation2 + $0x4c] sm:$0x1] %v257_v9  ;;  %265 = vst [vmem:[#allocation2 + $0x60] sm:$0x1] %v264_v12  ;;  %v366_v6 = vld [vmem:[%s3989_s27 + $0x48] sm:$0xff]  ;;  %v367_v7 = vld [vmem:[%s3989_s27 + $0x50] sm:$0xff]  ;;  %v3188_v9 = vpack.c.bf16 %v467_v61, %v467_v61  ;;  %v404_v18 = vmul.f32 %v4119_v40, %v365_v1 }
  0x39   : > { %272 = vst [vmem:[#allocation2 + $0x74] sm:$0x1] %v271_v13  ;;  %279 = vst [vmem:[#allocation2 + $0x88] sm:$0x1] %v278_v16  ;;  %v472_v11 = vmax.f32 %v440_v63, 0.0  ;;  %v473_v12 = vmax.f32 %v441_v0, 0.0  ;;  %v3240_v15 = vpack.c.bf16 %v470_v3, %v469_v2  ;;  %v3192_v16 = vpack.c.bf16 %v471_v4, %v471_v4 }
  0x3a   : > { %286 = vst [vmem:[#allocation2 + $0x9c] sm:$0x1] %v285_v17  ;;  %293 = vst [vmem:[#allocation2 + $0xb0] sm:$0x1] %v292_v20  ;;  %v369_v13 = vld [vmem:[%s3989_s27 + $0x60] sm:$0xff]  ;;  %v474_v17 = vmax.f32 %v442_v5, 0.0  ;;  %v406_v22 = vmul.f32 %v4119_v40, %v367_v7 }
  0x3b   : > { %300 = vst [vmem:[#allocation2 + $0xc4] sm:$0x1] %v299_v21  ;;  %307 = vst [vmem:[#allocation2 + $0xd8] sm:$0x1] %v306_v26  ;;  %v371_v19 = vld [vmem:[%s3989_s27 + $0x70] sm:$0xff]  ;;  %v3193_v20 = vpack.c.bf16 %v472_v11, %v472_v11  ;;  %v405_v21 = vmul.f32 %v4119_v40, %v366_v6  ;;  %v372_v24 = vld [vmem:[%s3989_s27 + $0x78] sm:$0xff]  ;;  %v443_v26 = vadd.f32 %v4124_v41, %v404_v18 }
  0x3c   : > { %314 = vst [vmem:[#allocation2 + $0xec] sm:$0x1] %v313_v27  ;;  %321 = vst [vmem:[#allocation2 + $0x100] sm:$0x1] %v320_v30  ;;  %v3245_v25 = vpack.c.bf16 %v474_v17, %v473_v12  ;;  %v408_v27 = vmul.f32 %v4119_v40, %v369_v13  ;;  %v445_v30 = vadd.f32 %v4124_v41, %v406_v22  ;;  %v373_v37 = vld [vmem:[%s3989_s27 + $0x80] sm:$0xff]  ;;  %v374_v44 = vld [vmem:[%s3989_s27 + $0x88] sm:$0xff] }
  0x3d   : > { %328 = vst [vmem:[#allocation2 + $0x114] sm:$0x1] %v327_v31  ;;  %335 = vst [vmem:[#allocation2 + $0x128] sm:$0x1] %v334_v34  ;;  %v444_v29 = vadd.f32 %v4124_v41, %v405_v21  ;;  %v446_v31 = vadd.f32 %v4124_v41, %v407_v23  ;;  %v410_v32 = vmul.f32 %v4119_v40, %v371_v19  ;;  %v475_v33 = vmax.f32 %v443_v26, 0.0  ;;  %v375_v49 = vld [vmem:[%s3989_s27 + $0x90] sm:$0xff] }
  0x3e   : > { %342 = vst [vmem:[#allocation2 + $0x13c] sm:$0x1] %v341_v35  ;;  %349 = vst [vmem:[#allocation2 + $0x150] sm:$0x1] %v348_v38  ;;  %v447_v34 = vadd.f32 %v4124_v41, %v408_v27  ;;  %v448_v35 = vadd.f32 %v4124_v41, %v409_v28  ;;  %v411_v36 = vmul.f32 %v4119_v40, %v372_v24  ;;  %v376_v50 = vld [vmem:[%s3989_s27 + $0x98] sm:$0xff]  ;;  %v377_v51 = vld [vmem:[%s3989_s27 + $0xa0] sm:$0xff] }
  0x3f   : > { %356 = vst [vmem:[#allocation2 + $0x164] sm:$0x1] %v355_v39  ;;  %628 = vst [vmem:[#allocation2 + $0x1c] sm:$0xf] %v3188_v9  ;;  %v476_v38 = vmax.f32 %v444_v29, 0.0  ;;  %v477_v39 = vmax.f32 %v445_v30, 0.0  ;;  %v449_v43 = vadd.f32 %v4124_v41, %v410_v32  ;;  %v3196_v45 = vpack.c.bf16 %v475_v33, %v475_v33 }
  0x40   : > { %629 = vst [vmem:[#allocation2 + $0x20] sm:$0xf] %v3189_v10  ;;  %3317 = vst [vmem:[#allocation2 + $0x30] sm:$0xff] %v3240_v15   ;;  %v478_v42 = vmax.f32 %v446_v31, 0.0  ;;  %v479_v46 = vmax.f32 %v447_v34, 0.0  ;;  %v480_v47 = vmax.f32 %v448_v35, 0.0  ;;  %v450_v48 = vadd.f32 %v4124_v41, %v411_v36 }
  0x41   : > { %632 = vst [vmem:[#allocation2 + $0x44] sm:$0xf] %v3192_v16  ;;  %633 = vst [vmem:[#allocation2 + $0x48] sm:$0xf] %v3193_v20  ;;  %v3197_v52 = vpack.c.bf16 %v476_v38, %v476_v38  ;;  %v481_v54 = vmax.f32 %v449_v43, 0.0  ;;  %v412_v55 = vmul.f32 %v4119_v40, %v373_v37  ;;  %v378_v56 = vld [vmem:[%s3989_s27 + $0xa8] sm:$0xff]  ;;  %v413_v61 = vmul.f32 %v4119_v40, %v374_v44 }
  0x42   : > { %3318 = vst [vmem:[#allocation2 + $0x58] sm:$0xff] %v3245_v25   ;;  %v3250_v53 = vpack.c.bf16 %v478_v42, %v477_v39  ;;  %v379_v57 = vld [vmem:[%s3989_s27 + $0xb0] sm:$0xff]  ;;  %636 = vst [vmem:[#allocation2 + $0x6c] sm:$0xf] %v3196_v45  ;;  %v3200_v58 = vpack.c.bf16 %v479_v46, %v479_v46  ;;  %v3201_v59 = vpack.c.bf16 %v480_v47, %v480_v47  ;;  %v482_v60 = vmax.f32 %v450_v48, 0.0  ;;  %v380_v2 = vld [vmem:[%s3989_s27 + $0xb8] sm:$0xff] }
  0x43   : > { %637 = vst [vmem:[#allocation2 + $0x70] sm:$0xf] %v3197_v52  ;;  %v451_v62 = vadd.f32 %v4124_v41, %v412_v55  ;;  %v414_v63 = vmul.f32 %v4119_v40, %v375_v49  ;;  %v415_v0 = vmul.f32 %v4119_v40, %v376_v50  ;;  %v416_v1 = vmul.f32 %v4119_v40, %v377_v51  ;;  %v381_v15 = vld [vmem:[%s3989_s27 + $0xc0] sm:$0xff]  ;;  %v382_v16 = vld [vmem:[%s3989_s27 + $0xc8] sm:$0xff]  ;;  %v383_v21 = vld [vmem:[%s3989_s27 + $0xd0] sm:$0xff] }
  0x44   : > { %3319 = vst [vmem:[#allocation2 + $0x80] sm:$0xff] %v3250_v53   ;;  %640 = vst [vmem:[#allocation2 + $0x94] sm:$0xf] %v3200_v58  ;;  %v3255_v3 = vpack.c.bf16 %v482_v60, %v481_v54  ;;  %v452_v4 = vadd.f32 %v4124_v41, %v413_v61  ;;  %v417_v5 = vmul.f32 %v4119_v40, %v378_v56  ;;  %v384_v22 = vld [vmem:[%s3989_s27 + $0xd8] sm:$0xff]  ;;  %v385_v27 = vld [vmem:[%s3989_s27 + $0xe0] sm:$0xff] }
  0x45   : > { %641 = vst [vmem:[#allocation2 + $0x98] sm:$0xf] %v3201_v59  ;;  %v418_v6 = vmul.f32 %v4119_v40, %v379_v57  ;;  %v483_v7 = vmax.f32 %v451_v62, 0.0  ;;  %v453_v8 = vadd.f32 %v4124_v41, %v414_v63  ;;  %v454_v9 = vadd.f32 %v4124_v41, %v415_v0  ;;  %v386_v28 = vld [vmem:[%s3989_s27 + $0xe8] sm:$0xff]  ;;  %v387_v33 = vld [vmem:[%s3989_s27 + $0xf0] sm:$0xff]  ;;  %v388_v44 = vld [vmem:[%s3989_s27 + $0xf8] sm:$0xff] }
  0x46   : > { %v455_v10 = vadd.f32 %v4124_v41, %v416_v1  ;;  %3320 = vst [vmem:[#allocation2 + $0xa8] sm:$0xff] %v3255_v3   ;;  %v484_v11 = vmax.f32 %v452_v4, 0.0  ;;  %v456_v12 = vadd.f32 %v4124_v41, %v417_v5  ;;  %v419_v13 = vmul.f32 %v4119_v40, %v380_v2 }
  0x47   : > { %v457_v14 = vadd.f32 %v4124_v41, %v418_v6  ;;  %v3204_v17 = vpack.c.bf16 %v483_v7, %v483_v7  ;;  %v485_v18 = vmax.f32 %v453_v8, 0.0  ;;  %v486_v19 = vmax.f32 %v454_v9, 0.0 }
  0x48   : > { %v487_v20 = vmax.f32 %v455_v10, 0.0  ;;  %v3205_v23 = vpack.c.bf16 %v484_v11, %v484_v11  ;;  %v488_v24 = vmax.f32 %v456_v12, 0.0  ;;  %v458_v25 = vadd.f32 %v4124_v41, %v419_v13 }
  0x49   : > { %v489_v26 = vmax.f32 %v457_v14, 0.0  ;;  %644 = vst [vmem:[#allocation2 + $0xbc] sm:$0xf] %v3204_v17  ;;  %v3260_v29 = vpack.c.bf16 %v486_v19, %v485_v18  ;;  %v420_v31 = vmul.f32 %v4119_v40, %v381_v15  ;;  %v421_v32 = vmul.f32 %v4119_v40, %v382_v16 }
  0x4a   : > { %v3208_v30 = vpack.c.bf16 %v487_v20, %v487_v20  ;;  %645 = vst [vmem:[#allocation2 + $0xc0] sm:$0xf] %v3205_v23  ;;  %v3209_v34 = vpack.c.bf16 %v488_v24, %v488_v24  ;;  %v490_v35 = vmax.f32 %v458_v25, 0.0  ;;  %v422_v36 = vmul.f32 %v4119_v40, %v383_v21 }
  0x4b   : > { %v423_v37 = vmul.f32 %v4119_v40, %v384_v22  ;;  %3321 = vst [vmem:[#allocation2 + $0xd0] sm:$0xff] %v3260_v29   ;;  %v459_v38 = vadd.f32 %v4124_v41, %v420_v31  ;;  %v460_v39 = vadd.f32 %v4124_v41, %v421_v32  ;;  %v424_v42 = vmul.f32 %v4119_v40, %v385_v27 }
  0x4c   : > { %648 = vst [vmem:[#allocation2 + $0xe4] sm:$0xf] %v3208_v30  ;;  %v425_v43 = vmul.f32 %v4119_v40, %v386_v28  ;;  %649 = vst [vmem:[#allocation2 + $0xe8] sm:$0xf] %v3209_v34  ;;  %v3265_v45 = vpack.c.bf16 %v490_v35, %v489_v26  ;;  %v461_v46 = vadd.f32 %v4124_v41, %v422_v36 }
  0x4d   : > { %v462_v47 = vadd.f32 %v4124_v41, %v423_v37  ;;  %v426_v48 = vmul.f32 %v4119_v40, %v387_v33  ;;  %v491_v49 = vmax.f32 %v459_v38, 0.0  ;;  %v492_v50 = vmax.f32 %v460_v39, 0.0 }
  0x4e   : > { %v463_v51 = vadd.f32 %v4124_v41, %v424_v42  ;;  %v464_v52 = vadd.f32 %v4124_v41, %v425_v43  ;;  %3322 = vst [vmem:[#allocation2 + $0xf8] sm:$0xff] %v3265_v45   ;;  %v493_v53 = vmax.f32 %v461_v46, 0.0  ;;  %v427_v55 = vmul.f32 %v4119_v40, %v388_v44 }
  0x4f   : > { %v494_v54 = vmax.f32 %v462_v47, 0.0  ;;  %v465_v56 = vadd.f32 %v4124_v41, %v426_v48  ;;  %v3212_v57 = vpack.c.bf16 %v491_v49, %v491_v49  ;;  %v3213_v58 = vpack.c.bf16 %v492_v50, %v492_v50 }
  0x50   : > { %v495_v59 = vmax.f32 %v463_v51, 0.0  ;;  %v496_v60 = vmax.f32 %v464_v52, 0.0  ;;  %v466_v62 = vadd.f32 %v4124_v41, %v427_v55 }
  0x51   : > { %v3270_v61 = vpack.c.bf16 %v494_v54, %v493_v53  ;;  %v497_v63 = vmax.f32 %v465_v56, 0.0  ;;  %652 = vst [vmem:[#allocation2 + $0x10c] sm:$0xf] %v3212_v57  ;;  %653 = vst [vmem:[#allocation2 + $0x110] sm:$0xf] %v3213_v58 }
  0x52   : > { %v3216_v0 = vpack.c.bf16 %v495_v59, %v495_v59  ;;  %v3217_v1 = vpack.c.bf16 %v496_v60, %v496_v60  ;;  %v498_v2 = vmax.f32 %v466_v62, 0.0 }
  0x53   : > { %3323 = vst [vmem:[#allocation2 + $0x120] sm:$0xff] %v3270_v61  }
  0x54   : > { %656 = vst [vmem:[#allocation2 + $0x134] sm:$0xf] %v3216_v0  ;;  %657 = vst [vmem:[#allocation2 + $0x138] sm:$0xf] %v3217_v1  ;;  %v3275_v3 = vpack.c.bf16 %v498_v2, %v497_v63 }
  0x56   : > { %3324 = vst [vmem:[#allocation2 + $0x148] sm:$0xff] %v3275_v3  }
  0x57 PF: > { %v3805_v40 = vld [vmem:[%s4832_s3 + $0x40] sm:$0xff]   ;;  %v3808_v5 = vld [vmem:[%s4832_s3 + $0x48] sm:$0xff]   ;;  %v3811_v8 = vld [vmem:[%s4832_s3 + $0x50] sm:$0xff]   ;;  %s3220_s8 = smul.u32 160, %s3909_s15  ;;  %vm1087_vm3 = vsmask.f32 3328 }
  0x58   : > { %v3806_v41 = vld [vmem:[%s4832_s3 + $0x80] sm:$0xff]   ;;  %3332 = vmatprep.subr.bf16.mxu0 %v3805_v40  ;;  %v3809_v6 = vld [vmem:[%s4832_s3 + $0x88] sm:$0xff]   ;;  %v3812_v9 = vld [vmem:[%s4832_s3 + $0x90] sm:$0xff]   ;;  %vm1088_vm4 = vsmask.f32 7440 }
  0x59   : > { %v3807_v4 = vld [vmem:[%s4832_s3] sm:$0xff]   ;;  %3572 = vmatprep.subr.bf16.mxu1 %v3806_v41  ;;  %v3810_v7 = vld [vmem:[%s4832_s3 + $0x8] sm:$0xff]   ;;  %v3813_v10 = vld [vmem:[%s4832_s3 + $0x10] sm:$0xff]   ;;  %s4290_s26 = scalar_lea.vmem [#allocation2], %s3220_s8  ;;  %vm694_vm5 = vsmask.f32 256 }
  0x5a   : > { %3333 = vmatpush3.bf16.msra.mxu0 %v3807_v4  ;;  %3573 = vmatpush3.bf16.msra.mxu1 %v3806_v41  ;;  %v3814_v11 = vld [vmem:[%s4832_s3 + $0x58] sm:$0xff]   ;;  %v3817_v14 = vld [vmem:[%s4832_s3 + $0x60] sm:$0xff]   ;;  %v3820_v17 = vld [vmem:[%s4832_s3 + $0x68] sm:$0xff]   ;;  %vm695_vm6 = vsmask.f32 4368 }
  0x5b   : > { %3334 = vmatprep.subr.bf16.mxu0 %v3808_v5  ;;  %3574 = vmatprep.subr.bf16.mxu1 %v3809_v6  ;;  %v3815_v12 = vld [vmem:[%s4832_s3 + $0x98] sm:$0xff]   ;;  %v3818_v15 = vld [vmem:[%s4832_s3 + $0xa0] sm:$0xff]   ;;  %v3821_v18 = vld [vmem:[%s4832_s3 + $0xa8] sm:$0xff]  }
  0x5c   : > { %v3816_v13 = vld [vmem:[%s4832_s3 + $0x18] sm:$0xff]   ;;  %v3819_v16 = vld [vmem:[%s4832_s3 + $0x20] sm:$0xff]   ;;  %v3822_v19 = vld [vmem:[%s4832_s3 + $0x28] sm:$0xff]  }
  0x5d   : > { %v3823_v20 = vld [vmem:[%s4832_s3 + $0x70] sm:$0xff]   ;;  %v3826_v23 = vld [vmem:[%s4832_s3 + $0x78] sm:$0xff]   ;;  %v3829_v25 = vld [vmem:[%s4290_s26 + $0x8] sm:$0xff]  }
  0x5e   : > { %3335 = vmatpush3.bf16.msra.mxu0 %v3810_v7  ;;  %3575 = vmatpush3.bf16.msra.mxu1 %v3809_v6  ;;  %v3824_v21 = vld [vmem:[%s4832_s3 + $0xb0] sm:$0xff]   ;;  %v3827_v24 = vld [vmem:[%s4832_s3 + $0xb8] sm:$0xff]   ;;  %v1057_v26 = vld [vmem:[%s4290_s26 + $0x8] sm:$0xf] }
  0x5f   : > { %3336 = vmatprep.subr.bf16.mxu0 %v3811_v8  ;;  %3576 = vmatprep.subr.bf16.mxu1 %v3812_v9  ;;  %v3825_v22 = vld [vmem:[%s4832_s3 + $0x30] sm:$0xff]   ;;  %v1058_v27 = vld [vmem:[%s4290_s26 + $0xc] sm:$0xf]  ;;  %v3828_v29 = vld [vmem:[%s4832_s3 + $0x38] sm:$0xff]   ;;  %v1091_v30 = vshrl.u32 %v1057_v26, 16  ;;  %v1094_v31 = vshll.u32 %v1057_v26, 16 }
  0x60   : > { %v1059_v28 = vld [vmem:[%s4290_s26 + $0x10] sm:$0x1]  ;;  %1628 = vmatprep.mubr.bf16.mxu0 %v3829_v25  ;;  %v1100_v32 = vshll.u32 %v1058_v27, 16  ;;  %v1104_v33 = vshrl.u32 %v1058_v27, 16  ;;  %v664_v35 = vld [vmem:[%s4290_s26 + $0x4] sm:$0x8]  ;;  %vm4311_vm7 = vmor %vm1087_vm3, %vm1088_vm4 }
  0x61   : > { %v1110_v34 = vshll.u32 %v1059_v28, 16  ;;  %v3830_v36 = vld [vmem:[%s4832_s3 + $0x100] sm:$0xff]   ;;  %v1093_v37 = vrot.slane %v1091_v30, 4  ;;  %v1096_v38 = vrot.slane %v1094_v31, 5  ;;  %v665_v39 = vld [vmem:[%s4290_s26 + $0x8] sm:$0xf]  ;;  %vm4319_vm8 = vmor %vm694_vm5, %vm695_vm6 }
  0x62   : > { %3337 = vmatpush3.bf16.msra.mxu0 %v3813_v10  ;;  %3577 = vmatpush3.bf16.msra.mxu1 %v3812_v9  ;;  %v666_v42 = vld [vmem:[%s4290_s26 + $0xc] sm:$0xf]  ;;  %v1102_v43 = vrot.slane %v1100_v32, 5  ;;  %v1106_v44 = vrot.slane %v1104_v33, 4  ;;  %v3831_v46 = vld [vmem:[%s4832_s3 + $0x1c0] sm:$0xff]   ;;  %v698_v48 = vshrl.u32 %v664_v35, 16 }
  0x63   : > { %3338 = vmatprep.subr.bf16.mxu0 %v3814_v11  ;;  %3578 = vmatprep.subr.bf16.mxu1 %v3815_v12  ;;  %v1112_v45 = vrot.slane %v1110_v34, 5  ;;  %v1097_v47 = vor.u32 %v1096_v38, %v1093_v37  ;;  %v703_v49 = vshrl.u32 %v665_v39, 16  ;;  %v1060_v50 = vld [vmem:[%s4290_s26 + $0x1c] sm:$0xf]  ;;  %v706_v53 = vshll.u32 %v665_v39, 16  ;;  %v3832_v38 = vld [vmem:[%s4832_s3 + $0xc0] sm:$0xff]  }
  0x64   : > { %v1107_v52 = vor.u32 %v1106_v44, %v1102_v43  ;;  %v712_v54 = vshrl.u32 %v666_v42, 16  ;;  %v715_v55 = vshll.u32 %v666_v42, 16  ;;  %v1061_v56 = vld [vmem:[%s4290_s26 + $0x20] sm:$0xf]  ;;  %v2961_v58 = vrot.slane %v698_v48, 11 }
  0x65   : > { %v1098_v57 = vrot.slane %v1097_v47, 4  ;;  %v705_v59 = vrot.slane %v703_v49, 7  ;;  %v1062_v60 = vld [vmem:[%s4290_s26 + $0x24] sm:$0x1]  ;;  %v1115_v61 = vshrl.u32 %v1060_v50, 16  ;;  %v1118_v1 = vshll.u32 %v1060_v50, 16 }
  0x66   : > { %3339 = vmatpush3.bf16.msra.mxu0 %v3816_v13  ;;  %3579 = vmatpush3.bf16.msra.mxu1 %v3815_v12  ;;  %v1108_v62 = vrot.slane %v1107_v52, 4  ;;  %v714_v0 = vrot.slane %v712_v54, 7  ;;  %v1124_v2 = vshll.u32 %v1061_v56, 16  ;;  %v1128_v11 = vshrl.u32 %v1061_v56, 16  ;;  %v1065_v25 = vld [vmem:[%s4290_s26 + $0x38] sm:$0x1] }
  0x67   : > { %3340 = vmatprep.subr.bf16.mxu0 %v3817_v14  ;;  %3580 = vmatprep.subr.bf16.mxu1 %v3818_v15  ;;  %v1103_v3 = vsel %vm4311_vm7, %v1098_v57, %v1102_v43  ;;  %v708_v40 = vor.u32 %v706_v53, %v705_v59  ;;  %v710_v41 = vrot.slane %v705_v59, 4  ;;  %v1117_v4 = vrot.slane %v1115_v61, 4  ;;  %v667_v32 = vld [vmem:[%s4290_s26 + $0x18] sm:$0x8]  ;;  %v668_v35 = vld [vmem:[%s4290_s26 + $0x1c] sm:$0xf] }
  0x68   : > { %v1113_v5 = vsel %vm4311_vm7, %v1108_v62, %v1112_v45  ;;  %v717_v6 = vor.u32 %v715_v55, %v714_v0  ;;  %v1120_v7 = vrot.slane %v1118_v1, 5  ;;  %v1126_v8 = vrot.slane %v1124_v2, 5  ;;  %v1066_v44 = vld [vmem:[%s4290_s26 + $0x44] sm:$0xf]  ;;  %v1067_v50 = vld [vmem:[%s4290_s26 + $0x48] sm:$0xf] }
  0x69   : > { %v2991_v9 = vcombine.low %v1103_v3, %v1113_v5  ;;  %v709_v10 = vsel %vm4319_vm8, %v2961_v58, %v708_v40  ;;  %v1134_v12 = vshll.u32 %v1062_v60, 16  ;;  %v1158_v31 = vshll.u32 %v1065_v25, 16  ;;  %v3835_v52 = vld [vmem:[%s4832_s3 + $0xc8] sm:$0xff]   ;;  %v3837_v0 = vld [vmem:[%s4832_s3 + $0x110] sm:$0xff]  }
  0x6a   : > { %3341 = vmatpush3.bf16.msra.mxu0 %v3819_v16  ;;  %3581 = vmatpush3.bf16.msra.mxu1 %v3818_v15  ;;  %v718_v13 = vsel %vm4319_vm8, %v710_v41, %v717_v6  ;;  %v1121_v14 = vor.u32 %v1120_v7, %v1117_v4  ;;  %v3833_v15 = vld [vmem:[%s4832_s3 + $0x180] sm:$0xff]   ;;  %v720_v48 = vshrl.u32 %v667_v32, 16  ;;  %v725_v49 = vshrl.u32 %v668_v35, 16  ;;  %v1068_v57 = vld [vmem:[%s4290_s26 + $0x4c] sm:$0x1] }
  0x6b   : > { %3342 = vmatprep.subr.bf16.mxu0 %v3820_v17  ;;  %3582 = vmatprep.subr.bf16.mxu1 %v3821_v18  ;;  %v2971_v16 = vcombine.low %v709_v10, %v718_v13  ;;  %v1130_v17 = vrot.slane %v1128_v11, 4  ;;  %v1160_v43 = vrot.slane %v1158_v31, 5  ;;  %v728_v54 = vshll.u32 %v668_v35, 16  ;;  %v3838_v58 = vld [vmem:[%s4832_s3 + $0x1c8] sm:$0xff]  }
  0x6c   : > { %3588 = vmatprep.mubr.bf16.mxu1 %v2991_v9  ;;  %v2962_v60 = vrot.slane %v720_v48, 11  ;;  %v727_v61 = vrot.slane %v725_v49, 7  ;;  %v1163_v62 = vshrl.u32 %v1066_v44, 16  ;;  %v1166_v3 = vshll.u32 %v1066_v44, 16  ;;  %v3840_v11 = vld [vmem:[%s4832_s3 + $0x188] sm:$0xff]  }
  0x6d   : > { %v1172_v40 = vshll.u32 %v1067_v50, 16 }
  0x6e   : > { %3343 = vmatpush3.bf16.msra.mxu0 %v3822_v19  ;;  %3583 = vmatpush3.bf16.msra.mxu1 %v3821_v18  ;;  %v1136_v18 = vrot.slane %v1134_v12, 5  ;;  %v1122_v19 = vrot.slane %v1121_v14, 4  ;;  %v730_v4 = vor.u32 %v728_v54, %v727_v61  ;;  %v732_v5 = vrot.slane %v727_v61, 4  ;;  %v1073_v61 = vld [vmem:[%s4290_s26 + $0x70] sm:$0xf] }
  0x6f   : > { %3344 = vmatprep.subr.bf16.mxu0 %v3823_v20  ;;  %3584 = vmatprep.subr.bf16.mxu1 %v3824_v21  ;;  %v4335_v20 = vld [vmem:[%s4290_s26 + $0x1c] sm:$0xff]   ;;  %v1165_v6 = vrot.slane %v1163_v62, 4  ;;  %v1168_v9 = vrot.slane %v1166_v3, 5  ;;  %v1174_v10 = vrot.slane %v1172_v40, 5  ;;  %v1176_v14 = vshrl.u32 %v1067_v50, 16  ;;  %v3847_v40 = vld [vmem:[%s4832_s3 + $0x190] sm:$0xff]  }
  0x70   : > { %v731_v13 = vsel %vm4319_vm8, %v2962_v60, %v730_v4  ;;  %v1072_v60 = vld [vmem:[%s4290_s26 + $0x6c] sm:$0xf]  ;;  %v1074_v3 = vld [vmem:[%s4290_s26 + $0x74] sm:$0x1] }
  0x71   : > { %v1211_v4 = vshrl.u32 %v1072_v60, 16 }
  0x72   : > { %3345 = vmatpush3.bf16.msra.mxu0 %v3825_v22  ;;  %3585 = vmatpush3.bf16.msra.mxu1 %v3824_v21  ;;  %v1131_v21 = vor.u32 %v1130_v17, %v1126_v8  ;;  %v1063_v22 = vld [vmem:[%s4290_s26 + $0x30] sm:$0xf]  ;;  %v1169_v17 = vor.u32 %v1168_v9, %v1165_v6  ;;  %v1220_v6 = vshll.u32 %v1073_v61, 16 }
  0x73   : > { %3346 = vmatprep.subr.bf16.mxu0 %v3826_v23  ;;  %3586 = vmatprep.subr.bf16.mxu1 %v3827_v24  ;;  %v1127_v23 = vsel %vm4311_vm7, %v1122_v19, %v1126_v8  ;;  %v1139_v26 = vshrl.u32 %v1063_v22, 16  ;;  %v1142_v27 = vshll.u32 %v1063_v22, 16  ;;  %v3841_v22 = vld [vmem:[%s4832_s3 + $0x118] sm:$0xff]  }
  0x74   : > { %v1132_v28 = vrot.slane %v1131_v21, 4  ;;  %v1178_v21 = vrot.slane %v1176_v14, 4  ;;  %v1213_v14 = vrot.slane %v1211_v4, 4 }
  0x75   : > { %v1141_v33 = vrot.slane %v1139_v26, 4  ;;  %v1144_v34 = vrot.slane %v1142_v27, 5  ;;  %v4396_v27 = vld [vmem:[%s4290_s26 + $0x30] sm:$0xff]  }
  0x76   : > { %3347 = vmatpush3.bf16.msra.mxu0 %v3828_v29  ;;  %3587 = vmatpush3.bf16.msra.mxu1 %v3827_v24  ;;  %v1064_v24 = vld [vmem:[%s4290_s26 + $0x34] sm:$0xf]  ;;  %v1137_v37 = vsel %vm4311_vm7, %v1132_v28, %v1136_v18  ;;  %v1179_v25 = vor.u32 %v1178_v21, %v1174_v10  ;;  %v1069_v28 = vld [vmem:[%s4290_s26 + $0x58] sm:$0xf] }
  0x77   : > { %3412 = vmatprep.subr.bf16.mxu1 %v3830_v36  ;;  %3492 = vmatprep.subr.bf16.mxu0 %v3831_v46  ;;  %v1148_v29 = vshll.u32 %v1064_v24, 16  ;;  %v1152_v30 = vshrl.u32 %v1064_v24, 16  ;;  %v669_v36 = vld [vmem:[%s4290_s26 + $0x20] sm:$0xf]  ;;  %v4352_v45 = vcombine.low %v1127_v23, %v1137_v37  ;;  %v3834_v46 = vld [vmem:[%s4832_s3 + $0x108] sm:$0xff]   ;;  %v1145_v47 = vor.u32 %v1144_v34, %v1141_v33  ;;  %v3839_v18 = vld [vmem:[%s4832_s3 + $0xd0] sm:$0xff]  }
  0x78   : > { %v734_v55 = vshrl.u32 %v669_v36, 16  ;;  %v737_v56 = vshll.u32 %v669_v36, 16  ;;  %v1170_v23 = vrot.slane %v1169_v17, 4  ;;  %v3842_v24 = vld [vmem:[%s4832_s3 + $0xd8] sm:$0xff]   ;;  %v1187_v31 = vshrl.u32 %v1069_v28, 16  ;;  %v3844_v34 = vld [vmem:[%s4832_s3 + $0x120] sm:$0xff]  }
  0x79   : > { %1629 = vmatmul.mubr.bf16.vlgmr.msra.gmra.mrb[0].mxu0 %v2971_v16  ;;  %v1150_v39 = vrot.slane %v1148_v29, 5  ;;  %v1154_v42 = vrot.slane %v1152_v30, 4  ;;  %3589 = vmatmul.mubr.bf16.vlgmr.msra.gmra.mrb[0].mxu1 %v4352_v45  ;;  %v1146_v59 = vrot.slane %v1145_v47, 4  ;;  %v1070_v29 = vld [vmem:[%s4290_s26 + $0x5c] sm:$0xf]  ;;  %v1190_v32 = vshll.u32 %v1069_v28, 16 }
  0x7a   : > { %3493 = vmatpush3.bf16.msra.mxu0 %v3833_v15  ;;  %1636 = vmatprep.mubr.bf16.mxu0 %v4335_v20  ;;  %v736_v2 = vrot.slane %v734_v55, 7  ;;  %v1182_v15 = vshll.u32 %v1068_v57, 16  ;;  %v1071_v30 = vld [vmem:[%s4290_s26 + $0x60] sm:$0x1]  ;;  %v1196_v33 = vshll.u32 %v1070_v29, 16  ;;  %v1175_v35 = vsel %vm4311_vm7, %v1170_v23, %v1174_v10  ;;  %v3849_v17 = vld [vmem:[%s4832_s3 + $0xe8] sm:$0xff]  }
  0x7b   : > { %v1155_v53 = vor.u32 %v1154_v42, %v1150_v39  ;;  %3413 = vmatpush3.bf16.msra.mxu1 %v3832_v38  ;;  %3494 = vmatprep.subr.bf16.mxu0 %v3838_v58  ;;  %v1151_v41 = vsel %vm4311_vm7, %v1146_v59, %v1150_v39  ;;  %v1180_v36 = vrot.slane %v1179_v25, 4  ;;  %v1200_v37 = vshrl.u32 %v1070_v29, 16  ;;  %v670_v39 = vld [vmem:[%s4290_s26 + $0x2c] sm:$0x8]  ;;  %v3845_v42 = vld [vmem:[%s4832_s3 + $0x1d0] sm:$0xff]   ;;  %v3846_v55 = vld [vmem:[%s4832_s3 + $0xe0] sm:$0xff]  }
  0x7c   : > { %3414 = vmatprep.subr.bf16.mxu1 %v3834_v46  ;;  %v739_v8 = vor.u32 %v737_v56, %v736_v2  ;;  %v1184_v26 = vrot.slane %v1182_v15, 5  ;;  %v1206_v38 = vshll.u32 %v1071_v30, 16  ;;  %v1192_v44 = vrot.slane %v1190_v32, 5  ;;  %v671_v47 = vld [vmem:[%s4290_s26 + $0x30] sm:$0xf]  ;;  %v3852_v32 = vld [vmem:[%s4832_s3 + $0x1d8] sm:$0xff]  }
  0x7d   : > { %v1156_v1 = vrot.slane %v1155_v53, 4  ;;  %v1198_v46 = vrot.slane %v1196_v33, 5  ;;  %v742_v48 = vshrl.u32 %v670_v39, 16  ;;  %v1202_v50 = vrot.slane %v1200_v37, 4  ;;  %v672_v53 = vld [vmem:[%s4290_s26 + $0x34] sm:$0xf] }
  0x7e   : > { %v740_v16 = vsel %vm4319_vm8, %v732_v5, %v739_v8  ;;  %3495 = vmatpush3.bf16.msra.mxu0 %v3840_v11  ;;  %v1185_v49 = vsel %vm4311_vm7, %v1180_v36, %v1184_v26  ;;  %v747_v54 = vshrl.u32 %v671_v47, 16  ;;  %v750_v59 = vshll.u32 %v671_v47, 16  ;;  %v3848_v11 = vld [vmem:[%s4832_s3 + $0x128] sm:$0xff]   ;;  %v3851_v29 = vld [vmem:[%s4832_s3 + $0x130] sm:$0xff]   ;;  %v1076_v39 = vld [vmem:[%s4290_s26 + $0x84] sm:$0xf] }
  0x7f   : > { %v1161_v7 = vsel %vm4311_vm7, %v1156_v1, %v1160_v43  ;;  %3415 = vmatpush3.bf16.msra.mxu1 %v3835_v52  ;;  %v4386_v19 = vcombine.low %v731_v13, %v740_v16  ;;  %v1189_v43 = vrot.slane %v1187_v31, 4  ;;  %v1208_v52 = vrot.slane %v1206_v38, 5  ;;  %3496 = vmatprep.subr.bf16.mxu0 %v3845_v42  ;;  %v1075_v38 = vld [vmem:[%s4290_s26 + $0x80] sm:$0xf]  ;;  %v1077_v42 = vld [vmem:[%s4290_s26 + $0x88] sm:$0x1] }
  0x80   : > { %v4376_v12 = vcombine.low %v1151_v41, %v1161_v7  ;;  %3416 = vmatprep.subr.bf16.mxu1 %v3837_v0  ;;  %v4418_v56 = vcombine.low %v1175_v35, %v1185_v49  ;;  %v2963_v58 = vrot.slane %v742_v48, 11  ;;  %v1203_v62 = vor.u32 %v1202_v50, %v1198_v46  ;;  %v673_v48 = vld [vmem:[%s4290_s26 + $0x40] sm:$0x8] }
  0x81   : > { %1637 = vmatmul.mubr.bf16.gmra.mrb[4].mxu0 %v4386_v19  ;;  %v1193_v57 = vor.u32 %v1192_v44, %v1189_v43  ;;  %v749_v0 = vrot.slane %v747_v54, 7  ;;  %v756_v1 = vshrl.u32 %v672_v53, 16  ;;  %v759_v2 = vshll.u32 %v672_v53, 16  ;;  %v675_v53 = vld [vmem:[%s4290_s26 + $0x48] sm:$0xf] }
  0x82   : > { %3592 = vmatprep.mubr.bf16.mxu1 %v4376_v12  ;;  %1644 = vmatprep.mubr.bf16.mxu0 %v4396_v27  ;;  %v1214_v5 = vshll.u32 %v1072_v60, 16  ;;  %v1204_v7 = vrot.slane %v1203_v62, 4  ;;  %v1222_v16 = vrot.slane %v1220_v6, 5  ;;  %v1224_v23 = vshrl.u32 %v1073_v61, 16  ;;  %v3853_v60 = vld [vmem:[%s4832_s3 + $0xf0] sm:$0xff]   ;;  %v3855_v6 = vld [vmem:[%s4832_s3 + $0x138] sm:$0xff]  }
  0x83   : > { %3417 = vmatpush3.bf16.msra.mxu1 %v3839_v18  ;;  %v1194_v41 = vrot.slane %v1193_v57, 4  ;;  %v752_v8 = vor.u32 %v750_v59, %v749_v0  ;;  %v754_v9 = vrot.slane %v749_v0, 4  ;;  %v758_v10 = vrot.slane %v756_v1, 7  ;;  %3497 = vmatpush3.bf16.msra.mxu0 %v3847_v40  ;;  %v1078_v59 = vld [vmem:[%s4290_s26 + $0x94] sm:$0xf] }
  0x84   : > { %3418 = vmatprep.subr.bf16.mxu1 %v3841_v22  ;;  %3593 = vmatmul.mubr.bf16.gmra.mrb[4].mxu1 %v4418_v56  ;;  %v1216_v15 = vrot.slane %v1214_v5, 5  ;;  %v1209_v18 = vsel %vm4311_vm7, %v1204_v7, %v1208_v52  ;;  %v1230_v28 = vshll.u32 %v1074_v3, 16  ;;  %v1226_v31 = vrot.slane %v1224_v23, 4  ;;  %v674_v52 = vld [vmem:[%s4290_s26 + $0x44] sm:$0xf] }
  0x85   : > { %v1199_v13 = vsel %vm4311_vm7, %v1194_v41, %v1198_v46  ;;  %v753_v21 = vsel %vm4319_vm8, %v2963_v58, %v752_v8  ;;  %v761_v22 = vor.u32 %v759_v2, %v758_v10  ;;  %3498 = vmatprep.subr.bf16.mxu0 %v3852_v32  ;;  %v1235_v44 = vshrl.u32 %v1075_v38, 16  ;;  %v3854_v2 = vld [vmem:[%s4832_s3 + $0x198] sm:$0xff]  }
  0x86   : > { %v4442_v25 = vcombine.low %v1199_v13, %v1209_v18  ;;  %v1217_v26 = vor.u32 %v1216_v15, %v1213_v14  ;;  %v1232_v35 = vrot.slane %v1230_v28, 5  ;;  %v1227_v36 = vor.u32 %v1226_v31, %v1222_v16  ;;  %v1079_v5 = vld [vmem:[%s4290_s26 + $0x98] sm:$0xf]  ;;  %v1080_v10 = vld [vmem:[%s4290_s26 + $0x9c] sm:$0x1] }
  0x87   : > { %3419 = vmatpush3.bf16.msra.mxu1 %v3842_v24  ;;  %v4440_v24 = vld [vmem:[%s4290_s26 + $0x44] sm:$0xff]   ;;  %v762_v30 = vsel %vm4319_vm8, %v754_v9, %v761_v22  ;;  %v1238_v46 = vshll.u32 %v1075_v38, 16  ;;  %v1244_v47 = vshll.u32 %v1076_v39, 16  ;;  %v1248_v49 = vshrl.u32 %v1076_v39, 16  ;;  %3499 = vmatpush3.bf16.msra.mxu0 %v3854_v2  ;;  %v3856_v13 = vld [vmem:[%s4832_s3 + $0xf8] sm:$0xff]  }
  0x88   : > { %3420 = vmatprep.subr.bf16.mxu1 %v3844_v34  ;;  %3596 = vmatprep.mubr.bf16.mxu1 %v4442_v25  ;;  %v4453_v33 = vcombine.low %v753_v21, %v762_v30  ;;  %v1218_v34 = vrot.slane %v1217_v26, 4  ;;  %v1228_v43 = vrot.slane %v1227_v36, 4  ;;  %v1254_v50 = vshll.u32 %v1077_v42, 16  ;;  %v4488_v31 = vld [vmem:[%s4290_s26 + $0x58] sm:$0xff]  }
  0x89   : > { %v1240_v57 = vrot.slane %v1238_v46, 5  ;;  %v1246_v58 = vrot.slane %v1244_v47, 5  ;;  %v1250_v62 = vrot.slane %v1248_v49, 4  ;;  %v764_v1 = vshrl.u32 %v673_v48, 16 }
  0x8a   : > { %1645 = vmatmul.mubr.bf16.gmra.mrb[8].mxu0 %v4453_v33  ;;  %v1223_v37 = vsel %vm4311_vm7, %v1218_v34, %v1222_v16  ;;  %v1233_v54 = vsel %vm4311_vm7, %v1228_v43, %v1232_v35  ;;  %v1256_v0 = vrot.slane %v1254_v50, 5  ;;  %v769_v40 = vshrl.u32 %v674_v52, 16  ;;  %v3860_v50 = vld [vmem:[%s4832_s3 + $0x1a0] sm:$0xff]  }
  0x8b   : > { %3421 = vmatpush3.bf16.msra.mxu1 %v3846_v55  ;;  %1652 = vmatprep.mubr.bf16.mxu0 %v4440_v24  ;;  %v1237_v55 = vrot.slane %v1235_v44, 4  ;;  %v4471_v61 = vcombine.low %v1223_v37, %v1233_v54  ;;  %v772_v41 = vshll.u32 %v674_v52, 16  ;;  %v778_v4 = vshrl.u32 %v675_v53, 16  ;;  %v4495_v37 = vld [vmem:[%s4832_s3 + $0x140] sm:$0xff]   ;;  %v676_v54 = vld [vmem:[%s4290_s26 + $0x54] sm:$0x8] }
  0x8c   : > { %3422 = vmatprep.subr.bf16.mxu1 %v3848_v11  ;;  %v1251_v7 = vor.u32 %v1250_v62, %v1246_v58  ;;  %v2964_v8 = vrot.slane %v764_v1, 11  ;;  %v781_v9 = vshll.u32 %v675_v53, 16  ;;  %v1259_v11 = vshrl.u32 %v1078_v59, 16  ;;  %v3859_v44 = vld [vmem:[%s4832_s3 + $0x1e0] sm:$0xff]  }
  0x8d   : > { %v1241_v3 = vor.u32 %v1240_v57, %v1237_v55  ;;  %3597 = vmatmul.mubr.bf16.gmra.mrb[8].mxu1 %v4471_v61  ;;  %v771_v15 = vrot.slane %v769_v40, 7  ;;  %v780_v16 = vrot.slane %v778_v4, 7  ;;  %v1268_v22 = vshll.u32 %v1079_v5, 16  ;;  %3500 = vmatprep.subr.bf16.mxu0 %v3859_v44  ;;  %v677_v55 = vld [vmem:[%s4290_s26 + $0x58] sm:$0xf]  ;;  %v3863_v4 = vld [vmem:[%s4832_s3 + $0x1e8] sm:$0xff]  }
  0x8e   : > { %v1252_v18 = vrot.slane %v1251_v7, 4  ;;  %v1261_v21 = vrot.slane %v1259_v11, 4  ;;  %v1272_v23 = vshrl.u32 %v1079_v5, 16  ;;  %v1278_v43 = vshll.u32 %v1080_v10, 16  ;;  %v678_v57 = vld [vmem:[%s4290_s26 + $0x5c] sm:$0xf]  ;;  %3501 = vmatpush3.bf16.msra.mxu0 %v3860_v50 }
  0x8f   : > { %3423 = vmatpush3.bf16.msra.mxu1 %v3849_v17  ;;  %v1242_v14 = vrot.slane %v1241_v3, 4  ;;  %v1262_v17 = vshll.u32 %v1078_v59, 16  ;;  %v774_v28 = vor.u32 %v772_v41, %v771_v15  ;;  %v783_v30 = vor.u32 %v781_v9, %v780_v16  ;;  %v679_v9 = vld [vmem:[%s4290_s26 + $0x68] sm:$0x8]  ;;  %3502 = vmatprep.subr.bf16.mxu0 %v3863_v4  ;;  %v4534_v11 = vld [vmem:[%s4290_s26 + $0x6c] sm:$0xff]  }
  0x90   : > { %3424 = vmatprep.subr.bf16.mxu1 %v3851_v29  ;;  %v776_v29 = vrot.slane %v771_v15, 4  ;;  %v1257_v32 = vsel %vm4311_vm7, %v1252_v18, %v1256_v0  ;;  %v1270_v35 = vrot.slane %v1268_v22, 5  ;;  %v1274_v36 = vrot.slane %v1272_v23, 4  ;;  %v684_v44 = vld [vmem:[%s4290_s26 + $0x84] sm:$0xf] }
  0x91   : > { %v1247_v26 = vsel %vm4311_vm7, %v1242_v14, %v1246_v58  ;;  %v1264_v34 = vrot.slane %v1262_v17, 5  ;;  %v775_v39 = vsel %vm4319_vm8, %v2964_v8, %v774_v28  ;;  %v1280_v49 = vrot.slane %v1278_v43, 5  ;;  %v681_v14 = vld [vmem:[%s4290_s26 + $0x70] sm:$0xf]  ;;  %v3862_v28 = vld [vmem:[%s4832_s3 + $0x148] sm:$0xff]  }
  0x92   : > { %v4497_v38 = vcombine.low %v1247_v26, %v1257_v32  ;;  %v784_v42 = vsel %vm4319_vm8, %v776_v29, %v783_v30  ;;  %v1275_v48 = vor.u32 %v1274_v36, %v1270_v35  ;;  %v786_v58 = vshrl.u32 %v676_v54, 16  ;;  %v3868_v43 = vld [vmem:[%s4832_s3 + $0x1b0] sm:$0xff]   ;;  %v4566_v54 = vld [vmem:[%s4290_s26 + $0x80] sm:$0xff]  }
  0x93   : > { %3425 = vmatpush3.bf16.msra.mxu1 %v3853_v60  ;;  %v4506_v46 = vcombine.low %v775_v39, %v784_v42  ;;  %v1265_v47 = vor.u32 %v1264_v34, %v1261_v21  ;;  %v791_v62 = vshrl.u32 %v677_v55, 16  ;;  %v794_v0 = vshll.u32 %v677_v55, 16  ;;  %v682_v39 = vld [vmem:[%s4290_s26 + $0x7c] sm:$0x8]  ;;  %v683_v42 = vld [vmem:[%s4290_s26 + $0x80] sm:$0xf] }
  0x94   : > { %3426 = vmatprep.subr.bf16.mxu1 %v3855_v6  ;;  %3600 = vmatprep.mubr.bf16.mxu1 %v4497_v38  ;;  %v1276_v53 = vrot.slane %v1275_v48, 4  ;;  %v2965_v2 = vrot.slane %v786_v58, 11  ;;  %v800_v3 = vshrl.u32 %v678_v57, 16  ;;  %v803_v40 = vshll.u32 %v678_v57, 16  ;;  %v3864_v6 = vld [vmem:[%s4832_s3 + $0x1a8] sm:$0xff]  }
  0x95   : > { %1653 = vmatmul.mubr.bf16.gmra.mrb[12].mxu0 %v4506_v46  ;;  %v1266_v52 = vrot.slane %v1265_v47, 4  ;;  %v793_v41 = vrot.slane %v791_v62, 7  ;;  %v808_v15 = vshrl.u32 %v679_v9, 16  ;;  %v822_v21 = vshrl.u32 %v681_v14, 16 }
  0x96   : > { %1660 = vmatprep.mubr.bf16.mxu0 %v4488_v31  ;;  %v1281_v60 = vsel %vm4311_vm7, %v1276_v53, %v1280_v49  ;;  %v802_v5 = vrot.slane %v800_v3, 7  ;;  %3503 = vmatpush3.bf16.msra.mxu0 %v3864_v6  ;;  %v825_v26 = vshll.u32 %v681_v14, 16  ;;  %v830_v47 = vshrl.u32 %v682_v39, 16  ;;  %v685_v3 = vld [vmem:[%s4290_s26 + $0x90] sm:$0x8]  ;;  %v3870_v6 = vld [vmem:[%s4832_s3 + $0x158] sm:$0xff]  }
  0x97   : > { %3427 = vmatpush3.bf16.msra.mxu1 %v3856_v13  ;;  %v1271_v59 = vsel %vm4311_vm7, %v1266_v52, %v1270_v35  ;;  %v796_v7 = vor.u32 %v794_v0, %v793_v41  ;;  %v798_v8 = vrot.slane %v793_v41, 4  ;;  %v680_v13 = vld [vmem:[%s4290_s26 + $0x6c] sm:$0xf]  ;;  %v2966_v23 = vrot.slane %v808_v15, 11  ;;  %v3871_v0 = vld [vmem:[%s4832_s3 + $0x1f8] sm:$0xff]  }
  0x98   : > { %3604 = vmatprep.subr.bf16.mxu1 %v4495_v37  ;;  %v4522_v1 = vcombine.low %v1271_v59, %v1281_v60  ;;  %v805_v10 = vor.u32 %v803_v40, %v802_v5  ;;  %v813_v17 = vshrl.u32 %v680_v13, 16  ;;  %v816_v18 = vshll.u32 %v680_v13, 16  ;;  %v686_v40 = vld [vmem:[%s4290_s26 + $0x94] sm:$0xf]  ;;  %v687_v41 = vld [vmem:[%s4290_s26 + $0x98] sm:$0xf] }
  0x99   : > { %v797_v16 = vsel %vm4319_vm8, %v2965_v2, %v796_v7  ;;  %v824_v32 = vrot.slane %v822_v21, 7  ;;  %v835_v48 = vshrl.u32 %v683_v42, 16  ;;  %v838_v49 = vshll.u32 %v683_v42, 16  ;;  %v3872_v7 = vld [vmem:[%s4832_s3 + $0x1b8] sm:$0xff]   ;;  %v4602_v21 = vld [vmem:[%s4832_s3 + $0x200] sm:$0xff]   ;;  %v4633_v42 = vld [vmem:[%s4832_s3 + $0x208] sm:$0xff]  }
  0x9a   : > { %3601 = vmatmul.mubr.bf16.gmra.mrb[12].mxu1 %v4522_v1  ;;  %v806_v22 = vsel %vm4319_vm8, %v798_v8, %v805_v10  ;;  %v815_v30 = vrot.slane %v813_v17, 7  ;;  %v844_v53 = vshrl.u32 %v684_v44, 16  ;;  %v2967_v58 = vrot.slane %v830_v47, 11  ;;  %v3873_v17 = vld [vmem:[%s4832_s3 + $0x160] sm:$0xff]   ;;  %v3880_v39 = vld [vmem:[%s4832_s3 + $0x178] sm:$0xff]  }
  0x9b   : > { %2055 = vmatprep.mubr.bf16.mxu1 %v4335_v20  ;;  %v3867_v20 = vld [vmem:[%s4832_s3 + $0x1f0] sm:$0xff]   ;;  %v4548_v29 = vcombine.low %v797_v16, %v806_v22  ;;  %v827_v36 = vor.u32 %v825_v26, %v824_v32  ;;  %v837_v55 = vrot.slane %v835_v48, 7  ;;  %v852_v4 = vshrl.u32 %v685_v3, 16  ;;  %v1081_v3 = vld [vmem:[%s4290_s26 + $0xa8] sm:$0xf] }
  0x9c   : > { %3504 = vmatprep.subr.bf16.mxu0 %v3867_v20  ;;  %v818_v34 = vor.u32 %v816_v18, %v815_v30  ;;  %v820_v35 = vrot.slane %v815_v30, 4  ;;  %v846_v59 = vrot.slane %v844_v53, 7  ;;  %v857_v5 = vshrl.u32 %v686_v40, 16  ;;  %v4597_v18 = vld [vmem:[%s4290_s26 + $0x94] sm:$0xff]   ;;  %v3875_v30 = vld [vmem:[%s4832_s3 + $0x168] sm:$0xff]  }
  0x9d   : > { %1661 = vmatmul.mubr.bf16.gmra.mrb[16].mxu0 %v4548_v29  ;;  %v840_v60 = vor.u32 %v838_v49, %v837_v55  ;;  %v842_v62 = vrot.slane %v837_v55, 4  ;;  %v860_v8 = vshll.u32 %v686_v40, 16  ;;  %v866_v9 = vshrl.u32 %v687_v41, 16  ;;  %v4666_v55 = vld [vmem:[%s4832_s3 + $0x220] sm:$0xff]   ;;  %v1082_v40 = vld [vmem:[%s4290_s26 + $0xac] sm:$0xf] }
  0x9e   : > { %1668 = vmatprep.mubr.bf16.mxu0 %v4534_v11  ;;  %v819_v50 = vsel %vm4319_vm8, %v2966_v23, %v818_v34  ;;  %v828_v52 = vsel %vm4319_vm8, %v820_v35, %v827_v36  ;;  %3505 = vmatpush3.bf16.msra.mxu0 %v3868_v43  ;;  %v859_v14 = vrot.slane %v857_v5, 7  ;;  %v869_v15 = vshll.u32 %v687_v41, 16  ;;  %v3877_v35 = vld [vmem:[%s4832_s3 + $0x170] sm:$0xff]   ;;  %v689_v43 = vld [vmem:[%s4290_s26 + $0xa8] sm:$0xf] }
  0x9f   : > { %v4571_v57 = vcombine.low %v819_v50, %v828_v52  ;;  %3506 = vmatprep.subr.bf16.mxu0 %v3871_v0  ;;  %v841_v10 = vsel %vm4319_vm8, %v2967_v58, %v840_v60  ;;  %v868_v16 = vrot.slane %v866_v9, 7  ;;  %v2968_v22 = vrot.slane %v852_v4, 11  ;;  %v4674_v60 = vld [vmem:[%s4832_s3 + $0x228] sm:$0xff]   ;;  %v692_v4 = vld [vmem:[%s4290_s26 + $0xbc] sm:$0xf] }
  0xa0   : > { %v862_v23 = vor.u32 %v860_v8, %v859_v14  ;;  %v864_v26 = vrot.slane %v859_v14, 4  ;;  %v879_v47 = vshrl.u32 %v689_v43, 16  ;;  %v882_v52 = vshll.u32 %v689_v43, 16  ;;  %v693_v5 = vld [vmem:[%s4290_s26 + $0xc0] sm:$0xf] }
  0xa1   : > { %v1296_v41 = vshrl.u32 %v1082_v40, 16  ;;  %v910_v8 = vshrl.u32 %v693_v5, 16  ;;  %v1084_v43 = vld [vmem:[%s4290_s26 + $0xbc] sm:$0xf] }
  0xa2   : > { %2056 = vmatmul.mubr.bf16.vlgmr.msra.gmra.mrb[16].mxu1 %v4386_v19  ;;  %v847_v19 = vshll.u32 %v684_v44, 16  ;;  %3507 = vmatpush3.bf16.msra.mxu0 %v3872_v7  ;;  %v863_v32 = vsel %vm4319_vm8, %v2968_v22, %v862_v23  ;;  %v690_v44 = vld [vmem:[%s4290_s26 + $0xac] sm:$0xf]  ;;  %v881_v50 = vrot.slane %v879_v47, 7  ;;  %v901_v7 = vshrl.u32 %v692_v4, 16 }
  0xa3   : > { %3605 = vmatpush3.bf16.msra.mxu1 %v4495_v37  ;;  %2063 = vmatprep.mubr.bf16.mxu1 %v4396_v27  ;;  %v3866_v37 = vld [vmem:[%s4832_s3 + $0x150] sm:$0xff]   ;;  %v888_v48 = vshrl.u32 %v690_v44, 16  ;;  %v1298_v14 = vrot.slane %v1296_v41, 4  ;;  %v1307_v47 = vshrl.u32 %v1084_v43, 16 }
  0xa4   : > { %3606 = vmatprep.subr.bf16.mxu1 %v3862_v28  ;;  %v849_v2 = vor.u32 %v847_v19, %v846_v59  ;;  %3636 = vmatprep.subr.bf16.mxu0 %v4602_v21  ;;  %v891_v19 = vshll.u32 %v690_v44, 16  ;;  %v884_v58 = vor.u32 %v882_v52, %v881_v50 }
  0xa5   : > { %1669 = vmatmul.mubr.bf16.gmra.mrb[20].mxu0 %v4571_v57  ;;  %v890_v53 = vrot.slane %v888_v48, 7  ;;  %v1310_v48 = vshll.u32 %v1084_v43, 16 }
  0xa6   : > { %1676 = vmatprep.mubr.bf16.mxu0 %v4566_v54  ;;  %v850_v13 = vsel %vm4319_vm8, %v842_v62, %v849_v2 }
  0xa7   : > { %3607 = vmatpush3.bf16.msra.mxu1 %v3862_v28  ;;  %v4604_v20 = vcombine.low %v841_v10, %v850_v13  ;;  %v871_v28 = vor.u32 %v869_v15, %v868_v16  ;;  %v893_v59 = vor.u32 %v891_v19, %v890_v53  ;;  %v1083_v15 = vld [vmem:[%s4290_s26 + $0xb0] sm:$0x1]  ;;  %v1309_v19 = vrot.slane %v1307_v47, 4 }
  0xa8   : > { %3608 = vmatprep.subr.bf16.mxu1 %v3866_v37 }
  0xa9   : > { %v872_v34 = vsel %vm4319_vm8, %v864_v26, %v871_v28  ;;  %v1302_v26 = vshll.u32 %v1083_v15, 16  ;;  %v3885_v28 = vld [vmem:[%s4290_s26 + $0xbc] sm:$0xff]  }
  0xaa   : > { %2064 = vmatmul.mubr.bf16.gmra.mrb[20].mxu1 %v4453_v33  ;;  %v4621_v36 = vcombine.low %v863_v32, %v872_v34 }
  0xab   : > { %2071 = vmatprep.mubr.bf16.mxu1 %v4440_v24  ;;  %3609 = vmatpush3.bf16.msra.mxu1 %v3866_v37 }
  0xac   : > { %3610 = vmatprep.subr.bf16.mxu1 %v3870_v6 }
  0xad   : > { %1677 = vmatmul.mubr.bf16.gmra.mrb[24].mxu0 %v4604_v20 }
  0xae   : > { %1684 = vmatprep.mubr.bf16.mxu0 %v4597_v18 }
  0xaf   : > { %3611 = vmatpush3.bf16.msra.mxu1 %v3870_v6  ;;  %v691_v6 = vld [vmem:[%s4290_s26 + $0xb8] sm:$0x8] }
  0xb0   : > { %3612 = vmatprep.subr.bf16.mxu1 %v3873_v17  ;;  %v896_v16 = vshrl.u32 %v691_v6, 16 }
  0xb2   : > { %2072 = vmatmul.mubr.bf16.gmra.mrb[24].mxu1 %v4506_v46 }
  0xb3   : > { %2079 = vmatprep.mubr.bf16.mxu1 %v4488_v31  ;;  %3613 = vmatpush3.bf16.msra.mxu1 %v3873_v17  ;;  %v903_v17 = vrot.slane %v901_v7, 7 }
  0xb4   : > { %3614 = vmatprep.subr.bf16.mxu1 %v3875_v30 }
  0xb5   : > { %1685 = vmatmul.mubr.bf16.gmra.mrb[28].mxu0 %v4621_v36  ;;  %v908_v34 = vrot.slane %v903_v17, 4 }
  0xb6   : > { %2514 = vmatprep.mubr.bf16.mxu0 %v4396_v27  ;;  %v4644_v27 = vld [vmem:[%s4832_s3 + $0x210] sm:$0xff]  }
  0xb7   : > { %3615 = vmatpush3.bf16.msra.mxu1 %v3875_v30  ;;  %v2970_v30 = vrot.slane %v896_v16, 11 }
  0xb8   : > { %3616 = vmatprep.subr.bf16.mxu1 %v3877_v35 }
  0xba   : > { %2080 = vmatmul.mubr.bf16.gmra.mrb[28].mxu1 %v4548_v29 }
  0xbb   : > { %2087 = vmatprep.mubr.bf16.mxu1 %v4534_v11  ;;  %3617 = vmatpush3.bf16.msra.mxu1 %v3877_v35 }
  0xbc   : > { %3618 = vmatprep.subr.bf16.mxu1 %v3880_v39 }
  0xbd   : > { %2515 = vmatmul.mubr.bf16.vlgmr.msra.gmra.mrb[32].mxu0 %v4453_v33  ;;  %v688_v33 = vld [vmem:[%s4290_s26 + $0xa4] sm:$0x8] }
  0xbe   : > { %3637 = vmatpush3.bf16.msra.mxu0 %v4602_v21  ;;  %2522 = vmatprep.mubr.bf16.mxu0 %v4440_v24  ;;  %v4655_v24 = vld [vmem:[%s4832_s3 + $0x218] sm:$0xff]   ;;  %v874_v49 = vshrl.u32 %v688_v33, 16 }
  0xbf   : > { %3619 = vmatpush3.bf16.msra.mxu1 %v3880_v39  ;;  %3638 = vmatprep.subr.bf16.mxu0 %v4633_v42 }
  0xc0   : > { %3668 = vmatprep.subr.bf16.mxu1 %v4602_v21  ;;  %v2969_v37 = vrot.slane %v874_v49, 11 }
  0xc2   : > { %2088 = vmatmul.mubr.bf16.gmra.mrb[32].mxu1 %v4571_v57  ;;  %3639 = vmatpush3.bf16.msra.mxu0 %v4633_v42  ;;  %v885_v62 = vsel %vm4319_vm8, %v2969_v37, %v884_v58  ;;  %v1086_v58 = vld [vmem:[%s4290_s26 + $0xc4] sm:$0x1] }
  0xc3   : > { %2095 = vmatprep.mubr.bf16.mxu1 %v4566_v54  ;;  %3640 = vmatprep.subr.bf16.mxu0 %v4644_v27 }
  0xc5   : > { %2523 = vmatmul.mubr.bf16.gmra.mrb[36].mxu0 %v4506_v46  ;;  %v3879_v46 = vld [vmem:[%s4290_s26 + $0xa8] sm:$0xff]  }
  0xc6   : > { %2530 = vmatprep.mubr.bf16.mxu0 %v4488_v31  ;;  %3641 = vmatpush3.bf16.msra.mxu0 %v4644_v27  ;;  %v886_v31 = vrot.slane %v881_v50, 4 }
  0xc7   : > { %3642 = vmatprep.subr.bf16.mxu0 %v4655_v24 }
  0xc8   : > { %v894_v0 = vsel %vm4319_vm8, %v886_v31, %v893_v59 }
  0xc9   : > { %v2979_v2 = vcombine.low %v885_v62, %v894_v0  ;;  %v1326_v62 = vshll.u32 %v1086_v58, 16 }
  0xca   : > { %2096 = vmatmul.mubr.bf16.gmra.mrb[36].mxu1 %v4604_v20  ;;  %3643 = vmatpush3.bf16.msra.mxu0 %v4655_v24 }
  0xcb   : > { %2103 = vmatprep.mubr.bf16.mxu1 %v4597_v18  ;;  %3644 = vmatprep.subr.bf16.mxu0 %v4666_v55 }
  0xcd   : > { %2531 = vmatmul.mubr.bf16.gmra.mrb[40].mxu0 %v4548_v29  ;;  %v4688_v29 = vld [vmem:[%s4832_s3 + $0x230] sm:$0xff]  }
  0xce   : > { %2538 = vmatprep.mubr.bf16.mxu0 %v4534_v11  ;;  %3645 = vmatpush3.bf16.msra.mxu0 %v4666_v55  ;;  %v4695_v11 = vld [vmem:[%s4832_s3 + $0x238] sm:$0xff]  }
  0xcf   : > { %3646 = vmatprep.subr.bf16.mxu0 %v4674_v60 }
  0xd2   : > { %2104 = vmatmul.mubr.bf16.gmra.mrb[40].mxu1 %v4621_v36  ;;  %3647 = vmatpush3.bf16.msra.mxu0 %v4674_v60 }
  0xd3   : > { %2111 = vmatprep.mubr.bf16.mxu1 %v3879_v46  ;;  %3648 = vmatprep.subr.bf16.mxu0 %v4688_v29 }
  0xd5   : > { %2539 = vmatmul.mubr.bf16.gmra.mrb[44].mxu0 %v4571_v57  ;;  %v1286_v57 = vshll.u32 %v1081_v3, 16 }
  0xd6   : > { %2546 = vmatprep.mubr.bf16.mxu0 %v4566_v54  ;;  %3649 = vmatpush3.bf16.msra.mxu0 %v4688_v29  ;;  %v1283_v54 = vshrl.u32 %v1081_v3, 16 }
  0xd7   : > { %3650 = vmatprep.subr.bf16.mxu0 %v4695_v11  ;;  %v1288_v10 = vrot.slane %v1286_v57, 5 }
  0xd8   : > { %v1285_v9 = vrot.slane %v1283_v54, 4 }
  0xda   : > { %2112 = vmatmul.mubr.bf16.gmra.mrb[44].mxu1 %v2979_v2  ;;  %3651 = vmatpush3.bf16.msra.mxu0 %v4695_v11  ;;  %v1289_v22 = vor.u32 %v1288_v10, %v1285_v9 }
  0xdb   : > { %3620 = vmatprep.mubr.bf16.mxu1 %v4352_v45  ;;  %v1292_v45 = vshll.u32 %v1082_v40, 16 }
  0xdd   : > { %2547 = vmatmul.mubr.bf16.gmra.mrb[48].mxu0 %v4604_v20  ;;  %v1294_v13 = vrot.slane %v1292_v45, 5  ;;  %v913_v20 = vshll.u32 %v693_v5, 16 }
  0xde   : > { %2554 = vmatprep.mubr.bf16.mxu0 %v4597_v18  ;;  %v904_v18 = vshll.u32 %v692_v4, 16 }
  0xdf   : > { %v1299_v23 = vor.u32 %v1298_v14, %v1294_v13 }
  0xe0   : > { %v906_v32 = vor.u32 %v904_v18, %v903_v17 }
  0xe1   : > { %v1300_v39 = vrot.slane %v1299_v23, 4 }
  0xe2   : > { %3621 = vmatmul.mubr.bf16.vlgmr.msra.gmra.mrb[0].mxu1 %v4376_v12  ;;  %v907_v44 = vsel %vm4319_vm8, %v2970_v30, %v906_v32 }
  0xe3   : > { %3676 = vmatpush3.bf16.msra.mxu1 %v4602_v21  ;;  %3624 = vmatprep.mubr.bf16.mxu1 %v4418_v56  ;;  %v912_v21 = vrot.slane %v910_v8, 7 }
  0xe4   : > { %3669 = vmatprep.subr.bf16.mxu1 %v4633_v42 }
  0xe5   : > { %2555 = vmatmul.mubr.bf16.gmra.mrb[52].mxu0 %v4621_v36  ;;  %v915_v35 = vor.u32 %v913_v20, %v912_v21  ;;  %v1290_v36 = vrot.slane %v1289_v22, 4 }
  0xe6   : > { %2562 = vmatprep.mubr.bf16.mxu0 %v3879_v46  ;;  %v1312_v46 = vrot.slane %v1310_v48, 5 }
  0xe7   : > { %3677 = vmatpush3.bf16.msra.mxu1 %v4633_v42  ;;  %v1304_v42 = vrot.slane %v1302_v26, 5  ;;  %v916_v33 = vsel %vm4319_vm8, %v908_v34, %v915_v35 }
  0xe8   : > { %3670 = vmatprep.subr.bf16.mxu1 %v4644_v27  ;;  %v2980_v53 = vcombine.low %v907_v44, %v916_v33  ;;  %v1313_v31 = vor.u32 %v1312_v46, %v1309_v19 }
  0xe9   : > { %v1305_v49 = vsel %vm4311_vm7, %v1300_v39, %v1304_v42 }
  0xea   : > { %3625 = vmatmul.mubr.bf16.gmra.mrb[4].mxu1 %v4442_v25 }
  0xeb   : > { %3678 = vmatpush3.bf16.msra.mxu1 %v4644_v27  ;;  %3628 = vmatprep.mubr.bf16.mxu1 %v4471_v61  ;;  %v1085_v27 = vld [vmem:[%s4290_s26 + $0xc0] sm:$0xf] }
  0xec   : > { %3671 = vmatprep.subr.bf16.mxu1 %v4655_v24  ;;  %v1316_v50 = vshll.u32 %v1085_v27, 16  ;;  %v1320_v52 = vshrl.u32 %v1085_v27, 16 }
  0xed   : > { %2563 = vmatmul.mubr.bf16.gmra.mrb[56].mxu0 %v2979_v2  ;;  %v1328_v2 = vrot.slane %v1326_v62, 5 }
  0xee   : > { %2570 = vmatprep.mubr.bf16.mxu0 %v3885_v28  ;;  %v1318_v37 = vrot.slane %v1316_v50, 5 }
  0xef   : > { %3679 = vmatpush3.bf16.msra.mxu1 %v4655_v24  ;;  %v1295_v24 = vsel %vm4311_vm7, %v1290_v36, %v1294_v13 }
  0xf0   : > { %3672 = vmatprep.subr.bf16.mxu1 %v4666_v55  ;;  %v2999_v63 = vcombine.low %v1295_v24, %v1305_v49 }
  0xf2   : > { %3629 = vmatmul.mubr.bf16.gmra.mrb[8].mxu1 %v4497_v38 }
  0xf3   : > { %3680 = vmatpush3.bf16.msra.mxu1 %v4666_v55  ;;  %3632 = vmatprep.mubr.bf16.mxu1 %v4522_v1  ;;  %v1322_v55 = vrot.slane %v1320_v52, 4 }
  0xf4   : > { %3673 = vmatprep.subr.bf16.mxu1 %v4674_v60 }
  0xf5   : > { %2571 = vmatmul.mubr.bf16.gmra.mrb[60].mxu0 %v2980_v53  ;;  %v1323_v59 = vor.u32 %v1322_v55, %v1318_v37 }
  0xf6   : > { %3652 = vmatprep.mubr.bf16.mxu0 %v4376_v12 }
  0xf7   : > { %3681 = vmatpush3.bf16.msra.mxu1 %v4674_v60  ;;  %v1314_v60 = vrot.slane %v1313_v31, 4  ;;  %v1324_v0 = vrot.slane %v1323_v59, 4 }
  0xf8   : > { %3674 = vmatprep.subr.bf16.mxu1 %v4688_v29 }
  0xf9   : > { %v1319_v12 = vsel %vm4311_vm7, %v1314_v60, %v1318_v37 }
  0xfa   : > { %3633 = vmatmul.mubr.bf16.gmra.mrb[12].mxu1 %v2999_v63 }
  0xfb   : > { %3682 = vmatpush3.bf16.msra.mxu1 %v4688_v29  ;;  %3660 = vmatprep.mubr.bf16.mxu1 %v4497_v38  ;;  %v1329_v38 = vsel %vm4311_vm7, %v1324_v0, %v1328_v2 }
  0xfc   : > { %3675 = vmatprep.subr.bf16.mxu1 %v4695_v11  ;;  %v3000_v29 = vcombine.low %v1319_v12, %v1329_v38 }
  0xfd   : > { %3653 = vmatmul.mubr.bf16.vlgmr.msra.gmra.mrb[64].mxu0 %v4418_v56 }
  0xfe   : > { %3656 = vmatprep.mubr.bf16.mxu0 %v4442_v25 }
  0xff   : > { %3683 = vmatpush3.bf16.msra.mxu1 %v4695_v11 }
 0x102   : > { %3661 = vmatmul.mubr.bf16.vlgmr.msra.gmra.mrb[8].mxu1 %v4522_v1 }
 0x103   : > { %3664 = vmatprep.mubr.bf16.mxu1 %v2999_v63 }
 0x105   : > { %3657 = vmatmul.mubr.bf16.gmra.mrb[68].mxu0 %v4471_v61 }
 0x10a   : > { %3665 = vmatmul.mubr.bf16.gmra.mrb[12].mxu1 %v3000_v29 }
 0x14c   : > { %v3348_v11 = vpop.f32.mrb[0].mxu0 }
 0x14d   : > { %v3349_v3 = vpop.f32.mrb[1].mxu0 }
 0x14e   : > { %v3350_v40 = vadd.f32 %v3349_v3, %v3348_v11  ;;  %v3351_v54 = vpop.f32.mrb[2].mxu0 }
 0x14f   : > { %v3352_v56 = vpop.f32.mrb[3].mxu0 }
 0x150   : > { %v3353_v57 = vadd.f32 %v3352_v56, %v3351_v54 }
 0x154   : > { %v3354_v1 = vpop.f32.mrb[4].mxu0 }
 0x155   : > { %v3355_v45 = vpop.f32.mrb[5].mxu0 }
 0x156   : > { %v3356_v25 = vadd.f32 %v3355_v45, %v3354_v1  ;;  %v3357_v41 = vpop.f32.mrb[6].mxu0 }
 0x157   : > { %v3358_v4 = vpop.f32.mrb[7].mxu0 }
 0x158   : > { %v3359_v5 = vadd.f32 %v3358_v4, %v3357_v41 }
 0x15d   : > { %v3360_v6 = vpop.f32.mrb[8].mxu0 }
 0x15e   : > { %v3361_v7 = vpop.f32.mrb[9].mxu0 }
 0x15f   : > { %v3362_v51 = vadd.f32 %v3361_v7, %v3360_v6  ;;  %v3363_v8 = vpop.f32.mrb[10].mxu0 }
 0x160   : > { %v3364_v9 = vpop.f32.mrb[11].mxu0 }
 0x161   : > { %v3365_v10 = vadd.f32 %v3364_v9, %v3363_v8 }
 0x168   : > { %v3366_v61 = vpop.f32.mrb[12].mxu0 }
 0x169   : > { %v3367_v13 = vpop.f32.mrb[13].mxu0 }
 0x16a   : > { %v3368_v14 = vadd.f32 %v3367_v13, %v3366_v61  ;;  %v3369_v15 = vpop.f32.mrb[14].mxu0 }
 0x16b   : > { %v3370_v16 = vpop.f32.mrb[15].mxu0 }
 0x16c   : > { %v3371_v17 = vadd.f32 %v3370_v16, %v3369_v15 }
 0x170   : > { %v3372_v18 = vpop.f32.mrb[16].mxu0 }
 0x171   : > { %v3373_v20 = vpop.f32.mrb[17].mxu0 }
 0x172   : > { %v4755_v22 = vadd.f32 %v3373_v20, %v3372_v18  ;;  %v3375_v26 = vpop.f32.mrb[18].mxu0 }
 0x173   : > { %v3376_v32 = vpop.f32.mrb[19].mxu0 }
 0x174   : > { %v3377_v34 = vadd.f32 %v3376_v32, %v3375_v26 }
 0x175   : > { %v3428_v21 = vpop.f32.mrb[16].mxu1 }
 0x176   : > { %v3429_v23 = vpop.f32.mrb[17].mxu1 }
 0x177   : > { %v3430_v28 = vadd.f32 %v3429_v23, %v3428_v21  ;;  %v3431_v30 = vpop.f32.mrb[18].mxu1 }
 0x178   : > { %v3432_v35 = vpop.f32.mrb[19].mxu1  ;;  %v3378_v43 = vpop.f32.mrb[20].mxu0 }
 0x179   : > { %v3433_v36 = vadd.f32 %v3432_v35, %v3431_v30  ;;  %v4757_v39 = vadd.f32 %v3430_v28, %v3350_v40  ;;  %v3379_v44 = vpop.f32.mrb[21].mxu0 }
 0x17a   : > { %v4761_v33 = vadd.f32 %v3379_v44, %v3378_v43  ;;  %v3381_v48 = vpop.f32.mrb[22].mxu0 }
 0x17b   : > { %v4759_v42 = vadd.f32 %v3433_v36, %v3353_v57  ;;  %v3382_v50 = vpop.f32.mrb[23].mxu0 }
 0x17c   : > { %v3383_v52 = vadd.f32 %v3382_v50, %v3381_v48 }
 0x17d   : > { %v3434_v27 = vpop.f32.mrb[20].mxu1 }
 0x17e   : > { %v3435_v47 = vpop.f32.mrb[21].mxu1 }
 0x17f   : > { %v3436_v24 = vadd.f32 %v3435_v47, %v3434_v27  ;;  %v3437_v49 = vpop.f32.mrb[22].mxu1 }
 0x180   : > { %v3438_v53 = vpop.f32.mrb[23].mxu1  ;;  %v3384_v37 = vpop.f32.mrb[24].mxu0 }
 0x181   : > { %v3439_v63 = vadd.f32 %v3438_v53, %v3437_v49  ;;  %v4763_v19 = vadd.f32 %v3436_v24, %v3356_v25  ;;  %v3385_v58 = vpop.f32.mrb[25].mxu0 }
 0x182   : > { %v4767_v31 = vadd.f32 %v3385_v58, %v3384_v37  ;;  %v3387_v62 = vpop.f32.mrb[26].mxu0 }
 0x183   : > { %v4765_v46 = vadd.f32 %v3439_v63, %v3359_v5  ;;  %v3388_v2 = vpop.f32.mrb[27].mxu0 }
 0x184   : > { %v3389_v12 = vadd.f32 %v3388_v2, %v3387_v62 }
 0x185   : > { %v3440_v55 = vpop.f32.mrb[24].mxu1 }
 0x186   : > { %v3441_v59 = vpop.f32.mrb[25].mxu1 }
 0x187   : > { %v3442_v60 = vadd.f32 %v3441_v59, %v3440_v55  ;;  %v3443_v0 = vpop.f32.mrb[26].mxu1 }
 0x188   : > { %v3444_v38 = vpop.f32.mrb[27].mxu1  ;;  %v3390_v40 = vpop.f32.mrb[28].mxu0 }
 0x189   : > { %v3445_v29 = vadd.f32 %v3444_v38, %v3443_v0  ;;  %v4769_v11 = vadd.f32 %v3442_v60, %v3362_v51  ;;  %v3391_v56 = vpop.f32.mrb[29].mxu0 }
 0x18a   : > { %v4773_v57 = vadd.f32 %v3391_v56, %v3390_v40  ;;  %v3393_v45 = vpop.f32.mrb[30].mxu0 }
 0x18b   : > { %v4771_v3 = vadd.f32 %v3445_v29, %v3365_v10  ;;  %v3394_v4 = vpop.f32.mrb[31].mxu0 }
 0x18c   : > { %v3395_v5 = vadd.f32 %v3394_v4, %v3393_v45 }
 0x18d   : > { %v3446_v54 = vpop.f32.mrb[28].mxu1 }
 0x18e   : > { %v3447_v1 = vpop.f32.mrb[29].mxu1 }
 0x18f   : > { %v3448_v25 = vadd.f32 %v3447_v1, %v3446_v54  ;;  %v3449_v41 = vpop.f32.mrb[30].mxu1 }
 0x190   : > { %v3450_v6 = vpop.f32.mrb[31].mxu1  ;;  %v3508_v51 = vpop.f32.mrb[32].mxu0 }
 0x191   : > { %v3451_v7 = vadd.f32 %v3450_v6, %v3449_v41  ;;  %v4775_v8 = vadd.f32 %v3448_v25, %v3368_v14  ;;  %v3509_v61 = vpop.f32.mrb[33].mxu0 }
 0x192   : > { %v4779_v15 = vadd.f32 %v3509_v61, %v3508_v51  ;;  %v3511_v16 = vpop.f32.mrb[34].mxu0 }
 0x193   : > { %v4777_v9 = vadd.f32 %v3451_v7, %v3371_v17  ;;  %v3512_v20 = vpop.f32.mrb[35].mxu0 }
 0x194   : > { %v4781_v26 = vadd.f32 %v3512_v20, %v3511_v16 }
 0x195   : > { %v3452_v10 = vpop.f32.mrb[32].mxu1 }
 0x196   : > { %v3453_v13 = vpop.f32.mrb[33].mxu1 }
 0x197   : > { %v3454_v18 = vadd.f32 %v3453_v13, %v3452_v10  ;;  %v3455_v21 = vpop.f32.mrb[34].mxu1 }
 0x198   : > { %v3456_v23 = vpop.f32.mrb[35].mxu1  ;;  %v3514_v32 = vpop.f32.mrb[36].mxu0 }
 0x199   : > { %v3719_v28 = vadd.f32 %v3454_v18, %v4755_v22  ;;  %v3457_v30 = vadd.f32 %v3456_v23, %v3455_v21  ;;  %v3515_v35 = vpop.f32.mrb[37].mxu0 }
 0x19a   : > { %v3516_v43 = vadd.f32 %v3515_v35, %v3514_v32  ;;  %v3517_v27 = vpop.f32.mrb[38].mxu0 }
 0x19b   : > { %v3725_v14 = vadd.f32 %v3457_v30, %v3377_v34  ;;  %v3518_v48 = vpop.f32.mrb[39].mxu0 }
 0x19c   : > { %v3519_v49 = vadd.f32 %v3518_v48, %v3517_v27 }
 0x19d   : > { %v3458_v17 = vpop.f32.mrb[36].mxu1 }
 0x19e   : > { %v3459_v36 = vpop.f32.mrb[37].mxu1 }
 0x19f   : > { %v3460_v44 = vadd.f32 %v3459_v36, %v3458_v17  ;;  %v3461_v47 = vpop.f32.mrb[38].mxu1 }
 0x1a0   : > { %v3462_v24 = vpop.f32.mrb[39].mxu1  ;;  %v3520_v22 = vpop.f32.mrb[40].mxu0 }
 0x1a1   : > { %v4785_v50 = vadd.f32 %v3460_v44, %v4761_v33  ;;  %v3463_v53 = vadd.f32 %v3462_v24, %v3461_v47  ;;  %v3521_v34 = vpop.f32.mrb[41].mxu0 }
 0x1a2   : > { %v3522_v58 = vadd.f32 %v3521_v34, %v3520_v22  ;;  %v3523_v59 = vpop.f32.mrb[42].mxu0 }
 0x1a3   : > { %v4787_v63 = vadd.f32 %v3463_v53, %v3383_v52  ;;  %v3524_v0 = vpop.f32.mrb[43].mxu0 }
 0x1a4   : > { %v3525_v38 = vadd.f32 %v3524_v0, %v3523_v59 }
 0x1a5   : > { %v3464_v37 = vpop.f32.mrb[40].mxu1 }
 0x1a6   : > { %v3465_v55 = vpop.f32.mrb[41].mxu1 }
 0x1a7   : > { %v3466_v62 = vadd.f32 %v3465_v55, %v3464_v37  ;;  %v3467_v60 = vpop.f32.mrb[42].mxu1 }
 0x1a8   : > { %v3468_v2 = vpop.f32.mrb[43].mxu1  ;;  %v3526_v54 = vpop.f32.mrb[44].mxu0 }
 0x1a9   : > { %v4790_v29 = vadd.f32 %v3466_v62, %v4767_v31  ;;  %v3469_v40 = vadd.f32 %v3468_v2, %v3467_v60  ;;  %v3527_v52 = vpop.f32.mrb[45].mxu0 }
 0x1aa   : > { %v3528_v45 = vadd.f32 %v3527_v52, %v3526_v54  ;;  %v3529_v25 = vpop.f32.mrb[46].mxu0 }
 0x1ab   : > { %v3737_v33 = vadd.f32 %v3469_v40, %v3389_v12  ;;  %v3530_v6 = vpop.f32.mrb[47].mxu0 }
 0x1ac   : > { %v3531_v51 = vadd.f32 %v3530_v6, %v3529_v25 }
 0x1ad   : > { %v3470_v56 = vpop.f32.mrb[44].mxu1 }
 0x1ae   : > { %v3471_v1 = vpop.f32.mrb[45].mxu1 }
 0x1af   : > { %v3472_v41 = vadd.f32 %v3471_v1, %v3470_v56  ;;  %v3473_v4 = vpop.f32.mrb[46].mxu1 }
 0x1b0   : > { %v3474_v7 = vpop.f32.mrb[47].mxu1  ;;  %v3532_v16 = vpop.f32.mrb[48].mxu0 }
 0x1b1   : > { %v3728_v10 = vadd.f32 %v3472_v41, %v4773_v57  ;;  %v3475_v61 = vadd.f32 %v3474_v7, %v3473_v4  ;;  %v3533_v18 = vpop.f32.mrb[49].mxu0 }
 0x1b2   : > { %v3534_v20 = vadd.f32 %v3533_v18, %v3532_v16  ;;  %v3535_v23 = vpop.f32.mrb[50].mxu0 }
 0x1b3   : > { %v3734_v13 = vadd.f32 %v3475_v61, %v3395_v5  ;;  %v3536_v17 = vpop.f32.mrb[51].mxu0 }
 0x1b4   : > { %v3537_v27 = vadd.f32 %v3536_v17, %v3535_v23  ;;  %v3720_v57 = vadd.f32 %v3719_v28, %v3534_v20 }
 0x1b5   : > { %v3622_v31 = vpop.f32.mrb[0].mxu1 }
 0x1b6   : > { %v3685_v12 = vadd.f32 %v4763_v19, %v3622_v31  ;;  %v2154_v21 = vpop.f32.mrb[1].mxu1  ;;  %v3726_v24 = vadd.f32 %v3725_v14, %v3537_v27 }
 0x1b7   : > { %v3689_v30 = vadd.f32 %v4757_v39, %v2154_v21  ;;  %v3623_v32 = vpop.f32.mrb[2].mxu1 }
 0x1b8   : > { %v3693_v35 = vadd.f32 %v4765_v46, %v3623_v32  ;;  %v2157_v36 = vpop.f32.mrb[3].mxu1  ;;  %v3686_v44 = vadd.f32 %v3685_v12, %v3516_v43  ;;  %v3538_v53 = vpop.f32.mrb[52].mxu0 }
 0x1b9   : > { %v3697_v5 = vadd.f32 %v4759_v42, %v2157_v36  ;;  %v3690_v47 = vadd.f32 %v3689_v30, %v4779_v15  ;;  %v3539_v37 = vpop.f32.mrb[53].mxu0 }
 0x1ba   : > { %v3694_v48 = vadd.f32 %v3693_v35, %v3519_v49  ;;  %v3540_v55 = vadd.f32 %v3539_v37, %v3538_v53  ;;  %v3541_v46 = vpop.f32.mrb[54].mxu0 }
 0x1bb   : > { %v3698_v19 = vadd.f32 %v3697_v5, %v4781_v26  ;;  %v3542_v28 = vpop.f32.mrb[55].mxu0 }
 0x1bc   : > { %v3543_v15 = vadd.f32 %v3542_v28, %v3541_v46  ;;  %v3717_v14 = vadd.f32 %v4785_v50, %v3540_v55 }
 0x1bd   : > { %v3626_v22 = vpop.f32.mrb[4].mxu1 }
 0x1be   : > { %v3701_v39 = vadd.f32 %v4775_v8, %v3626_v22  ;;  %v2170_v34 = vpop.f32.mrb[5].mxu1  ;;  %v3723_v0 = vadd.f32 %v4787_v63, %v3543_v15 }
 0x1bf   : > { %v3705_v59 = vadd.f32 %v4769_v11, %v2170_v34  ;;  %v3627_v43 = vpop.f32.mrb[6].mxu1 }
 0x1c0   : > { %v3709_v42 = vadd.f32 %v4777_v9, %v3627_v43  ;;  %v2173_v62 = vpop.f32.mrb[7].mxu1  ;;  %v3702_v49 = vadd.f32 %v3701_v39, %v3528_v45  ;;  %v3544_v40 = vpop.f32.mrb[56].mxu0 }
 0x1c1   : > { %v3713_v26 = vadd.f32 %v4771_v3, %v2173_v62  ;;  %v3706_v60 = vadd.f32 %v3705_v59, %v3522_v58  ;;  %v3545_v54 = vpop.f32.mrb[57].mxu0 }
 0x1c2   : > { %v3710_v8 = vadd.f32 %v3709_v42, %v3531_v51  ;;  %v3546_v56 = vadd.f32 %v3545_v54, %v3544_v40  ;;  %v3547_v11 = vpop.f32.mrb[58].mxu0 }
 0x1c3   : > { %v3714_v2 = vadd.f32 %v3713_v26, %v3525_v38  ;;  %v3548_v52 = vpop.f32.mrb[59].mxu0 }
 0x1c4   : > { %v3549_v1 = vadd.f32 %v3548_v52, %v3547_v11  ;;  %v3732_v9 = vadd.f32 %v4790_v29, %v3546_v56 }
 0x1c6   : > { %v3738_v25 = vadd.f32 %v3737_v33, %v3549_v1 }
 0x1c8   : > { %v3550_v41 = vpop.f32.mrb[60].mxu0 }
 0x1c9   : > { %v3551_v4 = vpop.f32.mrb[61].mxu0 }
 0x1ca   : > { %v3552_v50 = vadd.f32 %v3551_v4, %v3550_v41  ;;  %v3553_v45 = vpop.f32.mrb[62].mxu0 }
 0x1cb   : > { %v3554_v6 = vpop.f32.mrb[63].mxu0 }
 0x1cc   : > { %v3555_v3 = vadd.f32 %v3554_v6, %v3553_v45  ;;  %v3729_v58 = vadd.f32 %v3728_v10, %v3552_v50 }
 0x1ce   : > { %v3735_v7 = vadd.f32 %v3734_v13, %v3555_v3 }
 0x1d0   : > { %v3654_v63 = vpop.f32.mrb[64].mxu0 }
 0x1d1   : > { %v3687_v51 = vadd.f32 %v3686_v44, %v3654_v63  ;;  %v2613_v61 = vpop.f32.mrb[65].mxu0 }
 0x1d2   : > { %v3691_v31 = vadd.f32 %v3690_v47, %v2613_v61  ;;  %v3655_v29 = vpop.f32.mrb[66].mxu0 }
 0x1d3   : > { %v3695_v12 = vadd.f32 %v3694_v48, %v3655_v29  ;;  %v2616_v20 = vpop.f32.mrb[67].mxu0 }
 0x1d4   : > { %v3699_v30 = vadd.f32 %v3698_v19, %v2616_v20 }
 0x1d5   : > { %v3662_v38 = vpop.f32.mrb[8].mxu1  ;;  %v3285_v13 = vpack.c.bf16 %v3695_v12, %v3687_v51 }
 0x1d6   : > { %v3718_v16 = vadd.f32 %v3717_v14, %v3662_v38  ;;  %v2645_v18 = vpop.f32.mrb[9].mxu1  ;;  %v3280_v35 = vpack.c.bf16 %v3699_v30, %v3691_v31 }
 0x1d7   : > { %v3721_v33 = vadd.f32 %v3720_v57, %v2645_v18  ;;  %v3663_v21 = vpop.f32.mrb[10].mxu1  ;;  %3325 = vst [vmem:[%s3994_s7 + $0x8] sm:$0xff] %v3285_v13  }
 0x1d8   : > { %v3724_v23 = vadd.f32 %v3723_v0, %v3663_v21  ;;  %v2648_v10 = vpop.f32.mrb[11].mxu1  ;;  %3281 = vst [vmem:[%s3994_s7] sm:$0xff] %v3280_v35   ;;  %v3658_v27 = vpop.f32.mrb[68].mxu0 }
 0x1d9   : > { %v3727_v32 = vadd.f32 %v3726_v24, %v2648_v10  ;;  %v3703_v44 = vadd.f32 %v3702_v49, %v3658_v27  ;;  %v2629_v57 = vpop.f32.mrb[69].mxu0 }
 0x1da   : > { %v3305_v17 = vpack.c.bf16 %v3724_v23, %v3718_v16  ;;  %v3707_v48 = vadd.f32 %v3706_v60, %v2629_v57  ;;  %v3659_v19 = vpop.f32.mrb[70].mxu0 }
 0x1db   : > { %v3300_v36 = vpack.c.bf16 %v3727_v32, %v3721_v33  ;;  %v3711_v22 = vadd.f32 %v3710_v8, %v3659_v19  ;;  %v2632_v39 = vpop.f32.mrb[71].mxu0 }
 0x1dc   : > { %3329 = vst [vmem:[%s3994_s7 + $0x28] sm:$0xff] %v3305_v17   ;;  %v3715_v55 = vadd.f32 %v3714_v2, %v2632_v39 }
 0x1dd   : > { %3328 = vst [vmem:[%s3994_s7 + $0x20] sm:$0xff] %v3300_v36   ;;  %v3666_v5 = vpop.f32.mrb[12].mxu1  ;;  %v3295_v59 = vpack.c.bf16 %v3711_v22, %v3703_v44 }
 0x1de   : > { %v3730_v47 = vadd.f32 %v3729_v58, %v3666_v5  ;;  %v2661_v53 = vpop.f32.mrb[13].mxu1  ;;  %v3290_v42 = vpack.c.bf16 %v3715_v55, %v3707_v48 }
 0x1df   : > { %v3733_v24 = vadd.f32 %v3732_v9, %v2661_v53  ;;  %v3667_v37 = vpop.f32.mrb[14].mxu1  ;;  %3327 = vst [vmem:[%s3994_s7 + $0x18] sm:$0xff] %v3295_v59  }
 0x1e0   : > { %v3736_v34 = vadd.f32 %v3735_v7, %v3667_v37  ;;  %v2664_v46 = vpop.f32.mrb[15].mxu1  ;;  %3326 = vst [vmem:[%s3994_s7 + $0x10] sm:$0xff] %v3290_v42  }
 0x1e1   : > { %v3739_v43 = vadd.f32 %v3738_v25, %v2664_v46 }
 0x1e2   : > { %v3315_v28 = vpack.c.bf16 %v3736_v34, %v3730_v47 }
 0x1e3   : > { %v3310_v62 = vpack.c.bf16 %v3739_v43, %v3733_v24 }
 0x1e4   : > { %3331 = vst [vmem:[%s3994_s7 + $0x38] sm:$0xff] %v3315_v28  }
 0x1e5   : > { %3330 = vst [vmem:[%s3994_s7 + $0x30] sm:$0xff] %v3310_v62  }
 0x1e6 PF: > { %s14_s19 = sadd.s32 1, %s3925_s19   ;;  %s4840_s15 = smov %s3917_s17 }
 0x1e7   : > { %p11_p8 = scmp.ge.s32.totalorder %s14_s19, 6   ;;  %s4841_s16 = smov %s3921_s18 }
 0x1e8   : > { %s4842_s17 = smov %s4845_s20  ;;  %s4843_s18 = smov %s4849_s21 }
 0x1e9   :  { %13 = sbr.rel (!%p11_p8) target bundleno = 3 (0x3), region = 74 }

// kernel: basic_block_forward.7
= control target key start
LH: loop header
LB: loop body
LE: loop exit
PB: predicated region body
PF: predicated region fallthrough
CT: control target
= control target key end

     0   :  { %10 = vsyncpa [#allocation6], 0  ;;  %s5141_s0 = inlined_call_operand.vmem [shape: bf16[2,16,16,128], index: 0, kind: input, shape index: {}]   ;;  %s5142_s1 = inlined_call_operand.vmem [shape: f32[1,128], index: 1, kind: input, shape index: {}]   ;;  %s5143_s2 = inlined_call_operand.vmem [shape: f32[1,128], index: 2, kind: input, shape index: {}]   ;;  %s5144_s3 = inlined_call_operand.vmem [shape: bf16[3,384,128], index: 3, kind: input, shape index: {}]   ;;  %s5145_s4 = inlined_call_operand.vmem [shape: f32[2,16,16,128], index: 4, kind: input, shape index: {}]   ;;  %s5146_s5 = inlined_call_operand.hbm [shape: f32[2,16,16,128], index: 5, kind: output, shape index: {}]  }
   0x1   :  { %12 = vsyncpa [#allocation6 + $0x1], 0  ;;  %s4135_s18 = smov 0   ;;  %s4137_s19 = smov 0  }
   0x2   :  { %s4139_s20 = smov 0   ;;  %s4141_s21 = smov 0  }
   0x3   :  { %s4143_s22 = smov 0   ;;  %s4145_s23 = smov 0  }
   0x4   :  { %s4147_s24 = smov 0   ;;  %s4149_s25 = smov 0  }
   0x5 LB: > { %5151 = sst [smem:[#allocation8_spill]] %s4095_s24  ;;  %s2990_s26 = sadd.s32 4294967295, %s4099_s25   ;;  %s4099_s25 = sphi %s4149_s25, %s18_s25   ;;  %s4095_s24 = sphi %s4147_s24, %s5165_s24   ;;  %s4091_s23 = sphi %s4145_s23, %s5170_s23   ;;  %s4087_s22 = sphi %s4143_s22, %s5163_s22   ;;  %s4083_s21 = sphi %s4141_s21, %s5169_s21   ;;  %s4079_s20 = sphi %s4139_s20, %s5168_s20   ;;  %s4075_s19 = sphi %s4137_s19, %s5167_s19   ;;  %s4071_s18 = sphi %s4135_s18, %s5166_s18  }
   0x6   : > { %s2991_s27 = sadd.s32 4294967294, %s4099_s25   ;;  %s27_s28 = sadd.s32 1, %s4091_s23 }
   0x7   : > { %p28_p0 = scmp.ge.s32.totalorder %s27_s28, 2  ;;  %s30_s29 = sadd.s32 1, %s4095_s24 }
   0x8   : > { %p166_p1 = scmp.ne.s32.totalorder %s4079_s20, %s4075_s19  ;;  %p167_p2 = scmp.eq.s32.totalorder %s2990_s26, 3 }
   0x9   : > { %s5172_s28 = smov (%p28_p0, %s27_s28), 0  ;;  %s5174_s29 = smov (!%p28_p0, %s30_s29), %s4095_s24 }
   0xa   : > { %5152 = sst [smem:[#allocation9_spill]] %s5172_s28  ;;  %s152_s30 = ssub.s32 %s4091_s23, %s5172_s28 }
   0xb   : > { %p4186_p3 = por %p167_p2, %p166_p1  ;;  %p32_p4 = scmp.ge.s32.totalorder %s5174_s29, 2 }
   0xc   : > { %p172_p5 = scmp.ne.s32.totalorder %s4075_s19, %s4071_s18  ;;  %p173_p6 = scmp.eq.s32.totalorder %s2991_s27, 3 }
   0xd   : > { %p2994_p7 = scmp.ge.s32.totalorder %s4099_s25, 1  ;;  %s5176_s29 = smov (%p32_p4, %s5174_s29), 0 }
   0xe   : > { %5154 = sst [smem:[#allocation10_spill]] %s5176_s29  ;;  %p4195_p8 = por %p173_p6, %p172_p5 }
   0xf   : > { %p222_p9 = scmp.lt.s32.totalorder %s4099_s25, 5  ;;  %s151_s8 = ssub.s32 %s4095_s24, %s5176_s29 }
  0x10   : > { %s156_s9 = sadd.s32 1, %s4079_s20  ;;  %s153_s10 = sor.u32 %s152_s30, %s151_s8 }
  0x11   : > { %p223_p10 = pnand %p2994_p7, %p222_p9  ;;  %p154_p11 = scmp.eq.s32.totalorder %s153_s10, 0 }
  0x12   : > { %s5150_s12 = sand.u32 (!%p223_p10), 1, %s4075_s19   ;;  %p260_p12 = scmp.lt.s32.totalorder (!%p223_p10), %s4087_s22, 1 }
  0x13   : > { %s4204_s11 = scalar_select %p154_p11, %s4079_s20, %s156_s9  }
  0x14   : > { %226 = sbr.rel (%p223_p10) target bundleno = 515 (0x203), region = 40  ;;  %s2995_s13 = sshll.u32 (!%p223_p10), %s5150_s12, 7 }
  0x15   : > { %s2998_s14 = sshll.u32 (!%p223_p10), %s4083_s21, 3  ;;  %s4222_s12 = scalar_lea.vmem (!%p223_p10), [#allocation5], %s2995_s13 }
  0x16   : > { %p268_p13 = scmp.lt.s32.totalorder (!%p223_p10), %s2998_s14, 15  ;;  %p3002_p0 = scmp.ne.s32.totalorder (!%p223_p10), %s4083_s21, 0 }
  0x1b   : > { %s261_s15 = scalar_select %p260_p12, %s4087_s22, 1 }
  0x1c   : > { %s5178_s14 = smov (!%p268_p13, %s2998_s14), 15  ;;  %281 = sbr.rel (%p3002_p0) target bundleno = 102 (0x66), region = 44 }
  0x1d   : > { %s3255_s16 = sshll.u32 %s261_s15, 7  ;;  %s3000_s17 = sshll.u32 %s261_s15, 5  ;;  %vm286_vm0 = vcmask (!%p3002_p0), 1040384   ;;  %vm287_vm1 = vsmask.f32 (!%p3002_p0), 256  ;;  %v4101_v1 = vmov (!%p3002_p0), 0  }
  0x1e   : > { %s4215_s30 = scalar_lea.vmem %s5141_s0, %s3255_s16  ;;  %s2999_s8 = sshll.u32 %s5178_s14, 1  ;;  %v4225_v0 = vld [vmem:[#allocation2 + $0x10] sm:$0x1] (!%p3002_p0)  ;;  %294 = vst [vmem:[#allocation2 + $0x1c] sm:$0xf] (!%p3002_p0), %v4101_v1  ;;  %vm4301_vm2 = vmand (!%p3002_p0), %vm286_vm0, %vm287_vm1 }
  0x1f   : > { %s272_s9 = sadd.s32 %s3000_s17, %s2999_s8  ;;  %282 = vst [vmem:[#allocation2] sm:$0xf] (!%p3002_p0), %v4101_v1  ;;  %283 = vst [vmem:[#allocation2 + $0x4] sm:$0xf] (!%p3002_p0), %v4101_v1  ;;  %v296_v3 = vld [vmem:[#allocation2 + $0x24] sm:$0x1] (!%p3002_p0) }
  0x20   : > { %s3001_s10 = sshll.u32 %s272_s9, 3  ;;  %284 = vst [vmem:[#allocation2 + $0x8] sm:$0xf] (!%p3002_p0), %v4101_v1  ;;  %285 = vst [vmem:[#allocation2 + $0xc] sm:$0xf] (!%p3002_p0), %v4101_v1  ;;  %v290_v5 = vsel (!%p3002_p0), %vm4301_vm2, 0, %v4225_v0 }
  0x21   : > { %s4220_s24 = scalar_lea.vmem %s5145_s4, %s3001_s10  ;;  %292 = vst [vmem:[#allocation2 + $0x14] sm:$0xf] (!%p3002_p0), %v4101_v1  ;;  %293 = vst [vmem:[#allocation2 + $0x18] sm:$0xf] (!%p3002_p0), %v4101_v1  ;;  %v303_v4 = vld [vmem:[#allocation2 + $0x38] sm:$0x1] (!%p3002_p0) }
  0x22   : > { %295 = vst [vmem:[#allocation2 + $0x20] sm:$0xf] (!%p3002_p0), %v4101_v1  ;;  %299 = vst [vmem:[#allocation2 + $0x28] sm:$0xf] (!%p3002_p0), %v4101_v1  ;;  %v297_v6 = vsel (!%p3002_p0), %vm4301_vm2, 0, %v296_v3  ;;  %v304_v7 = vsel (!%p3002_p0), %vm4301_vm2, 0, %v303_v4 }
  0x23   : > { %300 = vst [vmem:[#allocation2 + $0x2c] sm:$0xf] %v4101_v1  ;;  %301 = vst [vmem:[#allocation2 + $0x30] sm:$0xf] %v4101_v1  ;;  %v310_v8 = vld [vmem:[#allocation2 + $0x4c] sm:$0x1] }
  0x24   : > { %302 = vst [vmem:[#allocation2 + $0x34] sm:$0xf] %v4101_v1  ;;  %306 = vst [vmem:[#allocation2 + $0x3c] sm:$0xf] %v4101_v1  ;;  %v3291_v9 = vld [vmem:[%s4215_s30] sm:$0xff]   ;;  %v311_v10 = vsel %vm4301_vm2, 0, %v310_v8 }
  0x25   : > { %307 = vst [vmem:[#allocation2 + $0x40] sm:$0xf] %v4101_v1  ;;  %308 = vst [vmem:[#allocation2 + $0x44] sm:$0xf] %v4101_v1  ;;  %v317_v11 = vld [vmem:[#allocation2 + $0x60] sm:$0x1]  ;;  %v3292_v26 = vunpack.c.l.bf16 %v3291_v9  ;;  %v3293_v27 = vunpack.c.h.bf16 %v3291_v9 }
  0x26   : > { %309 = vst [vmem:[#allocation2 + $0x48] sm:$0xf] %v4101_v1  ;;  %313 = vst [vmem:[#allocation2 + $0x50] sm:$0xf] %v4101_v1  ;;  %v324_v12 = vld [vmem:[#allocation2 + $0x74] sm:$0x1] }
  0x27   : > { %314 = vst [vmem:[#allocation2 + $0x54] sm:$0xf] %v4101_v1  ;;  %315 = vst [vmem:[#allocation2 + $0x58] sm:$0xf] %v4101_v1  ;;  %v3394_v13 = vld [vmem:[%s4215_s30 + $0x8] sm:$0xff]   ;;  %v318_v14 = vsel %vm4301_vm2, 0, %v317_v11 }
  0x28   : > { %316 = vst [vmem:[#allocation2 + $0x5c] sm:$0xf] %v4101_v1  ;;  %320 = vst [vmem:[#allocation2 + $0x64] sm:$0xf] %v4101_v1  ;;  %v325_v15 = vsel %vm4301_vm2, 0, %v324_v12  ;;  %v3296_v32 = vunpack.c.l.bf16 %v3394_v13  ;;  %v3297_v33 = vunpack.c.h.bf16 %v3394_v13  ;;  %v3395_v50 = vld [vmem:[%s4215_s30 + $0x10] sm:$0xff]  }
  0x29   : > { %321 = vst [vmem:[#allocation2 + $0x68] sm:$0xf] %v4101_v1  ;;  %322 = vst [vmem:[#allocation2 + $0x6c] sm:$0xf] %v4101_v1  ;;  %v331_v16 = vld [vmem:[#allocation2 + $0x88] sm:$0x1]  ;;  %v3300_v52 = vunpack.c.l.bf16 %v3395_v50  ;;  %v3301_v53 = vunpack.c.h.bf16 %v3395_v50 }
  0x2a   : > { %323 = vst [vmem:[#allocation2 + $0x70] sm:$0xf] %v4101_v1  ;;  %327 = vst [vmem:[#allocation2 + $0x78] sm:$0xf] %v4101_v1  ;;  %v338_v17 = vld [vmem:[#allocation2 + $0x9c] sm:$0x1] }
  0x2b   : > { %328 = vst [vmem:[#allocation2 + $0x7c] sm:$0xf] %v4101_v1  ;;  %329 = vst [vmem:[#allocation2 + $0x80] sm:$0xf] %v4101_v1  ;;  %v332_v18 = vsel %vm4301_vm2, 0, %v331_v16  ;;  %v339_v19 = vsel %vm4301_vm2, 0, %v338_v17 }
  0x2c   : > { %330 = vst [vmem:[#allocation2 + $0x84] sm:$0xf] %v4101_v1  ;;  %334 = vst [vmem:[#allocation2 + $0x8c] sm:$0xf] %v4101_v1  ;;  %v345_v20 = vld [vmem:[#allocation2 + $0xb0] sm:$0x1] }
  0x2d   : > { %335 = vst [vmem:[#allocation2 + $0x90] sm:$0xf] %v4101_v1  ;;  %336 = vst [vmem:[#allocation2 + $0x94] sm:$0xf] %v4101_v1  ;;  %v352_v21 = vld [vmem:[#allocation2 + $0xc4] sm:$0x1] }
  0x2e   : > { %337 = vst [vmem:[#allocation2 + $0x98] sm:$0xf] %v4101_v1  ;;  %341 = vst [vmem:[#allocation2 + $0xa0] sm:$0xf] %v4101_v1  ;;  %v346_v22 = vsel %vm4301_vm2, 0, %v345_v20  ;;  %v353_v23 = vsel %vm4301_vm2, 0, %v352_v21 }
  0x2f   : > { %342 = vst [vmem:[#allocation2 + $0xa4] sm:$0xf] %v4101_v1  ;;  %343 = vst [vmem:[#allocation2 + $0xa8] sm:$0xf] %v4101_v1  ;;  %v359_v24 = vld [vmem:[#allocation2 + $0xd8] sm:$0x1] }
  0x30   : > { %344 = vst [vmem:[#allocation2 + $0xac] sm:$0xf] %v4101_v1  ;;  %348 = vst [vmem:[#allocation2 + $0xb4] sm:$0xf] %v4101_v1  ;;  %v366_v25 = vld [vmem:[#allocation2 + $0xec] sm:$0x1] }
  0x31   : > { %349 = vst [vmem:[#allocation2 + $0xb8] sm:$0xf] %v4101_v1  ;;  %350 = vst [vmem:[#allocation2 + $0xbc] sm:$0xf] %v4101_v1  ;;  %v360_v28 = vsel %vm4301_vm2, 0, %v359_v24  ;;  %v367_v29 = vsel %vm4301_vm2, 0, %v366_v25 }
  0x32   : > { %351 = vst [vmem:[#allocation2 + $0xc0] sm:$0xf] %v4101_v1  ;;  %355 = vst [vmem:[#allocation2 + $0xc8] sm:$0xf] %v4101_v1  ;;  %v373_v30 = vld [vmem:[#allocation2 + $0x100] sm:$0x1] }
  0x33   : > { %356 = vst [vmem:[#allocation2 + $0xcc] sm:$0xf] %v4101_v1  ;;  %357 = vst [vmem:[#allocation2 + $0xd0] sm:$0xf] %v4101_v1  ;;  %v380_v31 = vld [vmem:[#allocation2 + $0x114] sm:$0x1] }
  0x34   : > { %358 = vst [vmem:[#allocation2 + $0xd4] sm:$0xf] %v4101_v1  ;;  %362 = vst [vmem:[#allocation2 + $0xdc] sm:$0xf] %v4101_v1  ;;  %v374_v34 = vsel %vm4301_vm2, 0, %v373_v30  ;;  %v381_v35 = vsel %vm4301_vm2, 0, %v380_v31 }
  0x35   : > { %363 = vst [vmem:[#allocation2 + $0xe0] sm:$0xf] %v4101_v1  ;;  %364 = vst [vmem:[#allocation2 + $0xe4] sm:$0xf] %v4101_v1  ;;  %v387_v36 = vld [vmem:[#allocation2 + $0x128] sm:$0x1] }
  0x36   : > { %365 = vst [vmem:[#allocation2 + $0xe8] sm:$0xf] %v4101_v1  ;;  %369 = vst [vmem:[#allocation2 + $0xf0] sm:$0xf] %v4101_v1  ;;  %v394_v37 = vld [vmem:[#allocation2 + $0x13c] sm:$0x1] }
  0x37   : > { %370 = vst [vmem:[#allocation2 + $0xf4] sm:$0xf] %v4101_v1  ;;  %371 = vst [vmem:[#allocation2 + $0xf8] sm:$0xf] %v4101_v1  ;;  %v388_v38 = vsel %vm4301_vm2, 0, %v387_v36  ;;  %v395_v39 = vsel %vm4301_vm2, 0, %v394_v37 }
  0x38   : > { %372 = vst [vmem:[#allocation2 + $0xfc] sm:$0xf] %v4101_v1  ;;  %376 = vst [vmem:[#allocation2 + $0x104] sm:$0xf] %v4101_v1  ;;  %v401_v40 = vld [vmem:[#allocation2 + $0x150] sm:$0x1] }
  0x39   : > { %377 = vst [vmem:[#allocation2 + $0x108] sm:$0xf] %v4101_v1  ;;  %378 = vst [vmem:[#allocation2 + $0x10c] sm:$0xf] %v4101_v1  ;;  %v408_v41 = vld [vmem:[#allocation2 + $0x164] sm:$0x1] }
  0x3a   : > { %379 = vst [vmem:[#allocation2 + $0x110] sm:$0xf] %v4101_v1  ;;  %383 = vst [vmem:[#allocation2 + $0x118] sm:$0xf] %v4101_v1  ;;  %v402_v42 = vsel %vm4301_vm2, 0, %v401_v40  ;;  %v409_v43 = vsel %vm4301_vm2, 0, %v408_v41 }
  0x3b   : > { %384 = vst [vmem:[#allocation2 + $0x11c] sm:$0xf] %v4101_v1  ;;  %385 = vst [vmem:[#allocation2 + $0x120] sm:$0xf] %v4101_v1  ;;  %v4347_v44 = vld [vmem:[%s5142_s1] ss:$0 sm:$0xff] }
  0x3c   : > { %386 = vst [vmem:[#allocation2 + $0x124] sm:$0xf] %v4101_v1  ;;  %390 = vst [vmem:[#allocation2 + $0x12c] sm:$0xf] %v4101_v1  ;;  %v4352_v45 = vld [vmem:[%s5143_s2] ss:$0 sm:$0xff]  ;;  %v482_v46 = vmul.f32 %v3292_v26, %v4347_v44  ;;  %v483_v47 = vmul.f32 %v3293_v27, %v4347_v44  ;;  %v484_v48 = vmul.f32 %v3296_v32, %v4347_v44 }
  0x3d   : > { %391 = vst [vmem:[#allocation2 + $0x130] sm:$0xf] %v4101_v1  ;;  %392 = vst [vmem:[#allocation2 + $0x134] sm:$0xf] %v4101_v1  ;;  %v485_v49 = vmul.f32 %v3297_v33, %v4347_v44  ;;  %v3396_v51 = vld [vmem:[%s4215_s30 + $0x18] sm:$0xff]   ;;  %v486_v60 = vmul.f32 %v3300_v52, %v4347_v44  ;;  %v487_v61 = vmul.f32 %v3301_v53, %v4347_v44  ;;  %v3397_v0 = vld [vmem:[%s4215_s30 + $0x20] sm:$0xff]  }
  0x3e   : > { %393 = vst [vmem:[#allocation2 + $0x138] sm:$0xf] %v4101_v1  ;;  %397 = vst [vmem:[#allocation2 + $0x140] sm:$0xf] %v4101_v1  ;;  %v3304_v54 = vunpack.c.l.bf16 %v3396_v51  ;;  %v3305_v55 = vunpack.c.h.bf16 %v3396_v51  ;;  %v521_v56 = vadd.f32 %v4352_v45, %v482_v46  ;;  %v522_v57 = vadd.f32 %v4352_v45, %v483_v47  ;;  %v3398_v9 = vld [vmem:[%s4215_s30 + $0x28] sm:$0xff]   ;;  %v3401_v46 = vld [vmem:[%s4215_s30 + $0x40] sm:$0xff]  }
  0x3f   : > { %398 = vst [vmem:[#allocation2 + $0x144] sm:$0xf] %v4101_v1  ;;  %399 = vst [vmem:[#allocation2 + $0x148] sm:$0xf] %v4101_v1  ;;  %v523_v58 = vadd.f32 %v4352_v45, %v484_v48  ;;  %v524_v59 = vadd.f32 %v4352_v45, %v485_v49  ;;  %v3308_v13 = vunpack.c.l.bf16 %v3397_v0  ;;  %v3309_v20 = vunpack.c.h.bf16 %v3397_v0 }
  0x40   : > { %400 = vst [vmem:[#allocation2 + $0x14c] sm:$0xf] %v4101_v1  ;;  %404 = vst [vmem:[#allocation2 + $0x154] sm:$0xf] %v4101_v1  ;;  %v488_v62 = vmul.f32 %v3304_v54, %v4347_v44  ;;  %v489_v63 = vmul.f32 %v3305_v55, %v4347_v44  ;;  %v554_v2 = vmax.f32 %v522_v57, 0.0  ;;  %v3312_v21 = vunpack.c.l.bf16 %v3398_v9  ;;  %v3402_v55 = vld [vmem:[%s4215_s30 + $0x48] sm:$0xff]  }
  0x41   : > { %405 = vst [vmem:[#allocation2 + $0x158] sm:$0xf] %v4101_v1  ;;  %406 = vst [vmem:[#allocation2 + $0x15c] sm:$0xf] %v4101_v1  ;;  %v555_v3 = vmax.f32 %v523_v58, 0.0  ;;  %v556_v4 = vmax.f32 %v524_v59, 0.0  ;;  %v3324_v58 = vunpack.c.l.bf16 %v3401_v46  ;;  %v3325_v59 = vunpack.c.h.bf16 %v3401_v46 }
  0x42   : > { %407 = vst [vmem:[#allocation2 + $0x160] sm:$0xf] %v4101_v1  ;;  %291 = vst [vmem:[#allocation2 + $0x10] sm:$0x1] %v290_v5  ;;  %v553_v1 = vmax.f32 %v521_v56, 0.0  ;;  %v525_v5 = vadd.f32 %v4352_v45, %v486_v60  ;;  %v528_v8 = vadd.f32 %v4352_v45, %v489_v63  ;;  %v3257_v11 = vpack.c.bf16 %v554_v2, %v554_v2  ;;  %v3403_v60 = vld [vmem:[%s4215_s30 + $0x50] sm:$0xff]  }
  0x43   : > { %298 = vst [vmem:[#allocation2 + $0x24] sm:$0x1] %v297_v6  ;;  %305 = vst [vmem:[#allocation2 + $0x38] sm:$0x1] %v304_v7  ;;  %v526_v6 = vadd.f32 %v4352_v45, %v487_v61  ;;  %v527_v7 = vadd.f32 %v4352_v45, %v488_v62  ;;  %v3357_v12 = vpack.c.bf16 %v556_v4, %v555_v3  ;;  %v3328_v3 = vunpack.c.l.bf16 %v3402_v55 }
  0x44   : > { %312 = vst [vmem:[#allocation2 + $0x4c] sm:$0x1] %v311_v10  ;;  %319 = vst [vmem:[#allocation2 + $0x60] sm:$0x1] %v318_v14  ;;  %v3256_v10 = vpack.c.bf16 %v553_v1, %v553_v1  ;;  %v3399_v14 = vld [vmem:[%s4215_s30 + $0x30] sm:$0xff]   ;;  %v492_v30 = vmul.f32 %v3312_v21, %v4347_v44  ;;  %v498_v1 = vmul.f32 %v3324_v58, %v4347_v44  ;;  %v3329_v4 = vunpack.c.h.bf16 %v3402_v55 }
  0x45   : > { %326 = vst [vmem:[#allocation2 + $0x74] sm:$0x1] %v325_v15  ;;  %333 = vst [vmem:[#allocation2 + $0x88] sm:$0x1] %v332_v18  ;;  %v557_v15 = vmax.f32 %v525_v5, 0.0  ;;  %v558_v16 = vmax.f32 %v526_v6, 0.0  ;;  %v3316_v27 = vunpack.c.l.bf16 %v3399_v14  ;;  %v3317_v33 = vunpack.c.h.bf16 %v3399_v14 }
  0x46   : > { %340 = vst [vmem:[#allocation2 + $0x9c] sm:$0x1] %v339_v19  ;;  %347 = vst [vmem:[#allocation2 + $0xb0] sm:$0x1] %v346_v22  ;;  %v559_v17 = vmax.f32 %v527_v7, 0.0  ;;  %v560_v18 = vmax.f32 %v528_v8, 0.0  ;;  %v490_v19 = vmul.f32 %v3308_v13, %v4347_v44  ;;  %v3313_v22 = vunpack.c.h.bf16 %v3398_v9 }
  0x47   : > { %354 = vst [vmem:[#allocation2 + $0xc4] sm:$0x1] %v353_v23  ;;  %361 = vst [vmem:[#allocation2 + $0xd8] sm:$0x1] %v360_v28  ;;  %v3400_v23 = vld [vmem:[%s4215_s30 + $0x38] sm:$0xff]   ;;  %v3260_v24 = vpack.c.bf16 %v557_v15, %v557_v15  ;;  %v3261_v25 = vpack.c.bf16 %v558_v16, %v558_v16  ;;  %v494_v32 = vmul.f32 %v3316_v27, %v4347_v44  ;;  %v3332_v8 = vunpack.c.l.bf16 %v3403_v60  ;;  %v3406_v27 = vld [vmem:[%s4215_s30 + $0x68] sm:$0xff]  }
  0x48   : > { %368 = vst [vmem:[#allocation2 + $0xec] sm:$0x1] %v367_v29  ;;  %375 = vst [vmem:[#allocation2 + $0x100] sm:$0x1] %v374_v34  ;;  %v3362_v26 = vpack.c.bf16 %v560_v18, %v559_v17  ;;  %v529_v28 = vadd.f32 %v4352_v45, %v490_v19  ;;  %v491_v29 = vmul.f32 %v3309_v20, %v4347_v44  ;;  %v3320_v34 = vunpack.c.l.bf16 %v3400_v23  ;;  %v3404_v5 = vld [vmem:[%s4215_s30 + $0x58] sm:$0xff]  }
  0x49   : > { %382 = vst [vmem:[#allocation2 + $0x114] sm:$0x1] %v381_v35  ;;  %389 = vst [vmem:[#allocation2 + $0x128] sm:$0x1] %v388_v38  ;;  %v493_v31 = vmul.f32 %v3313_v22, %v4347_v44  ;;  %v3321_v35 = vunpack.c.h.bf16 %v3400_v23  ;;  %v531_v38 = vadd.f32 %v4352_v45, %v492_v30  ;;  %v533_v40 = vadd.f32 %v4352_v45, %v494_v32 }
  0x4a   : > { %396 = vst [vmem:[#allocation2 + $0x13c] sm:$0x1] %v395_v39  ;;  %403 = vst [vmem:[#allocation2 + $0x150] sm:$0x1] %v402_v42  ;;  %v561_v36 = vmax.f32 %v529_v28, 0.0  ;;  %v530_v37 = vadd.f32 %v4352_v45, %v491_v29  ;;  %v495_v41 = vmul.f32 %v3317_v33, %v4347_v44  ;;  %v496_v42 = vmul.f32 %v3320_v34, %v4347_v44 }
  0x4b   : > { %410 = vst [vmem:[#allocation2 + $0x164] sm:$0x1] %v409_v43  ;;  %714 = vst [vmem:[#allocation2 + $0x1c] sm:$0xf] %v3256_v10  ;;  %v532_v39 = vadd.f32 %v4352_v45, %v493_v31  ;;  %v497_v43 = vmul.f32 %v3321_v35, %v4347_v44  ;;  %v563_v49 = vmax.f32 %v531_v38, 0.0  ;;  %v565_v51 = vmax.f32 %v533_v40, 0.0 }
  0x4c   : > { %715 = vst [vmem:[#allocation2 + $0x20] sm:$0xf] %v3257_v11  ;;  %3409 = vst [vmem:[#allocation2 + $0x30] sm:$0xff] %v3357_v12   ;;  %v3264_v47 = vpack.c.bf16 %v561_v36, %v561_v36  ;;  %v562_v48 = vmax.f32 %v530_v37, 0.0  ;;  %v534_v52 = vadd.f32 %v4352_v45, %v495_v41  ;;  %v535_v53 = vadd.f32 %v4352_v45, %v496_v42  ;;  %v3407_v40 = vld [vmem:[%s4215_s30 + $0x70] sm:$0xff]   ;;  %v3408_v41 = vld [vmem:[%s4215_s30 + $0x78] sm:$0xff]  }
  0x4d   : > { %718 = vst [vmem:[#allocation2 + $0x44] sm:$0xf] %v3260_v24  ;;  %719 = vst [vmem:[#allocation2 + $0x48] sm:$0xf] %v3261_v25  ;;  %v564_v50 = vmax.f32 %v532_v39, 0.0  ;;  %v536_v54 = vadd.f32 %v4352_v45, %v497_v43  ;;  %v3268_v61 = vpack.c.bf16 %v565_v51, %v565_v51  ;;  %v499_v2 = vmul.f32 %v3325_v59, %v4347_v44 }
  0x4e   : > { %3410 = vst [vmem:[#allocation2 + $0x58] sm:$0xff] %v3362_v26   ;;  %722 = vst [vmem:[#allocation2 + $0x6c] sm:$0xf] %v3264_v47  ;;  %v3265_v56 = vpack.c.bf16 %v562_v48, %v562_v48  ;;  %v566_v62 = vmax.f32 %v534_v52, 0.0  ;;  %v567_v63 = vmax.f32 %v535_v53, 0.0  ;;  %v3333_v9 = vunpack.c.h.bf16 %v3403_v60  ;;  %v3405_v26 = vld [vmem:[%s4215_s30 + $0x60] sm:$0xff]  }
  0x4f   : > { %v3367_v57 = vpack.c.bf16 %v564_v50, %v563_v49  ;;  %v568_v0 = vmax.f32 %v536_v54, 0.0  ;;  %726 = vst [vmem:[#allocation2 + $0x94] sm:$0xf] %v3268_v61  ;;  %v537_v10 = vadd.f32 %v4352_v45, %v498_v1  ;;  %v538_v11 = vadd.f32 %v4352_v45, %v499_v2 }
  0x50   : > { %723 = vst [vmem:[#allocation2 + $0x70] sm:$0xf] %v3265_v56  ;;  %v3269_v6 = vpack.c.bf16 %v566_v62, %v566_v62  ;;  %v500_v12 = vmul.f32 %v3328_v3, %v4347_v44  ;;  %v501_v13 = vmul.f32 %v3329_v4, %v4347_v44  ;;  %v502_v14 = vmul.f32 %v3332_v8, %v4347_v44 }
  0x51   : > { %3411 = vst [vmem:[#allocation2 + $0x80] sm:$0xff] %v3367_v57   ;;  %v3372_v7 = vpack.c.bf16 %v568_v0, %v567_v63  ;;  %v503_v15 = vmul.f32 %v3333_v9, %v4347_v44  ;;  %v3336_v16 = vunpack.c.l.bf16 %v3404_v5  ;;  %v3337_v17 = vunpack.c.h.bf16 %v3404_v5 }
  0x52   : > { %727 = vst [vmem:[#allocation2 + $0x98] sm:$0xf] %v3269_v6  ;;  %v569_v18 = vmax.f32 %v537_v10, 0.0  ;;  %v570_v19 = vmax.f32 %v538_v11, 0.0  ;;  %v539_v20 = vadd.f32 %v4352_v45, %v500_v12  ;;  %v540_v21 = vadd.f32 %v4352_v45, %v501_v13 }
  0x53   : > { %3412 = vst [vmem:[#allocation2 + $0xa8] sm:$0xff] %v3372_v7   ;;  %v541_v22 = vadd.f32 %v4352_v45, %v502_v14  ;;  %v542_v23 = vadd.f32 %v4352_v45, %v503_v15  ;;  %v504_v24 = vmul.f32 %v3336_v16, %v4347_v44  ;;  %v505_v25 = vmul.f32 %v3337_v17, %v4347_v44 }
  0x54   : > { %v3272_v28 = vpack.c.bf16 %v569_v18, %v569_v18  ;;  %v3273_v29 = vpack.c.bf16 %v570_v19, %v570_v19  ;;  %v571_v30 = vmax.f32 %v539_v20, 0.0  ;;  %v572_v31 = vmax.f32 %v540_v21, 0.0 }
  0x55   : > { %v573_v32 = vmax.f32 %v541_v22, 0.0  ;;  %v574_v33 = vmax.f32 %v542_v23, 0.0  ;;  %v543_v34 = vadd.f32 %v4352_v45, %v504_v24  ;;  %v544_v35 = vadd.f32 %v4352_v45, %v505_v25 }
  0x56   : > { %730 = vst [vmem:[#allocation2 + $0xbc] sm:$0xf] %v3272_v28  ;;  %731 = vst [vmem:[#allocation2 + $0xc0] sm:$0xf] %v3273_v29  ;;  %v3377_v36 = vpack.c.bf16 %v572_v31, %v571_v30  ;;  %v3340_v37 = vunpack.c.l.bf16 %v3405_v26  ;;  %v3341_v38 = vunpack.c.h.bf16 %v3405_v26  ;;  %v3344_v39 = vunpack.c.l.bf16 %v3406_v27 }
  0x57   : > { %v3276_v42 = vpack.c.bf16 %v573_v32, %v573_v32  ;;  %v3277_v43 = vpack.c.bf16 %v574_v33, %v574_v33  ;;  %v575_v46 = vmax.f32 %v543_v34, 0.0  ;;  %v576_v47 = vmax.f32 %v544_v35, 0.0 }
  0x58   : > { %3413 = vst [vmem:[#allocation2 + $0xd0] sm:$0xff] %v3377_v36   ;;  %v506_v48 = vmul.f32 %v3340_v37, %v4347_v44  ;;  %v507_v49 = vmul.f32 %v3341_v38, %v4347_v44  ;;  %v3345_v50 = vunpack.c.h.bf16 %v3406_v27  ;;  %v508_v51 = vmul.f32 %v3344_v39, %v4347_v44 }
  0x59   : > { %734 = vst [vmem:[#allocation2 + $0xe4] sm:$0xf] %v3276_v42  ;;  %735 = vst [vmem:[#allocation2 + $0xe8] sm:$0xf] %v3277_v43  ;;  %v3382_v52 = vpack.c.bf16 %v576_v47, %v575_v46  ;;  %v3348_v53 = vunpack.c.l.bf16 %v3407_v40  ;;  %v3349_v54 = vunpack.c.h.bf16 %v3407_v40  ;;  %v3352_v55 = vunpack.c.l.bf16 %v3408_v41 }
  0x5a   : > { %v545_v56 = vadd.f32 %v4352_v45, %v506_v48  ;;  %v546_v57 = vadd.f32 %v4352_v45, %v507_v49  ;;  %v509_v58 = vmul.f32 %v3345_v50, %v4347_v44  ;;  %v547_v59 = vadd.f32 %v4352_v45, %v508_v51 }
  0x5b   : > { %3414 = vst [vmem:[#allocation2 + $0xf8] sm:$0xff] %v3382_v52   ;;  %v510_v60 = vmul.f32 %v3348_v53, %v4347_v44  ;;  %v511_v61 = vmul.f32 %v3349_v54, %v4347_v44  ;;  %v3353_v62 = vunpack.c.h.bf16 %v3408_v41  ;;  %v512_v63 = vmul.f32 %v3352_v55, %v4347_v44 }
  0x5c   : > { %v577_v0 = vmax.f32 %v545_v56, 0.0  ;;  %v578_v1 = vmax.f32 %v546_v57, 0.0  ;;  %v548_v2 = vadd.f32 %v4352_v45, %v509_v58  ;;  %v579_v3 = vmax.f32 %v547_v59, 0.0 }
  0x5d   : > { %v549_v4 = vadd.f32 %v4352_v45, %v510_v60  ;;  %v550_v5 = vadd.f32 %v4352_v45, %v511_v61  ;;  %v513_v6 = vmul.f32 %v3353_v62, %v4347_v44  ;;  %v551_v7 = vadd.f32 %v4352_v45, %v512_v63 }
  0x5e   : > { %v3280_v8 = vpack.c.bf16 %v577_v0, %v577_v0  ;;  %v3281_v9 = vpack.c.bf16 %v578_v1, %v578_v1  ;;  %v580_v10 = vmax.f32 %v548_v2, 0.0 }
  0x5f   : > { %v581_v11 = vmax.f32 %v549_v4, 0.0  ;;  %v582_v12 = vmax.f32 %v550_v5, 0.0  ;;  %v552_v13 = vadd.f32 %v4352_v45, %v513_v6  ;;  %v583_v14 = vmax.f32 %v551_v7, 0.0 }
  0x60   : > { %738 = vst [vmem:[#allocation2 + $0x10c] sm:$0xf] %v3280_v8  ;;  %739 = vst [vmem:[#allocation2 + $0x110] sm:$0xf] %v3281_v9  ;;  %v3387_v15 = vpack.c.bf16 %v580_v10, %v579_v3 }
  0x61   : > { %v3284_v16 = vpack.c.bf16 %v581_v11, %v581_v11  ;;  %v3285_v17 = vpack.c.bf16 %v582_v12, %v582_v12  ;;  %v584_v18 = vmax.f32 %v552_v13, 0.0 }
  0x62   : > { %3415 = vst [vmem:[#allocation2 + $0x120] sm:$0xff] %v3387_v15  }
  0x63   : > { %742 = vst [vmem:[#allocation2 + $0x134] sm:$0xf] %v3284_v16  ;;  %743 = vst [vmem:[#allocation2 + $0x138] sm:$0xf] %v3285_v17  ;;  %v3392_v44 = vpack.c.bf16 %v584_v18, %v583_v14 }
  0x65   : > { %3416 = vst [vmem:[#allocation2 + $0x148] sm:$0xff] %v3392_v44  }
  0x66 PF: > { %v3923_v19 = vld [vmem:[%s5144_s3 + $0x40] sm:$0xff]   ;;  %v3926_v21 = vld [vmem:[%s5144_s3 + $0x48] sm:$0xff]   ;;  %v3929_v24 = vld [vmem:[%s5144_s3 + $0x50] sm:$0xff]   ;;  %s3288_s10 = smul.u32 160, %s4083_s21  ;;  %vm1173_vm3 = vsmask.f32 3328 }
  0x67   : > { %v3924_v45 = vld [vmem:[%s5144_s3 + $0x80] sm:$0xff]   ;;  %3417 = vmatprep.subr.bf16.mxu0 %v3923_v19  ;;  %v3927_v22 = vld [vmem:[%s5144_s3 + $0x88] sm:$0xff]   ;;  %v3930_v25 = vld [vmem:[%s5144_s3 + $0x90] sm:$0xff]   ;;  %vm1174_vm4 = vsmask.f32 7440  ;;  %s4102_s30 = smov [#allocation5]  }
  0x68   : > { %v3925_v20 = vld [vmem:[%s5144_s3] sm:$0xff]   ;;  %3657 = vmatprep.subr.bf16.mxu1 %v3924_v45  ;;  %v3928_v23 = vld [vmem:[%s5144_s3 + $0x8] sm:$0xff]   ;;  %v3931_v26 = vld [vmem:[%s5144_s3 + $0x10] sm:$0xff]   ;;  %s4502_s28 = scalar_lea.vmem [#allocation2], %s3288_s10  ;;  %vm780_vm5 = vsmask.f32 256 }
  0x69   : > { %3418 = vmatpush3.bf16.msra.mxu0 %v3925_v20  ;;  %3658 = vmatpush3.bf16.msra.mxu1 %v3924_v45  ;;  %v3932_v27 = vld [vmem:[%s5144_s3 + $0x58] sm:$0xff]   ;;  %v3935_v30 = vld [vmem:[%s5144_s3 + $0x60] sm:$0xff]   ;;  %v3938_v33 = vld [vmem:[%s5144_s3 + $0x68] sm:$0xff]   ;;  %vm781_vm6 = vsmask.f32 4368  ;;  %s3251_s10 = sshll.u32 %s4087_s22, 5 }
  0x6a   : > { %3419 = vmatprep.subr.bf16.mxu0 %v3926_v21  ;;  %3659 = vmatprep.subr.bf16.mxu1 %v3927_v22  ;;  %v3933_v28 = vld [vmem:[%s5144_s3 + $0x98] sm:$0xff]   ;;  %v3936_v31 = vld [vmem:[%s5144_s3 + $0xa0] sm:$0xff]   ;;  %v3939_v34 = vld [vmem:[%s5144_s3 + $0xa8] sm:$0xff]   ;;  %s2891_s22 = sshll.u32 %s4222_s12, 4  ;;  %s4009_s8 = sshll.u32 %s4102_s30, 4  ;;  %s5080_s22 = int_to_ptr.vmem [resolvable:$true] %s2891_s22  ;;  %s4010_s8 = int_to_ptr.vmem [resolvable:$false] %s4009_s8 }
  0x6b   : > { %v3934_v29 = vld [vmem:[%s5144_s3 + $0x18] sm:$0xff]   ;;  %v3937_v32 = vld [vmem:[%s5144_s3 + $0x20] sm:$0xff]   ;;  %v3940_v35 = vld [vmem:[%s5144_s3 + $0x28] sm:$0xff]   ;;  %s4005_s27 = scalar_lea.vmem %s5080_s22, 2048  ;;  %s4011_s9 = scalar_lea.vmem %s4010_s8, 4096 }
  0x6c   : > { %v3941_v36 = vld [vmem:[%s5144_s3 + $0x70] sm:$0xff]   ;;  %v3944_v39 = vld [vmem:[%s5144_s3 + $0x78] sm:$0xff]   ;;  %v3947_v41 = vld [vmem:[%s4502_s28 + $0x8] sm:$0xff]   ;;  %p4006_p1 = scmp.ne.s32.totalorder %s5080_s22, %s4005_s27  ;;  %p4012_p5 = scmp.lt.s32.totalorder %s5080_s22, %s4010_s8 }
  0x6d   : > { %3420 = vmatpush3.bf16.msra.mxu0 %v3928_v23  ;;  %3660 = vmatpush3.bf16.msra.mxu1 %v3927_v22  ;;  %v3942_v37 = vld [vmem:[%s5144_s3 + $0xb0] sm:$0xff]   ;;  %v3945_v40 = vld [vmem:[%s5144_s3 + $0xb8] sm:$0xff]   ;;  %v1143_v42 = vld [vmem:[%s4502_s28 + $0x8] sm:$0xf]  ;;  %p4013_p6 = scmp.lt.s32.totalorder %s4011_s9, %s4005_s27 }
  0x6e   : > { %3421 = vmatprep.subr.bf16.mxu0 %v3929_v24  ;;  %3661 = vmatprep.subr.bf16.mxu1 %v3930_v25  ;;  %v3943_v38 = vld [vmem:[%s5144_s3 + $0x30] sm:$0xff]   ;;  %v1144_v43 = vld [vmem:[%s4502_s28 + $0xc] sm:$0xf]  ;;  %v3946_v47 = vld [vmem:[%s5144_s3 + $0x38] sm:$0xff]   ;;  %v1177_v48 = vshrl.u32 %v1143_v42, 16  ;;  %v1180_v49 = vshll.u32 %v1143_v42, 16  ;;  %p4007_p2 = pnand %p4006_p1, %p4186_p3 }
  0x6f   : > { %v1145_v46 = vld [vmem:[%s4502_s28 + $0x10] sm:$0x1]  ;;  %1714 = vmatprep.mubr.bf16.mxu0 %v3947_v41  ;;  %v1186_v50 = vshll.u32 %v1144_v43, 16  ;;  %v1190_v51 = vshrl.u32 %v1144_v43, 16  ;;  %v750_v53 = vld [vmem:[%s4502_s28 + $0x4] sm:$0x8]  ;;  %vm4523_vm7 = vmor %vm1173_vm3, %vm1174_vm4  ;;  %p4014_p7 = por %p4013_p6, %p4012_p5 }
  0x70   : > { %v1196_v52 = vshll.u32 %v1145_v46, 16  ;;  %v3948_v54 = vld [vmem:[%s5144_s3 + $0x100] sm:$0xff]   ;;  %v1179_v55 = vrot.slane %v1177_v48, 4  ;;  %v1182_v56 = vrot.slane %v1180_v49, 5  ;;  %v751_v57 = vld [vmem:[%s4502_s28 + $0x8] sm:$0xf]  ;;  %vm4531_vm8 = vmor %vm780_vm5, %vm781_vm6  ;;  %p4008_p4 = pneg %p4007_p2 }
  0x71   : > { %3422 = vmatpush3.bf16.msra.mxu0 %v3931_v26  ;;  %3662 = vmatpush3.bf16.msra.mxu1 %v3930_v25  ;;  %v752_v58 = vld [vmem:[%s4502_s28 + $0xc] sm:$0xf]  ;;  %v1188_v59 = vrot.slane %v1186_v50, 5  ;;  %v1192_v60 = vrot.slane %v1190_v51, 4  ;;  %v3949_v62 = vld [vmem:[%s5144_s3 + $0x1c0] sm:$0xff]   ;;  %v784_v0 = vshrl.u32 %v750_v53, 16 }
  0x72   : > { %3423 = vmatprep.subr.bf16.mxu0 %v3932_v27  ;;  %3663 = vmatprep.subr.bf16.mxu1 %v3933_v28  ;;  %v1198_v61 = vrot.slane %v1196_v52, 5  ;;  %v1183_v63 = vor.u32 %v1182_v56, %v1179_v55  ;;  %v789_v1 = vshrl.u32 %v751_v57, 16  ;;  %v1146_v2 = vld [vmem:[%s4502_s28 + $0x1c] sm:$0xf]  ;;  %v792_v5 = vshll.u32 %v751_v57, 16  ;;  %v3950_v56 = vld [vmem:[%s5144_s3 + $0xc0] sm:$0xff]   ;;  %p4015_p9 = pnand %p4014_p7, %p4008_p4 }
  0x73   : > { %v1193_v4 = vor.u32 %v1192_v60, %v1188_v59  ;;  %v798_v6 = vshrl.u32 %v752_v58, 16  ;;  %v801_v7 = vshll.u32 %v752_v58, 16  ;;  %v1147_v8 = vld [vmem:[%s4502_s28 + $0x20] sm:$0xf]  ;;  %v3040_v10 = vrot.slane %v784_v0, 11 }
  0x74   : > { %v1184_v9 = vrot.slane %v1183_v63, 4  ;;  %v791_v11 = vrot.slane %v789_v1, 7  ;;  %v1148_v12 = vld [vmem:[%s4502_s28 + $0x24] sm:$0x1]  ;;  %v1201_v13 = vshrl.u32 %v1146_v2, 16  ;;  %v1204_v17 = vshll.u32 %v1146_v2, 16 }
  0x75   : > { %3424 = vmatpush3.bf16.msra.mxu0 %v3934_v29  ;;  %3664 = vmatpush3.bf16.msra.mxu1 %v3933_v28  ;;  %v1194_v14 = vrot.slane %v1193_v4, 4  ;;  %v800_v16 = vrot.slane %v798_v6, 7  ;;  %v1210_v18 = vshll.u32 %v1147_v8, 16  ;;  %v1214_v27 = vshrl.u32 %v1147_v8, 16  ;;  %v1151_v41 = vld [vmem:[%s4502_s28 + $0x38] sm:$0x1] }
  0x76   : > { %3425 = vmatprep.subr.bf16.mxu0 %v3935_v30  ;;  %3665 = vmatprep.subr.bf16.mxu1 %v3936_v31  ;;  %v1189_v44 = vsel %vm4523_vm7, %v1184_v9, %v1188_v59  ;;  %v794_v19 = vor.u32 %v792_v5, %v791_v11  ;;  %v796_v45 = vrot.slane %v791_v11, 4  ;;  %v1203_v20 = vrot.slane %v1201_v13, 4  ;;  %v753_v50 = vld [vmem:[%s4502_s28 + $0x18] sm:$0x8]  ;;  %v754_v53 = vld [vmem:[%s4502_s28 + $0x1c] sm:$0xf] }
  0x77   : > { %v1199_v21 = vsel %vm4523_vm7, %v1194_v14, %v1198_v61  ;;  %v803_v22 = vor.u32 %v801_v7, %v800_v16  ;;  %v1206_v23 = vrot.slane %v1204_v17, 5  ;;  %v1212_v24 = vrot.slane %v1210_v18, 5  ;;  %v1152_v60 = vld [vmem:[%s4502_s28 + $0x44] sm:$0xf]  ;;  %v1153_v2 = vld [vmem:[%s4502_s28 + $0x48] sm:$0xf] }
  0x78   : > { %v3070_v25 = vcombine.low %v1189_v44, %v1199_v21  ;;  %v795_v26 = vsel %vm4531_vm8, %v3040_v10, %v794_v19  ;;  %v1220_v28 = vshll.u32 %v1148_v12, 16  ;;  %v1244_v49 = vshll.u32 %v1151_v41, 16  ;;  %v3953_v4 = vld [vmem:[%s5144_s3 + $0xc8] sm:$0xff]   ;;  %v3955_v16 = vld [vmem:[%s5144_s3 + $0x110] sm:$0xff]  }
  0x79   : > { %3426 = vmatpush3.bf16.msra.mxu0 %v3937_v32  ;;  %3666 = vmatpush3.bf16.msra.mxu1 %v3936_v31  ;;  %v804_v29 = vsel %vm4531_vm8, %v796_v45, %v803_v22  ;;  %v1207_v30 = vor.u32 %v1206_v23, %v1203_v20  ;;  %v3951_v31 = vld [vmem:[%s5144_s3 + $0x180] sm:$0xff]   ;;  %v806_v0 = vshrl.u32 %v753_v50, 16  ;;  %v811_v1 = vshrl.u32 %v754_v53, 16  ;;  %v1154_v9 = vld [vmem:[%s4502_s28 + $0x4c] sm:$0x1] }
  0x7a   : > { %3427 = vmatprep.subr.bf16.mxu0 %v3938_v33  ;;  %3667 = vmatprep.subr.bf16.mxu1 %v3939_v34  ;;  %v3050_v32 = vcombine.low %v795_v26, %v804_v29  ;;  %v1216_v33 = vrot.slane %v1214_v27, 4  ;;  %v1246_v59 = vrot.slane %v1244_v49, 5  ;;  %v814_v6 = vshll.u32 %v754_v53, 16  ;;  %v3956_v10 = vld [vmem:[%s5144_s3 + $0x1c8] sm:$0xff]  }
  0x7b   : > { %3673 = vmatprep.mubr.bf16.mxu1 %v3070_v25  ;;  %v3041_v12 = vrot.slane %v806_v0, 11  ;;  %v813_v13 = vrot.slane %v811_v1, 7  ;;  %v1249_v14 = vshrl.u32 %v1152_v60, 16  ;;  %v1252_v44 = vshll.u32 %v1152_v60, 16  ;;  %v3958_v27 = vld [vmem:[%s5144_s3 + $0x188] sm:$0xff]  }
  0x7c   : > { %v1258_v19 = vshll.u32 %v1153_v2, 16 }
  0x7d   : > { %3428 = vmatpush3.bf16.msra.mxu0 %v3940_v35  ;;  %3668 = vmatpush3.bf16.msra.mxu1 %v3939_v34  ;;  %v1222_v34 = vrot.slane %v1220_v28, 5  ;;  %v1208_v35 = vrot.slane %v1207_v30, 4  ;;  %v816_v20 = vor.u32 %v814_v6, %v813_v13  ;;  %v818_v21 = vrot.slane %v813_v13, 4  ;;  %v1159_v13 = vld [vmem:[%s4502_s28 + $0x70] sm:$0xf] }
  0x7e   : > { %3429 = vmatprep.subr.bf16.mxu0 %v3941_v36  ;;  %3669 = vmatprep.subr.bf16.mxu1 %v3942_v37  ;;  %v4547_v36 = vld [vmem:[%s4502_s28 + $0x1c] sm:$0xff]   ;;  %v1251_v22 = vrot.slane %v1249_v14, 4  ;;  %v1254_v25 = vrot.slane %v1252_v44, 5  ;;  %v1260_v26 = vrot.slane %v1258_v19, 5  ;;  %v1262_v30 = vshrl.u32 %v1153_v2, 16  ;;  %v3965_v19 = vld [vmem:[%s5144_s3 + $0x190] sm:$0xff]  }
  0x7f   : > { %v817_v29 = vsel %vm4531_vm8, %v3041_v12, %v816_v20  ;;  %v1158_v12 = vld [vmem:[%s4502_s28 + $0x6c] sm:$0xf]  ;;  %v1160_v44 = vld [vmem:[%s4502_s28 + $0x74] sm:$0x1] }
  0x80   : > { %v1297_v20 = vshrl.u32 %v1158_v12, 16 }
  0x81   : > { %3430 = vmatpush3.bf16.msra.mxu0 %v3943_v38  ;;  %3670 = vmatpush3.bf16.msra.mxu1 %v3942_v37  ;;  %v1217_v37 = vor.u32 %v1216_v33, %v1212_v24  ;;  %v1149_v38 = vld [vmem:[%s4502_s28 + $0x30] sm:$0xf]  ;;  %v1255_v33 = vor.u32 %v1254_v25, %v1251_v22  ;;  %v1306_v22 = vshll.u32 %v1159_v13, 16 }
  0x82   : > { %3431 = vmatprep.subr.bf16.mxu0 %v3944_v39  ;;  %3671 = vmatprep.subr.bf16.mxu1 %v3945_v40  ;;  %v1213_v39 = vsel %vm4523_vm7, %v1208_v35, %v1212_v24  ;;  %v1225_v42 = vshrl.u32 %v1149_v38, 16  ;;  %v1228_v43 = vshll.u32 %v1149_v38, 16  ;;  %v3959_v38 = vld [vmem:[%s5144_s3 + $0x118] sm:$0xff]  }
  0x83   : > { %v1218_v46 = vrot.slane %v1217_v37, 4  ;;  %v1264_v37 = vrot.slane %v1262_v30, 4  ;;  %v1299_v30 = vrot.slane %v1297_v20, 4 }
  0x84   : > { %v1227_v51 = vrot.slane %v1225_v42, 4  ;;  %v1230_v52 = vrot.slane %v1228_v43, 5  ;;  %v4608_v43 = vld [vmem:[%s4502_s28 + $0x30] sm:$0xff]  }
  0x85   : > { %3432 = vmatpush3.bf16.msra.mxu0 %v3946_v47  ;;  %3672 = vmatpush3.bf16.msra.mxu1 %v3945_v40  ;;  %v1150_v40 = vld [vmem:[%s4502_s28 + $0x34] sm:$0xf]  ;;  %v1223_v55 = vsel %vm4523_vm7, %v1218_v46, %v1222_v34  ;;  %v1265_v41 = vor.u32 %v1264_v37, %v1260_v26  ;;  %v1155_v46 = vld [vmem:[%s4502_s28 + $0x58] sm:$0xf] }
  0x86   : > { %3497 = vmatprep.subr.bf16.mxu1 %v3948_v54  ;;  %3577 = vmatprep.subr.bf16.mxu0 %v3949_v62  ;;  %v1234_v47 = vshll.u32 %v1150_v40, 16  ;;  %v1238_v48 = vshrl.u32 %v1150_v40, 16  ;;  %v755_v54 = vld [vmem:[%s4502_s28 + $0x20] sm:$0xf]  ;;  %v4564_v61 = vcombine.low %v1213_v39, %v1223_v55  ;;  %v3952_v62 = vld [vmem:[%s5144_s3 + $0x108] sm:$0xff]   ;;  %v1231_v63 = vor.u32 %v1230_v52, %v1227_v51  ;;  %v3957_v34 = vld [vmem:[%s5144_s3 + $0xd0] sm:$0xff]  }
  0x87   : > { %v820_v7 = vshrl.u32 %v755_v54, 16  ;;  %v823_v8 = vshll.u32 %v755_v54, 16  ;;  %v1256_v39 = vrot.slane %v1255_v33, 4  ;;  %v3960_v40 = vld [vmem:[%s5144_s3 + $0xd8] sm:$0xff]   ;;  %v1273_v49 = vshrl.u32 %v1155_v46, 16  ;;  %v3962_v52 = vld [vmem:[%s5144_s3 + $0x120] sm:$0xff]  }
  0x88   : > { %1715 = vmatmul.mubr.bf16.vlgmr.msra.gmra.mrb[0].mxu0 %v3050_v32  ;;  %v1236_v57 = vrot.slane %v1234_v47, 5  ;;  %v1240_v58 = vrot.slane %v1238_v48, 4  ;;  %3674 = vmatmul.mubr.bf16.vlgmr.msra.gmra.mrb[0].mxu1 %v4564_v61  ;;  %v1232_v11 = vrot.slane %v1231_v63, 4  ;;  %v1156_v47 = vld [vmem:[%s4502_s28 + $0x5c] sm:$0xf]  ;;  %v1276_v50 = vshll.u32 %v1155_v46, 16 }
  0x89   : > { %3578 = vmatpush3.bf16.msra.mxu0 %v3951_v31  ;;  %1722 = vmatprep.mubr.bf16.mxu0 %v4547_v36  ;;  %v822_v18 = vrot.slane %v820_v7, 7  ;;  %v1268_v31 = vshll.u32 %v1154_v9, 16  ;;  %v1157_v48 = vld [vmem:[%s4502_s28 + $0x60] sm:$0x1]  ;;  %v1282_v51 = vshll.u32 %v1156_v47, 16  ;;  %v1261_v53 = vsel %vm4523_vm7, %v1256_v39, %v1260_v26  ;;  %v3967_v33 = vld [vmem:[%s5144_s3 + $0xe8] sm:$0xff]  }
  0x8a   : > { %v1241_v5 = vor.u32 %v1240_v58, %v1236_v57  ;;  %3498 = vmatpush3.bf16.msra.mxu1 %v3950_v56  ;;  %3579 = vmatprep.subr.bf16.mxu0 %v3956_v10  ;;  %v1237_v45 = vsel %vm4523_vm7, %v1232_v11, %v1236_v57  ;;  %v1266_v54 = vrot.slane %v1265_v41, 4  ;;  %v1286_v55 = vshrl.u32 %v1156_v47, 16  ;;  %v756_v57 = vld [vmem:[%s4502_s28 + $0x2c] sm:$0x8]  ;;  %v3963_v58 = vld [vmem:[%s5144_s3 + $0x1d0] sm:$0xff]   ;;  %v3964_v7 = vld [vmem:[%s5144_s3 + $0xe0] sm:$0xff]  }
  0x8b   : > { %3499 = vmatprep.subr.bf16.mxu1 %v3952_v62  ;;  %v825_v24 = vor.u32 %v823_v8, %v822_v18  ;;  %v1270_v42 = vrot.slane %v1268_v31, 5  ;;  %v1292_v56 = vshll.u32 %v1157_v48, 16  ;;  %v1278_v60 = vrot.slane %v1276_v50, 5  ;;  %v757_v63 = vld [vmem:[%s4502_s28 + $0x30] sm:$0xf]  ;;  %v3970_v50 = vld [vmem:[%s5144_s3 + $0x1d8] sm:$0xff]  }
  0x8c   : > { %v1242_v17 = vrot.slane %v1241_v5, 4  ;;  %v1284_v62 = vrot.slane %v1282_v51, 5  ;;  %v828_v0 = vshrl.u32 %v756_v57, 16  ;;  %v1288_v2 = vrot.slane %v1286_v55, 4  ;;  %v758_v5 = vld [vmem:[%s4502_s28 + $0x34] sm:$0xf] }
  0x8d   : > { %v826_v32 = vsel %vm4531_vm8, %v818_v21, %v825_v24  ;;  %3580 = vmatpush3.bf16.msra.mxu0 %v3958_v27  ;;  %v1271_v1 = vsel %vm4523_vm7, %v1266_v54, %v1270_v42  ;;  %v833_v6 = vshrl.u32 %v757_v63, 16  ;;  %v836_v11 = vshll.u32 %v757_v63, 16  ;;  %v3966_v27 = vld [vmem:[%s5144_s3 + $0x128] sm:$0xff]   ;;  %v3969_v47 = vld [vmem:[%s5144_s3 + $0x130] sm:$0xff]   ;;  %v1162_v57 = vld [vmem:[%s4502_s28 + $0x84] sm:$0xf] }
  0x8e   : > { %v1247_v23 = vsel %vm4523_vm7, %v1242_v17, %v1246_v59  ;;  %3500 = vmatpush3.bf16.msra.mxu1 %v3953_v4  ;;  %v4598_v35 = vcombine.low %v817_v29, %v826_v32  ;;  %v1275_v59 = vrot.slane %v1273_v49, 4  ;;  %v1294_v4 = vrot.slane %v1292_v56, 5  ;;  %3581 = vmatprep.subr.bf16.mxu0 %v3963_v58  ;;  %v1161_v56 = vld [vmem:[%s4502_s28 + $0x80] sm:$0xf]  ;;  %v1163_v58 = vld [vmem:[%s4502_s28 + $0x88] sm:$0x1] }
  0x8f   : > { %v4588_v28 = vcombine.low %v1237_v45, %v1247_v23  ;;  %3501 = vmatprep.subr.bf16.mxu1 %v3955_v16  ;;  %v4630_v8 = vcombine.low %v1261_v53, %v1271_v1  ;;  %v3042_v10 = vrot.slane %v828_v0, 11  ;;  %v1289_v14 = vor.u32 %v1288_v2, %v1284_v62  ;;  %v759_v0 = vld [vmem:[%s4502_s28 + $0x40] sm:$0x8] }
  0x90   : > { %1723 = vmatmul.mubr.bf16.gmra.mrb[4].mxu0 %v4598_v35  ;;  %v1279_v9 = vor.u32 %v1278_v60, %v1275_v59  ;;  %v835_v16 = vrot.slane %v833_v6, 7  ;;  %v842_v17 = vshrl.u32 %v758_v5, 16  ;;  %v845_v18 = vshll.u32 %v758_v5, 16  ;;  %v761_v5 = vld [vmem:[%s4502_s28 + $0x48] sm:$0xf] }
  0x91   : > { %3677 = vmatprep.mubr.bf16.mxu1 %v4588_v28  ;;  %1730 = vmatprep.mubr.bf16.mxu0 %v4608_v43  ;;  %v1300_v21 = vshll.u32 %v1158_v12, 16  ;;  %v1290_v23 = vrot.slane %v1289_v14, 4  ;;  %v1308_v32 = vrot.slane %v1306_v22, 5  ;;  %v1310_v39 = vshrl.u32 %v1159_v13, 16  ;;  %v3971_v12 = vld [vmem:[%s5144_s3 + $0xf0] sm:$0xff]   ;;  %v3973_v22 = vld [vmem:[%s5144_s3 + $0x138] sm:$0xff]  }
  0x92   : > { %3502 = vmatpush3.bf16.msra.mxu1 %v3957_v34  ;;  %v1280_v45 = vrot.slane %v1279_v9, 4  ;;  %v838_v24 = vor.u32 %v836_v11, %v835_v16  ;;  %v840_v25 = vrot.slane %v835_v16, 4  ;;  %v844_v26 = vrot.slane %v842_v17, 7  ;;  %3582 = vmatpush3.bf16.msra.mxu0 %v3965_v19  ;;  %v1164_v11 = vld [vmem:[%s4502_s28 + $0x94] sm:$0xf] }
  0x93   : > { %3503 = vmatprep.subr.bf16.mxu1 %v3959_v38  ;;  %3678 = vmatmul.mubr.bf16.gmra.mrb[4].mxu1 %v4630_v8  ;;  %v1302_v31 = vrot.slane %v1300_v21, 5  ;;  %v1295_v34 = vsel %vm4523_vm7, %v1290_v23, %v1294_v4  ;;  %v1316_v46 = vshll.u32 %v1160_v44, 16  ;;  %v1312_v49 = vrot.slane %v1310_v39, 4  ;;  %v760_v4 = vld [vmem:[%s4502_s28 + $0x44] sm:$0xf] }
  0x94   : > { %v1285_v29 = vsel %vm4523_vm7, %v1280_v45, %v1284_v62  ;;  %v839_v37 = vsel %vm4531_vm8, %v3042_v10, %v838_v24  ;;  %v847_v38 = vor.u32 %v845_v18, %v844_v26  ;;  %3583 = vmatprep.subr.bf16.mxu0 %v3970_v50  ;;  %v1321_v60 = vshrl.u32 %v1161_v56, 16  ;;  %v3972_v18 = vld [vmem:[%s5144_s3 + $0x198] sm:$0xff]  }
  0x95   : > { %v4654_v41 = vcombine.low %v1285_v29, %v1295_v34  ;;  %v1303_v42 = vor.u32 %v1302_v31, %v1299_v30  ;;  %v1318_v53 = vrot.slane %v1316_v46, 5  ;;  %v1313_v54 = vor.u32 %v1312_v49, %v1308_v32  ;;  %v1165_v21 = vld [vmem:[%s4502_s28 + $0x98] sm:$0xf]  ;;  %v1166_v26 = vld [vmem:[%s4502_s28 + $0x9c] sm:$0x1] }
  0x96   : > { %3504 = vmatpush3.bf16.msra.mxu1 %v3960_v40  ;;  %v4652_v40 = vld [vmem:[%s4502_s28 + $0x44] sm:$0xff]   ;;  %v848_v48 = vsel %vm4531_vm8, %v840_v25, %v847_v38  ;;  %v1324_v62 = vshll.u32 %v1161_v56, 16  ;;  %v1330_v63 = vshll.u32 %v1162_v57, 16  ;;  %v1334_v1 = vshrl.u32 %v1162_v57, 16  ;;  %3584 = vmatpush3.bf16.msra.mxu0 %v3972_v18  ;;  %v3974_v29 = vld [vmem:[%s5144_s3 + $0xf8] sm:$0xff]  }
  0x97   : > { %3505 = vmatprep.subr.bf16.mxu1 %v3962_v52  ;;  %3681 = vmatprep.mubr.bf16.mxu1 %v4654_v41  ;;  %v4665_v51 = vcombine.low %v839_v37, %v848_v48  ;;  %v1304_v52 = vrot.slane %v1303_v42, 4  ;;  %v1314_v59 = vrot.slane %v1313_v54, 4  ;;  %v1340_v2 = vshll.u32 %v1163_v58, 16  ;;  %v4700_v49 = vld [vmem:[%s4502_s28 + $0x58] sm:$0xff]  }
  0x98   : > { %v1326_v9 = vrot.slane %v1324_v62, 5  ;;  %v1332_v10 = vrot.slane %v1330_v63, 5  ;;  %v1336_v14 = vrot.slane %v1334_v1, 4  ;;  %v850_v17 = vshrl.u32 %v759_v0, 16 }
  0x99   : > { %1731 = vmatmul.mubr.bf16.gmra.mrb[8].mxu0 %v4665_v51  ;;  %v1309_v55 = vsel %vm4523_vm7, %v1304_v52, %v1308_v32  ;;  %v1319_v6 = vsel %vm4523_vm7, %v1314_v59, %v1318_v53  ;;  %v1342_v16 = vrot.slane %v1340_v2, 5  ;;  %v855_v19 = vshrl.u32 %v760_v4, 16  ;;  %v3978_v2 = vld [vmem:[%s5144_s3 + $0x1a0] sm:$0xff]  }
  0x9a   : > { %3506 = vmatpush3.bf16.msra.mxu1 %v3964_v7  ;;  %1738 = vmatprep.mubr.bf16.mxu0 %v4652_v40  ;;  %v1323_v7 = vrot.slane %v1321_v60, 4  ;;  %v4683_v13 = vcombine.low %v1309_v55, %v1319_v6  ;;  %v858_v45 = vshll.u32 %v760_v4, 16  ;;  %v864_v20 = vshrl.u32 %v761_v5, 16  ;;  %v4707_v55 = vld [vmem:[%s5144_s3 + $0x140] sm:$0xff]   ;;  %v762_v6 = vld [vmem:[%s4502_s28 + $0x54] sm:$0x8] }
  0x9b   : > { %3507 = vmatprep.subr.bf16.mxu1 %v3966_v27  ;;  %v1337_v23 = vor.u32 %v1336_v14, %v1332_v10  ;;  %v3043_v24 = vrot.slane %v850_v17, 11  ;;  %v867_v25 = vshll.u32 %v761_v5, 16  ;;  %v1345_v27 = vshrl.u32 %v1164_v11, 16  ;;  %v3977_v60 = vld [vmem:[%s5144_s3 + $0x1e0] sm:$0xff]  }
  0x9c   : > { %v1327_v44 = vor.u32 %v1326_v9, %v1323_v7  ;;  %3682 = vmatmul.mubr.bf16.gmra.mrb[8].mxu1 %v4683_v13  ;;  %v857_v31 = vrot.slane %v855_v19, 7  ;;  %v866_v32 = vrot.slane %v864_v20, 7  ;;  %v1354_v38 = vshll.u32 %v1165_v21, 16  ;;  %3585 = vmatprep.subr.bf16.mxu0 %v3977_v60  ;;  %v763_v7 = vld [vmem:[%s4502_s28 + $0x58] sm:$0xf]  ;;  %v3981_v20 = vld [vmem:[%s5144_s3 + $0x1e8] sm:$0xff]  }
  0x9d   : > { %v1338_v34 = vrot.slane %v1337_v23, 4  ;;  %v1347_v37 = vrot.slane %v1345_v27, 4  ;;  %v1358_v39 = vshrl.u32 %v1165_v21, 16  ;;  %v1364_v59 = vshll.u32 %v1166_v26, 16  ;;  %v764_v9 = vld [vmem:[%s4502_s28 + $0x5c] sm:$0xf]  ;;  %3586 = vmatpush3.bf16.msra.mxu0 %v3978_v2 }
  0x9e   : > { %3508 = vmatpush3.bf16.msra.mxu1 %v3967_v33  ;;  %v1328_v30 = vrot.slane %v1327_v44, 4  ;;  %v1348_v33 = vshll.u32 %v1164_v11, 16  ;;  %v860_v46 = vor.u32 %v858_v45, %v857_v31  ;;  %v869_v48 = vor.u32 %v867_v25, %v866_v32  ;;  %v765_v25 = vld [vmem:[%s4502_s28 + $0x68] sm:$0x8]  ;;  %3587 = vmatprep.subr.bf16.mxu0 %v3981_v20  ;;  %v4746_v27 = vld [vmem:[%s4502_s28 + $0x6c] sm:$0xff]  }
  0x9f   : > { %3509 = vmatprep.subr.bf16.mxu1 %v3969_v47  ;;  %v862_v47 = vrot.slane %v857_v31, 4  ;;  %v1343_v50 = vsel %vm4523_vm7, %v1338_v34, %v1342_v16  ;;  %v1356_v53 = vrot.slane %v1354_v38, 5  ;;  %v1360_v54 = vrot.slane %v1358_v39, 4  ;;  %v770_v60 = vld [vmem:[%s4502_s28 + $0x84] sm:$0xf] }
  0xa0   : > { %v1333_v42 = vsel %vm4523_vm7, %v1328_v30, %v1332_v10  ;;  %v1350_v52 = vrot.slane %v1348_v33, 5  ;;  %v861_v57 = vsel %vm4531_vm8, %v3043_v24, %v860_v46  ;;  %v1366_v1 = vrot.slane %v1364_v59, 5  ;;  %v767_v30 = vld [vmem:[%s4502_s28 + $0x70] sm:$0xf]  ;;  %v3980_v46 = vld [vmem:[%s5144_s3 + $0x148] sm:$0xff]  }
  0xa1   : > { %v4709_v56 = vcombine.low %v1333_v42, %v1343_v50  ;;  %v870_v58 = vsel %vm4531_vm8, %v862_v47, %v869_v48  ;;  %v1361_v0 = vor.u32 %v1360_v54, %v1356_v53  ;;  %v872_v10 = vshrl.u32 %v762_v6, 16  ;;  %v3986_v59 = vld [vmem:[%s5144_s3 + $0x1b0] sm:$0xff]   ;;  %v4778_v6 = vld [vmem:[%s4502_s28 + $0x80] sm:$0xff]  }
  0xa2   : > { %3510 = vmatpush3.bf16.msra.mxu1 %v3971_v12  ;;  %v4718_v62 = vcombine.low %v861_v57, %v870_v58  ;;  %v1351_v63 = vor.u32 %v1350_v52, %v1347_v37  ;;  %v877_v14 = vshrl.u32 %v763_v7, 16  ;;  %v880_v16 = vshll.u32 %v763_v7, 16  ;;  %v768_v57 = vld [vmem:[%s4502_s28 + $0x7c] sm:$0x8]  ;;  %v769_v58 = vld [vmem:[%s4502_s28 + $0x80] sm:$0xf] }
  0xa3   : > { %3511 = vmatprep.subr.bf16.mxu1 %v3973_v22  ;;  %3685 = vmatprep.mubr.bf16.mxu1 %v4709_v56  ;;  %v1362_v5 = vrot.slane %v1361_v0, 4  ;;  %v3044_v18 = vrot.slane %v872_v10, 11  ;;  %v886_v44 = vshrl.u32 %v764_v9, 16  ;;  %v889_v19 = vshll.u32 %v764_v9, 16  ;;  %v3982_v22 = vld [vmem:[%s5144_s3 + $0x1a8] sm:$0xff]  }
  0xa4   : > { %1739 = vmatmul.mubr.bf16.gmra.mrb[12].mxu0 %v4718_v62  ;;  %v1352_v4 = vrot.slane %v1351_v63, 4  ;;  %v879_v45 = vrot.slane %v877_v14, 7  ;;  %v894_v31 = vshrl.u32 %v765_v25, 16  ;;  %v908_v37 = vshrl.u32 %v767_v30, 16 }
  0xa5   : > { %1746 = vmatprep.mubr.bf16.mxu0 %v4700_v49  ;;  %v1367_v12 = vsel %vm4523_vm7, %v1362_v5, %v1366_v1  ;;  %v888_v21 = vrot.slane %v886_v44, 7  ;;  %3588 = vmatpush3.bf16.msra.mxu0 %v3982_v22  ;;  %v911_v42 = vshll.u32 %v767_v30, 16  ;;  %v916_v63 = vshrl.u32 %v768_v57, 16  ;;  %v771_v44 = vld [vmem:[%s4502_s28 + $0x90] sm:$0x8]  ;;  %v3988_v22 = vld [vmem:[%s5144_s3 + $0x158] sm:$0xff]  }
  0xa6   : > { %3512 = vmatpush3.bf16.msra.mxu1 %v3974_v29  ;;  %v1357_v11 = vsel %vm4523_vm7, %v1352_v4, %v1356_v53  ;;  %v882_v23 = vor.u32 %v880_v16, %v879_v45  ;;  %v884_v24 = vrot.slane %v879_v45, 4  ;;  %v766_v29 = vld [vmem:[%s4502_s28 + $0x6c] sm:$0xf]  ;;  %v3045_v39 = vrot.slane %v894_v31, 11  ;;  %v3989_v16 = vld [vmem:[%s5144_s3 + $0x1f8] sm:$0xff]  }
  0xa7   : > { %3689 = vmatprep.subr.bf16.mxu1 %v4707_v55  ;;  %v4734_v17 = vcombine.low %v1357_v11, %v1367_v12  ;;  %v891_v26 = vor.u32 %v889_v19, %v888_v21  ;;  %v899_v33 = vshrl.u32 %v766_v29, 16  ;;  %v902_v34 = vshll.u32 %v766_v29, 16  ;;  %v772_v19 = vld [vmem:[%s4502_s28 + $0x94] sm:$0xf]  ;;  %v773_v45 = vld [vmem:[%s4502_s28 + $0x98] sm:$0xf] }
  0xa8   : > { %v883_v32 = vsel %vm4531_vm8, %v3044_v18, %v882_v23  ;;  %v910_v50 = vrot.slane %v908_v37, 7  ;;  %v921_v0 = vshrl.u32 %v769_v58, 16  ;;  %v924_v1 = vshll.u32 %v769_v58, 16  ;;  %v3990_v23 = vld [vmem:[%s5144_s3 + $0x1b8] sm:$0xff]   ;;  %v4814_v37 = vld [vmem:[%s5144_s3 + $0x200] sm:$0xff]   ;;  %v4845_v58 = vld [vmem:[%s5144_s3 + $0x208] sm:$0xff]  }
  0xa9   : > { %3686 = vmatmul.mubr.bf16.gmra.mrb[12].mxu1 %v4734_v17  ;;  %v892_v38 = vsel %vm4531_vm8, %v884_v24, %v891_v26  ;;  %v901_v48 = vrot.slane %v899_v33, 7  ;;  %v930_v5 = vshrl.u32 %v770_v60, 16  ;;  %v3046_v10 = vrot.slane %v916_v63, 11  ;;  %v3991_v33 = vld [vmem:[%s5144_s3 + $0x160] sm:$0xff]   ;;  %v3998_v57 = vld [vmem:[%s5144_s3 + $0x178] sm:$0xff]  }
  0xaa   : > { %2141 = vmatprep.mubr.bf16.mxu1 %v4547_v36  ;;  %v3985_v36 = vld [vmem:[%s5144_s3 + $0x1f0] sm:$0xff]   ;;  %v4760_v47 = vcombine.low %v883_v32, %v892_v38  ;;  %v913_v54 = vor.u32 %v911_v42, %v910_v50  ;;  %v923_v7 = vrot.slane %v921_v0, 7  ;;  %v938_v20 = vshrl.u32 %v771_v44, 16  ;;  %v1167_v44 = vld [vmem:[%s4502_s28 + $0xa8] sm:$0xf] }
  0xab   : > { %3589 = vmatprep.subr.bf16.mxu0 %v3985_v36  ;;  %v904_v52 = vor.u32 %v902_v34, %v901_v48  ;;  %v906_v53 = vrot.slane %v901_v48, 4  ;;  %v932_v11 = vrot.slane %v930_v5, 7  ;;  %v943_v21 = vshrl.u32 %v772_v19, 16  ;;  %v4809_v34 = vld [vmem:[%s4502_s28 + $0x94] sm:$0xff]   ;;  %v3993_v48 = vld [vmem:[%s5144_s3 + $0x168] sm:$0xff]  }
  0xac   : > { %1747 = vmatmul.mubr.bf16.gmra.mrb[16].mxu0 %v4760_v47  ;;  %v926_v12 = vor.u32 %v924_v1, %v923_v7  ;;  %v928_v14 = vrot.slane %v923_v7, 4  ;;  %v946_v24 = vshll.u32 %v772_v19, 16  ;;  %v952_v25 = vshrl.u32 %v773_v45, 16  ;;  %v4878_v7 = vld [vmem:[%s5144_s3 + $0x220] sm:$0xff]   ;;  %v1168_v19 = vld [vmem:[%s4502_s28 + $0xac] sm:$0xf] }
  0xad   : > { %1754 = vmatprep.mubr.bf16.mxu0 %v4746_v27  ;;  %v905_v2 = vsel %vm4531_vm8, %v3045_v39, %v904_v52  ;;  %v914_v4 = vsel %vm4531_vm8, %v906_v53, %v913_v54  ;;  %3590 = vmatpush3.bf16.msra.mxu0 %v3986_v59  ;;  %v945_v30 = vrot.slane %v943_v21, 7  ;;  %v955_v31 = vshll.u32 %v773_v45, 16  ;;  %v3995_v53 = vld [vmem:[%s5144_s3 + $0x170] sm:$0xff]   ;;  %v775_v59 = vld [vmem:[%s4502_s28 + $0xa8] sm:$0xf] }
  0xae   : > { %v4783_v9 = vcombine.low %v905_v2, %v914_v4  ;;  %3591 = vmatprep.subr.bf16.mxu0 %v3989_v16  ;;  %v927_v26 = vsel %vm4531_vm8, %v3046_v10, %v926_v12  ;;  %v954_v32 = vrot.slane %v952_v25, 7  ;;  %v3047_v38 = vrot.slane %v938_v20, 11  ;;  %v4886_v12 = vld [vmem:[%s5144_s3 + $0x228] sm:$0xff]   ;;  %v778_v20 = vld [vmem:[%s4502_s28 + $0xbc] sm:$0xf] }
  0xaf   : > { %v948_v39 = vor.u32 %v946_v24, %v945_v30  ;;  %v950_v42 = vrot.slane %v945_v30, 4  ;;  %v965_v63 = vshrl.u32 %v775_v59, 16  ;;  %v968_v4 = vshll.u32 %v775_v59, 16  ;;  %v779_v21 = vld [vmem:[%s4502_s28 + $0xc0] sm:$0xf] }
  0xb0   : > { %v1382_v45 = vshrl.u32 %v1168_v19, 16  ;;  %v996_v24 = vshrl.u32 %v779_v21, 16  ;;  %v1170_v59 = vld [vmem:[%s4502_s28 + $0xbc] sm:$0xf] }
  0xb1   : > { %2142 = vmatmul.mubr.bf16.vlgmr.msra.gmra.mrb[16].mxu1 %v4598_v35  ;;  %v933_v35 = vshll.u32 %v770_v60, 16  ;;  %3592 = vmatpush3.bf16.msra.mxu0 %v3990_v23  ;;  %v949_v50 = vsel %vm4531_vm8, %v3047_v38, %v948_v39  ;;  %v776_v60 = vld [vmem:[%s4502_s28 + $0xac] sm:$0xf]  ;;  %v967_v2 = vrot.slane %v965_v63, 7  ;;  %v987_v23 = vshrl.u32 %v778_v20, 16 }
  0xb2   : > { %3690 = vmatpush3.bf16.msra.mxu1 %v4707_v55  ;;  %2149 = vmatprep.mubr.bf16.mxu1 %v4608_v43  ;;  %v3984_v55 = vld [vmem:[%s5144_s3 + $0x150] sm:$0xff]   ;;  %v974_v0 = vshrl.u32 %v776_v60, 16  ;;  %v1384_v30 = vrot.slane %v1382_v45, 4  ;;  %v1393_v63 = vshrl.u32 %v1170_v59, 16 }
  0xb3   : > { %3691 = vmatprep.subr.bf16.mxu1 %v3980_v46  ;;  %v935_v18 = vor.u32 %v933_v35, %v932_v11  ;;  %3721 = vmatprep.subr.bf16.mxu0 %v4814_v37  ;;  %v977_v35 = vshll.u32 %v776_v60, 16  ;;  %v970_v10 = vor.u32 %v968_v4, %v967_v2 }
  0xb4   : > { %1755 = vmatmul.mubr.bf16.gmra.mrb[20].mxu0 %v4783_v9  ;;  %v976_v5 = vrot.slane %v974_v0, 7  ;;  %v1396_v0 = vshll.u32 %v1170_v59, 16 }
  0xb5   : > { %1762 = vmatprep.mubr.bf16.mxu0 %v4778_v6  ;;  %v936_v29 = vsel %vm4531_vm8, %v928_v14, %v935_v18 }
  0xb6   : > { %3692 = vmatpush3.bf16.msra.mxu1 %v3980_v46  ;;  %v4816_v36 = vcombine.low %v927_v26, %v936_v29  ;;  %v957_v46 = vor.u32 %v955_v31, %v954_v32  ;;  %v979_v11 = vor.u32 %v977_v35, %v976_v5  ;;  %v1169_v31 = vld [vmem:[%s4502_s28 + $0xb0] sm:$0x1]  ;;  %v1395_v35 = vrot.slane %v1393_v63, 4 }
  0xb7   : > { %3693 = vmatprep.subr.bf16.mxu1 %v3984_v55 }
  0xb8   : > { %v958_v52 = vsel %vm4531_vm8, %v950_v42, %v957_v46  ;;  %v1388_v42 = vshll.u32 %v1169_v31, 16  ;;  %v4003_v46 = vld [vmem:[%s4502_s28 + $0xbc] sm:$0xff]  }
  0xb9   : > { %2150 = vmatmul.mubr.bf16.gmra.mrb[20].mxu1 %v4665_v51  ;;  %v4833_v54 = vcombine.low %v949_v50, %v958_v52 }
  0xba   : > { %2157 = vmatprep.mubr.bf16.mxu1 %v4652_v40  ;;  %3694 = vmatpush3.bf16.msra.mxu1 %v3984_v55 }
  0xbb   : > { %3695 = vmatprep.subr.bf16.mxu1 %v3988_v22 }
  0xbc   : > { %1763 = vmatmul.mubr.bf16.gmra.mrb[24].mxu0 %v4816_v36 }
  0xbd   : > { %1770 = vmatprep.mubr.bf16.mxu0 %v4809_v34 }
  0xbe   : > { %3696 = vmatpush3.bf16.msra.mxu1 %v3988_v22  ;;  %v777_v22 = vld [vmem:[%s4502_s28 + $0xb8] sm:$0x8] }
  0xbf   : > { %3697 = vmatprep.subr.bf16.mxu1 %v3991_v33  ;;  %v982_v32 = vshrl.u32 %v777_v22, 16 }
  0xc1   : > { %2158 = vmatmul.mubr.bf16.gmra.mrb[24].mxu1 %v4718_v62 }
  0xc2   : > { %2165 = vmatprep.mubr.bf16.mxu1 %v4700_v49  ;;  %3698 = vmatpush3.bf16.msra.mxu1 %v3991_v33  ;;  %v989_v33 = vrot.slane %v987_v23, 7 }
  0xc3   : > { %3699 = vmatprep.subr.bf16.mxu1 %v3993_v48 }
  0xc4   : > { %1771 = vmatmul.mubr.bf16.gmra.mrb[28].mxu0 %v4833_v54  ;;  %v994_v52 = vrot.slane %v989_v33, 4 }
  0xc5   : > { %2600 = vmatprep.mubr.bf16.mxu0 %v4608_v43  ;;  %v4856_v43 = vld [vmem:[%s5144_s3 + $0x210] sm:$0xff]  }
  0xc6   : > { %3700 = vmatpush3.bf16.msra.mxu1 %v3993_v48  ;;  %v3049_v48 = vrot.slane %v982_v32, 11 }
  0xc7   : > { %3701 = vmatprep.subr.bf16.mxu1 %v3995_v53 }
  0xc9   : > { %2166 = vmatmul.mubr.bf16.gmra.mrb[28].mxu1 %v4760_v47 }
  0xca   : > { %2173 = vmatprep.mubr.bf16.mxu1 %v4746_v27  ;;  %3702 = vmatpush3.bf16.msra.mxu1 %v3995_v53 }
  0xcb   : > { %3703 = vmatprep.subr.bf16.mxu1 %v3998_v57 }
  0xcc   : > { %2601 = vmatmul.mubr.bf16.vlgmr.msra.gmra.mrb[32].mxu0 %v4665_v51  ;;  %v774_v51 = vld [vmem:[%s4502_s28 + $0xa4] sm:$0x8] }
  0xcd   : > { %3722 = vmatpush3.bf16.msra.mxu0 %v4814_v37  ;;  %2608 = vmatprep.mubr.bf16.mxu0 %v4652_v40  ;;  %v4867_v40 = vld [vmem:[%s5144_s3 + $0x218] sm:$0xff]   ;;  %v960_v1 = vshrl.u32 %v774_v51, 16 }
  0xce   : > { %3704 = vmatpush3.bf16.msra.mxu1 %v3998_v57  ;;  %3723 = vmatprep.subr.bf16.mxu0 %v4845_v58 }
  0xcf   : > { %3753 = vmatprep.subr.bf16.mxu1 %v4814_v37  ;;  %v3048_v55 = vrot.slane %v960_v1, 11 }
  0xd1   : > { %2174 = vmatmul.mubr.bf16.gmra.mrb[32].mxu1 %v4783_v9  ;;  %3724 = vmatpush3.bf16.msra.mxu0 %v4845_v58  ;;  %v971_v14 = vsel %vm4531_vm8, %v3048_v55, %v970_v10  ;;  %v1172_v10 = vld [vmem:[%s4502_s28 + $0xc4] sm:$0x1] }
  0xd2   : > { %2181 = vmatprep.mubr.bf16.mxu1 %v4778_v6  ;;  %3725 = vmatprep.subr.bf16.mxu0 %v4856_v43 }
  0xd4   : > { %2609 = vmatmul.mubr.bf16.gmra.mrb[36].mxu0 %v4718_v62  ;;  %v3997_v62 = vld [vmem:[%s4502_s28 + $0xa8] sm:$0xff]  }
  0xd5   : > { %2616 = vmatprep.mubr.bf16.mxu0 %v4700_v49  ;;  %3726 = vmatpush3.bf16.msra.mxu0 %v4856_v43  ;;  %v972_v49 = vrot.slane %v967_v2, 4 }
  0xd6   : > { %3727 = vmatprep.subr.bf16.mxu0 %v4867_v40 }
  0xd7   : > { %v980_v16 = vsel %vm4531_vm8, %v972_v49, %v979_v11 }
  0xd8   : > { %v3058_v18 = vcombine.low %v971_v14, %v980_v16  ;;  %v1412_v14 = vshll.u32 %v1172_v10, 16 }
  0xd9   : > { %2182 = vmatmul.mubr.bf16.gmra.mrb[36].mxu1 %v4816_v36  ;;  %3728 = vmatpush3.bf16.msra.mxu0 %v4867_v40 }
  0xda   : > { %2189 = vmatprep.mubr.bf16.mxu1 %v4809_v34  ;;  %3729 = vmatprep.subr.bf16.mxu0 %v4878_v7 }
  0xdc   : > { %2617 = vmatmul.mubr.bf16.gmra.mrb[40].mxu0 %v4760_v47  ;;  %v4900_v47 = vld [vmem:[%s5144_s3 + $0x230] sm:$0xff]  }
  0xdd   : > { %2624 = vmatprep.mubr.bf16.mxu0 %v4746_v27  ;;  %3730 = vmatpush3.bf16.msra.mxu0 %v4878_v7  ;;  %v4907_v27 = vld [vmem:[%s5144_s3 + $0x238] sm:$0xff]  }
  0xde   : > { %3731 = vmatprep.subr.bf16.mxu0 %v4886_v12 }
  0xe1   : > { %2190 = vmatmul.mubr.bf16.gmra.mrb[40].mxu1 %v4833_v54  ;;  %3732 = vmatpush3.bf16.msra.mxu0 %v4886_v12 }
  0xe2   : > { %2197 = vmatprep.mubr.bf16.mxu1 %v3997_v62  ;;  %3733 = vmatprep.subr.bf16.mxu0 %v4900_v47 }
  0xe4   : > { %2625 = vmatmul.mubr.bf16.gmra.mrb[44].mxu0 %v4783_v9  ;;  %v1372_v9 = vshll.u32 %v1167_v44, 16 }
  0xe5   : > { %2632 = vmatprep.mubr.bf16.mxu0 %v4778_v6  ;;  %3734 = vmatpush3.bf16.msra.mxu0 %v4900_v47  ;;  %v1369_v6 = vshrl.u32 %v1167_v44, 16 }
  0xe6   : > { %3735 = vmatprep.subr.bf16.mxu0 %v4907_v27  ;;  %v1374_v26 = vrot.slane %v1372_v9, 5 }
  0xe7   : > { %v1371_v25 = vrot.slane %v1369_v6, 4 }
  0xe9   : > { %2198 = vmatmul.mubr.bf16.gmra.mrb[44].mxu1 %v3058_v18  ;;  %3736 = vmatpush3.bf16.msra.mxu0 %v4907_v27  ;;  %v1375_v38 = vor.u32 %v1374_v26, %v1371_v25 }
  0xea   : > { %3705 = vmatprep.mubr.bf16.mxu1 %v4564_v61  ;;  %v1378_v61 = vshll.u32 %v1168_v19, 16 }
  0xec   : > { %2633 = vmatmul.mubr.bf16.gmra.mrb[48].mxu0 %v4816_v36  ;;  %v1380_v29 = vrot.slane %v1378_v61, 5  ;;  %v999_v36 = vshll.u32 %v779_v21, 16 }
  0xed   : > { %2640 = vmatprep.mubr.bf16.mxu0 %v4809_v34  ;;  %v990_v34 = vshll.u32 %v778_v20, 16 }
  0xee   : > { %v1385_v39 = vor.u32 %v1384_v30, %v1380_v29 }
  0xef   : > { %v992_v50 = vor.u32 %v990_v34, %v989_v33 }
  0xf0   : > { %v1386_v57 = vrot.slane %v1385_v39, 4 }
  0xf1   : > { %3706 = vmatmul.mubr.bf16.vlgmr.msra.gmra.mrb[0].mxu1 %v4588_v28  ;;  %v993_v60 = vsel %vm4531_vm8, %v3049_v48, %v992_v50 }
  0xf2   : > { %3761 = vmatpush3.bf16.msra.mxu1 %v4814_v37  ;;  %3709 = vmatprep.mubr.bf16.mxu1 %v4630_v8  ;;  %v998_v37 = vrot.slane %v996_v24, 7 }
  0xf3   : > { %3754 = vmatprep.subr.bf16.mxu1 %v4845_v58 }
  0xf4   : > { %2641 = vmatmul.mubr.bf16.gmra.mrb[52].mxu0 %v4833_v54  ;;  %v1001_v53 = vor.u32 %v999_v36, %v998_v37  ;;  %v1376_v54 = vrot.slane %v1375_v38, 4 }
  0xf5   : > { %2648 = vmatprep.mubr.bf16.mxu0 %v3997_v62  ;;  %v1398_v62 = vrot.slane %v1396_v0, 5 }
  0xf6   : > { %3762 = vmatpush3.bf16.msra.mxu1 %v4845_v58  ;;  %v1390_v58 = vrot.slane %v1388_v42, 5  ;;  %v1002_v51 = vsel %vm4531_vm8, %v994_v52, %v1001_v53 }
  0xf7   : > { %3755 = vmatprep.subr.bf16.mxu1 %v4856_v43  ;;  %v3059_v5 = vcombine.low %v993_v60, %v1002_v51  ;;  %v1399_v49 = vor.u32 %v1398_v62, %v1395_v35 }
  0xf8   : > { %v1391_v1 = vsel %vm4523_vm7, %v1386_v57, %v1390_v58 }
  0xf9   : > { %3710 = vmatmul.mubr.bf16.gmra.mrb[4].mxu1 %v4654_v41 }
  0xfa   : > { %3763 = vmatpush3.bf16.msra.mxu1 %v4856_v43  ;;  %3713 = vmatprep.mubr.bf16.mxu1 %v4683_v13  ;;  %v1171_v43 = vld [vmem:[%s4502_s28 + $0xc0] sm:$0xf]  ;;  %s3289_s28 = sshll.u32 %s4083_s21, 4 }
  0xfb   : > { %3756 = vmatprep.subr.bf16.mxu1 %v4867_v40  ;;  %v1402_v2 = vshll.u32 %v1171_v43, 16  ;;  %v1406_v4 = vshrl.u32 %v1171_v43, 16  ;;  %s5053_s14 = sadd.s32 %s3289_s28, %s3251_s10 }
  0xfc   : > { %2649 = vmatmul.mubr.bf16.gmra.mrb[56].mxu0 %v3058_v18  ;;  %v1414_v18 = vrot.slane %v1412_v14, 5  ;;  %s3252_s21 = sshll.u32 %s5053_s14, 7 }
  0xfd   : > { %2656 = vmatprep.mubr.bf16.mxu0 %v4003_v46  ;;  %v1404_v55 = vrot.slane %v1402_v2, 5  ;;  %s5078_s17 = scalar_lea.hbm %s5146_s5, %s3252_s21 }
  0xfe   : > { %3764 = vmatpush3.bf16.msra.mxu1 %v4867_v40  ;;  %v1381_v40 = vsel %vm4523_vm7, %v1376_v54, %v1380_v29 }
  0xff   : > { %3757 = vmatprep.subr.bf16.mxu1 %v4878_v7  ;;  %v3078_v15 = vcombine.low %v1381_v40, %v1391_v1 }
 0x101   : > { %3714 = vmatmul.mubr.bf16.gmra.mrb[8].mxu1 %v4709_v56 }
 0x102   : > { %3765 = vmatpush3.bf16.msra.mxu1 %v4878_v7  ;;  %3717 = vmatprep.mubr.bf16.mxu1 %v4734_v17  ;;  %v1408_v7 = vrot.slane %v1406_v4, 4 }
 0x103   : > { %3758 = vmatprep.subr.bf16.mxu1 %v4886_v12 }
 0x104   : > { %2657 = vmatmul.mubr.bf16.gmra.mrb[60].mxu0 %v3059_v5  ;;  %v1409_v11 = vor.u32 %v1408_v7, %v1404_v55 }
 0x105   : > { %3737 = vmatprep.mubr.bf16.mxu0 %v4588_v28 }
 0x106   : > { %3766 = vmatpush3.bf16.msra.mxu1 %v4886_v12  ;;  %v1400_v12 = vrot.slane %v1399_v49, 4  ;;  %v1410_v16 = vrot.slane %v1409_v11, 4 }
 0x107   : > { %3759 = vmatprep.subr.bf16.mxu1 %v4900_v47 }
 0x108   : > { %v1405_v28 = vsel %vm4523_vm7, %v1400_v12, %v1404_v55 }
 0x109   : > { %3718 = vmatmul.mubr.bf16.gmra.mrb[12].mxu1 %v3078_v15 }
 0x10a   : > { %3767 = vmatpush3.bf16.msra.mxu1 %v4900_v47  ;;  %3745 = vmatprep.mubr.bf16.mxu1 %v4709_v56  ;;  %v1415_v56 = vsel %vm4523_vm7, %v1410_v16, %v1414_v18 }
 0x10b   : > { %3760 = vmatprep.subr.bf16.mxu1 %v4907_v27  ;;  %v3079_v47 = vcombine.low %v1405_v28, %v1415_v56 }
 0x10c   : > { %3738 = vmatmul.mubr.bf16.vlgmr.msra.gmra.mrb[64].mxu0 %v4630_v8 }
 0x10d   : > { %3741 = vmatprep.mubr.bf16.mxu0 %v4654_v41 }
 0x10e   : > { %3768 = vmatpush3.bf16.msra.mxu1 %v4907_v27 }
 0x111   : > { %3746 = vmatmul.mubr.bf16.vlgmr.msra.gmra.mrb[8].mxu1 %v4734_v17 }
 0x112   : > { %3749 = vmatprep.mubr.bf16.mxu1 %v3078_v15 }
 0x114   : > { %3742 = vmatmul.mubr.bf16.gmra.mrb[68].mxu0 %v4683_v13 }
 0x119   : > { %3750 = vmatmul.mubr.bf16.gmra.mrb[12].mxu1 %v3079_v47 }
 0x15b   : > { %v3433_v27 = vpop.f32.mrb[0].mxu0 }
 0x15c   : > { %v3434_v44 = vpop.f32.mrb[1].mxu0 }
 0x15d   : > { %v3435_v19 = vadd.f32 %v3434_v44, %v3433_v27  ;;  %v3436_v6 = vpop.f32.mrb[2].mxu0 }
 0x15e   : > { %v3437_v8 = vpop.f32.mrb[3].mxu0 }
 0x15f   : > { %v3438_v9 = vadd.f32 %v3437_v8, %v3436_v6 }
 0x163   : > { %v3439_v17 = vpop.f32.mrb[4].mxu0 }
 0x164   : > { %v3440_v61 = vpop.f32.mrb[5].mxu0 }
 0x165   : > { %v3441_v41 = vadd.f32 %v3440_v61, %v3439_v17  ;;  %v3442_v45 = vpop.f32.mrb[6].mxu0 }
 0x166   : > { %v3443_v20 = vpop.f32.mrb[7].mxu0 }
 0x167   : > { %v3444_v21 = vadd.f32 %v3443_v20, %v3442_v45 }
 0x16c   : > { %v3445_v22 = vpop.f32.mrb[8].mxu0 }
 0x16d   : > { %v3446_v23 = vpop.f32.mrb[9].mxu0 }
 0x16e   : > { %v3447_v3 = vadd.f32 %v3446_v23, %v3445_v22  ;;  %v3448_v24 = vpop.f32.mrb[10].mxu0 }
 0x16f   : > { %v3449_v25 = vpop.f32.mrb[11].mxu0 }
 0x170   : > { %v3450_v26 = vadd.f32 %v3449_v25, %v3448_v24 }
 0x177   : > { %v3451_v13 = vpop.f32.mrb[12].mxu0 }
 0x178   : > { %v3452_v29 = vpop.f32.mrb[13].mxu0 }
 0x179   : > { %v3453_v30 = vadd.f32 %v3452_v29, %v3451_v13  ;;  %v3454_v31 = vpop.f32.mrb[14].mxu0 }
 0x17a   : > { %v3455_v32 = vpop.f32.mrb[15].mxu0 }
 0x17b   : > { %v3456_v33 = vadd.f32 %v3455_v32, %v3454_v31 }
 0x17f   : > { %v3457_v34 = vpop.f32.mrb[16].mxu0 }
 0x180   : > { %v3458_v36 = vpop.f32.mrb[17].mxu0 }
 0x181   : > { %v4967_v38 = vadd.f32 %v3458_v36, %v3457_v34  ;;  %v3460_v42 = vpop.f32.mrb[18].mxu0 }
 0x182   : > { %v3461_v50 = vpop.f32.mrb[19].mxu0 }
 0x183   : > { %v3462_v52 = vadd.f32 %v3461_v50, %v3460_v42 }
 0x184   : > { %v3513_v37 = vpop.f32.mrb[16].mxu1 }
 0x185   : > { %v3514_v39 = vpop.f32.mrb[17].mxu1 }
 0x186   : > { %v3515_v46 = vadd.f32 %v3514_v39, %v3513_v37  ;;  %v3516_v48 = vpop.f32.mrb[18].mxu1 }
 0x187   : > { %v3517_v53 = vpop.f32.mrb[19].mxu1  ;;  %v3463_v59 = vpop.f32.mrb[20].mxu0 }
 0x188   : > { %v3518_v54 = vadd.f32 %v3517_v53, %v3516_v48  ;;  %v4969_v57 = vadd.f32 %v3515_v46, %v3435_v19  ;;  %v3464_v60 = vpop.f32.mrb[21].mxu0 }
 0x189   : > { %v4973_v51 = vadd.f32 %v3464_v60, %v3463_v59  ;;  %v3466_v0 = vpop.f32.mrb[22].mxu0 }
 0x18a   : > { %v4971_v58 = vadd.f32 %v3518_v54, %v3438_v9  ;;  %v3467_v2 = vpop.f32.mrb[23].mxu0 }
 0x18b   : > { %v3468_v4 = vadd.f32 %v3467_v2, %v3466_v0 }
 0x18c   : > { %v3519_v43 = vpop.f32.mrb[20].mxu1 }
 0x18d   : > { %v3520_v63 = vpop.f32.mrb[21].mxu1 }
 0x18e   : > { %v3521_v40 = vadd.f32 %v3520_v63, %v3519_v43  ;;  %v3522_v1 = vpop.f32.mrb[22].mxu1 }
 0x18f   : > { %v3523_v5 = vpop.f32.mrb[23].mxu1  ;;  %v3469_v55 = vpop.f32.mrb[24].mxu0 }
 0x190   : > { %v3524_v15 = vadd.f32 %v3523_v5, %v3522_v1  ;;  %v4975_v35 = vadd.f32 %v3521_v40, %v3441_v41  ;;  %v3470_v10 = vpop.f32.mrb[25].mxu0 }
 0x191   : > { %v4979_v49 = vadd.f32 %v3470_v10, %v3469_v55  ;;  %v3472_v14 = vpop.f32.mrb[26].mxu0 }
 0x192   : > { %v4977_v62 = vadd.f32 %v3524_v15, %v3444_v21  ;;  %v3473_v18 = vpop.f32.mrb[27].mxu0 }
 0x193   : > { %v3474_v28 = vadd.f32 %v3473_v18, %v3472_v14 }
 0x194   : > { %v3525_v7 = vpop.f32.mrb[24].mxu1 }
 0x195   : > { %v3526_v11 = vpop.f32.mrb[25].mxu1 }
 0x196   : > { %v3527_v12 = vadd.f32 %v3526_v11, %v3525_v7  ;;  %v3528_v16 = vpop.f32.mrb[26].mxu1 }
 0x197   : > { %v3529_v56 = vpop.f32.mrb[27].mxu1  ;;  %v3475_v19 = vpop.f32.mrb[28].mxu0 }
 0x198   : > { %v3530_v47 = vadd.f32 %v3529_v56, %v3528_v16  ;;  %v4981_v27 = vadd.f32 %v3527_v12, %v3447_v3  ;;  %v3476_v8 = vpop.f32.mrb[29].mxu0 }
 0x199   : > { %v4985_v9 = vadd.f32 %v3476_v8, %v3475_v19  ;;  %v3478_v61 = vpop.f32.mrb[30].mxu0 }
 0x19a   : > { %v4983_v44 = vadd.f32 %v3530_v47, %v3450_v26  ;;  %v3479_v20 = vpop.f32.mrb[31].mxu0 }
 0x19b   : > { %v3480_v21 = vadd.f32 %v3479_v20, %v3478_v61 }
 0x19c   : > { %v3531_v6 = vpop.f32.mrb[28].mxu1 }
 0x19d   : > { %v3532_v17 = vpop.f32.mrb[29].mxu1 }
 0x19e   : > { %v3533_v41 = vadd.f32 %v3532_v17, %v3531_v6  ;;  %v3534_v45 = vpop.f32.mrb[30].mxu1 }
 0x19f   : > { %v3535_v22 = vpop.f32.mrb[31].mxu1  ;;  %v3593_v3 = vpop.f32.mrb[32].mxu0 }
 0x1a0   : > { %v3536_v23 = vadd.f32 %v3535_v22, %v3534_v45  ;;  %v4987_v24 = vadd.f32 %v3533_v41, %v3453_v30  ;;  %v3594_v13 = vpop.f32.mrb[33].mxu0 }
 0x1a1   : > { %v4991_v31 = vadd.f32 %v3594_v13, %v3593_v3  ;;  %v3596_v32 = vpop.f32.mrb[34].mxu0 }
 0x1a2   : > { %v4989_v25 = vadd.f32 %v3536_v23, %v3456_v33  ;;  %v3597_v36 = vpop.f32.mrb[35].mxu0 }
 0x1a3   : > { %v4993_v42 = vadd.f32 %v3597_v36, %v3596_v32 }
 0x1a4   : > { %v3537_v26 = vpop.f32.mrb[32].mxu1 }
 0x1a5   : > { %v3538_v29 = vpop.f32.mrb[33].mxu1 }
 0x1a6   : > { %v3539_v34 = vadd.f32 %v3538_v29, %v3537_v26  ;;  %v3540_v37 = vpop.f32.mrb[34].mxu1 }
 0x1a7   : > { %v3541_v39 = vpop.f32.mrb[35].mxu1  ;;  %v3599_v50 = vpop.f32.mrb[36].mxu0 }
 0x1a8   : > { %v3804_v46 = vadd.f32 %v3539_v34, %v4967_v38  ;;  %v3542_v48 = vadd.f32 %v3541_v39, %v3540_v37  ;;  %v3600_v53 = vpop.f32.mrb[37].mxu0 }
 0x1a9   : > { %v3601_v59 = vadd.f32 %v3600_v53, %v3599_v50  ;;  %v3602_v43 = vpop.f32.mrb[38].mxu0 }
 0x1aa   : > { %v3810_v30 = vadd.f32 %v3542_v48, %v3462_v52  ;;  %v3603_v0 = vpop.f32.mrb[39].mxu0 }
 0x1ab   : > { %v3604_v1 = vadd.f32 %v3603_v0, %v3602_v43 }
 0x1ac   : > { %v3543_v33 = vpop.f32.mrb[36].mxu1 }
 0x1ad   : > { %v3544_v54 = vpop.f32.mrb[37].mxu1 }
 0x1ae   : > { %v3545_v60 = vadd.f32 %v3544_v54, %v3543_v33  ;;  %v3546_v63 = vpop.f32.mrb[38].mxu1 }
 0x1af   : > { %v3547_v40 = vpop.f32.mrb[39].mxu1  ;;  %v3605_v38 = vpop.f32.mrb[40].mxu0 }
 0x1b0   : > { %v4997_v2 = vadd.f32 %v3545_v60, %v4973_v51  ;;  %v3548_v5 = vadd.f32 %v3547_v40, %v3546_v63  ;;  %v3606_v52 = vpop.f32.mrb[41].mxu0 }
 0x1b1   : > { %v3607_v10 = vadd.f32 %v3606_v52, %v3605_v38  ;;  %v3608_v11 = vpop.f32.mrb[42].mxu0 }
 0x1b2   : > { %v4999_v15 = vadd.f32 %v3548_v5, %v3468_v4  ;;  %v3609_v16 = vpop.f32.mrb[43].mxu0 }
 0x1b3   : > { %v3610_v56 = vadd.f32 %v3609_v16, %v3608_v11 }
 0x1b4   : > { %v3549_v55 = vpop.f32.mrb[40].mxu1 }
 0x1b5   : > { %v3550_v7 = vpop.f32.mrb[41].mxu1 }
 0x1b6   : > { %v3551_v14 = vadd.f32 %v3550_v7, %v3549_v55  ;;  %v3552_v12 = vpop.f32.mrb[42].mxu1 }
 0x1b7   : > { %v3553_v18 = vpop.f32.mrb[43].mxu1  ;;  %v3611_v6 = vpop.f32.mrb[44].mxu0 }
 0x1b8   : > { %v5002_v47 = vadd.f32 %v3551_v14, %v4979_v49  ;;  %v3554_v19 = vadd.f32 %v3553_v18, %v3552_v12  ;;  %v3612_v4 = vpop.f32.mrb[45].mxu0 }
 0x1b9   : > { %v3613_v61 = vadd.f32 %v3612_v4, %v3611_v6  ;;  %v3614_v41 = vpop.f32.mrb[46].mxu0 }
 0x1ba   : > { %v3822_v51 = vadd.f32 %v3554_v19, %v3474_v28  ;;  %v3615_v22 = vpop.f32.mrb[47].mxu0 }
 0x1bb   : > { %v3616_v3 = vadd.f32 %v3615_v22, %v3614_v41 }
 0x1bc   : > { %v3555_v8 = vpop.f32.mrb[44].mxu1 }
 0x1bd   : > { %v3556_v17 = vpop.f32.mrb[45].mxu1 }
 0x1be   : > { %v3557_v45 = vadd.f32 %v3556_v17, %v3555_v8  ;;  %v3558_v20 = vpop.f32.mrb[46].mxu1 }
 0x1bf   : > { %v3559_v23 = vpop.f32.mrb[47].mxu1  ;;  %v3617_v32 = vpop.f32.mrb[48].mxu0 }
 0x1c0   : > { %v3813_v26 = vadd.f32 %v3557_v45, %v4985_v9  ;;  %v3560_v13 = vadd.f32 %v3559_v23, %v3558_v20  ;;  %v3618_v34 = vpop.f32.mrb[49].mxu0  ;;  %v2828_v23 = vld [vmem:[%s4220_s24 + $0x10] sm:$0xff] }
 0x1c1   : > { %v3619_v36 = vadd.f32 %v3618_v34, %v3617_v32  ;;  %v3620_v39 = vpop.f32.mrb[50].mxu0  ;;  %v2826_v32 = vld [vmem:[%s4220_s24] sm:$0xff] }
 0x1c2   : > { %v3819_v29 = vadd.f32 %v3560_v13, %v3480_v21  ;;  %v3621_v33 = vpop.f32.mrb[51].mxu0  ;;  %v2836_v13 = vld [vmem:[%s4220_s24 + $0x50] sm:$0xff] }
 0x1c3   : > { %v3622_v43 = vadd.f32 %v3621_v33, %v3620_v39  ;;  %v3805_v9 = vadd.f32 %v3804_v46, %v3619_v36  ;;  %v2829_v39 = vld [vmem:[%s4220_s24 + $0x18] sm:$0xff] }
 0x1c4   : > { %v3707_v49 = vpop.f32.mrb[0].mxu1  ;;  %v2837_v33 = vld [vmem:[%s4220_s24 + $0x58] sm:$0xff] }
 0x1c5   : > { %v3770_v28 = vadd.f32 %v4975_v35, %v3707_v49  ;;  %v2240_v37 = vpop.f32.mrb[1].mxu1  ;;  %v5010_v40 = vadd.f32 %v3810_v30, %v3622_v43 }
 0x1c6   : > { %v3774_v48 = vadd.f32 %v4969_v57, %v2240_v37  ;;  %v3708_v50 = vpop.f32.mrb[2].mxu1  ;;  %v2834_v37 = vld [vmem:[%s4220_s24 + $0x40] sm:$0xff] }
 0x1c7   : > { %v3778_v53 = vadd.f32 %v4977_v62, %v3708_v50  ;;  %v2243_v54 = vpop.f32.mrb[3].mxu1  ;;  %v3771_v60 = vadd.f32 %v3770_v28, %v3601_v59  ;;  %v3623_v5 = vpop.f32.mrb[52].mxu0 }
 0x1c8   : > { %v3782_v21 = vadd.f32 %v4971_v58, %v2243_v54  ;;  %v3775_v63 = vadd.f32 %v3774_v48, %v4991_v31  ;;  %v3624_v57 = vpop.f32.mrb[53].mxu0  ;;  %v2827_v54 = vld [vmem:[%s4220_s24 + $0x8] sm:$0xff] }
 0x1c9   : > { %v3779_v0 = vadd.f32 %v3778_v53, %v3604_v1  ;;  %v3625_v62 = vadd.f32 %v3624_v57, %v3623_v5  ;;  %v3626_v7 = vpop.f32.mrb[54].mxu0 }
 0x1ca   : > { %v3783_v35 = vadd.f32 %v3782_v21, %v4993_v42  ;;  %v3627_v11 = vpop.f32.mrb[55].mxu0 }
 0x1cb   : > { %v3628_v1 = vadd.f32 %v3627_v11, %v3626_v7  ;;  %v3802_v30 = vadd.f32 %v4997_v2, %v3625_v62  ;;  %v2832_v7 = vld [vmem:[%s4220_s24 + $0x30] sm:$0xff] }
 0x1cc   : > { %v3711_v38 = vpop.f32.mrb[4].mxu1 }
 0x1cd   : > { %v3786_v55 = vadd.f32 %v4987_v24, %v3711_v38  ;;  %v2256_v52 = vpop.f32.mrb[5].mxu1  ;;  %v3808_v24 = vadd.f32 %v4999_v15, %v3628_v1  ;;  %v2835_v38 = vld [vmem:[%s4220_s24 + $0x48] sm:$0xff] }
 0x1ce   : > { %v3790_v59 = vadd.f32 %v4981_v27, %v2256_v52  ;;  %v3712_v46 = vpop.f32.mrb[6].mxu1 }
 0x1cf   : > { %v3794_v58 = vadd.f32 %v4989_v25, %v3712_v46  ;;  %v2259_v31 = vpop.f32.mrb[7].mxu1  ;;  %v5017_v14 = vadd.f32 %v3786_v55, %v3613_v61  ;;  %v3629_v27 = vpop.f32.mrb[56].mxu0  ;;  %v2840_v46 = vld [vmem:[%s4220_s24 + $0x70] sm:$0xff] }
 0x1d0   : > { %v3798_v42 = vadd.f32 %v4983_v44, %v2259_v31  ;;  %v5020_v12 = vadd.f32 %v3790_v59, %v3607_v10  ;;  %v3630_v19 = vpop.f32.mrb[57].mxu0 }
 0x1d1   : > { %v5023_v16 = vadd.f32 %v3794_v58, %v3616_v3  ;;  %v3631_v25 = vadd.f32 %v3630_v19, %v3629_v27  ;;  %v3632_v6 = vpop.f32.mrb[58].mxu0  ;;  %v2830_v58 = vld [vmem:[%s4220_s24 + $0x20] sm:$0xff]  ;;  %v2833_v27 = vld [vmem:[%s4220_s24 + $0x38] sm:$0xff] }
 0x1d2   : > { %v5025_v18 = vadd.f32 %v3798_v42, %v3610_v56  ;;  %v3633_v8 = vpop.f32.mrb[59].mxu0  ;;  %v2838_v42 = vld [vmem:[%s4220_s24 + $0x60] sm:$0xff] }
 0x1d3   : > { %v3634_v2 = vadd.f32 %v3633_v8, %v3632_v6  ;;  %v5028_v4 = vadd.f32 %v5002_v47, %v3631_v25  ;;  %v2841_v8 = vld [vmem:[%s4220_s24 + $0x78] sm:$0xff] }
 0x1d5   : > { %v5030_v44 = vadd.f32 %v3822_v51, %v3634_v2 }
 0x1d7   : > { %v3635_v10 = vpop.f32.mrb[60].mxu0 }
 0x1d8   : > { %v3636_v15 = vpop.f32.mrb[61].mxu0 }
 0x1d9   : > { %v3637_v17 = vadd.f32 %v3636_v15, %v3635_v10  ;;  %v3638_v56 = vpop.f32.mrb[62].mxu0  ;;  %v2831_v10 = vld [vmem:[%s4220_s24 + $0x28] sm:$0xff] }
 0x1da   : > { %v3639_v61 = vpop.f32.mrb[63].mxu0 }
 0x1db   : > { %v3640_v41 = vadd.f32 %v3639_v61, %v3638_v56  ;;  %v3814_v45 = vadd.f32 %v3813_v26, %v3637_v17 }
 0x1dd   : > { %v5032_v20 = vadd.f32 %v3819_v29, %v3640_v41 }
 0x1df   : > { %v3739_v22 = vpop.f32.mrb[64].mxu0 }
 0x1e0   : > { %v3772_v3 = vadd.f32 %v3771_v60, %v3739_v22  ;;  %v2699_v51 = vpop.f32.mrb[65].mxu0 }
 0x1e1   : > { %v3776_v34 = vadd.f32 %v3775_v63, %v2699_v51  ;;  %v3740_v36 = vpop.f32.mrb[66].mxu0 }
 0x1e2   : > { %v2844_v26 = vadd.f32 %v3772_v3, %v2828_v23  ;;  %v3780_v48 = vadd.f32 %v3779_v0, %v3740_v36  ;;  %v2702_v53 = vpop.f32.mrb[67].mxu0 }
 0x1e3   : > { %v2842_v60 = vadd.f32 %v3776_v34, %v2826_v32  ;;  %v3784_v63 = vadd.f32 %v3783_v35, %v2702_v53 }
 0x1e4   : > { %v3747_v47 = vpop.f32.mrb[8].mxu1  ;;  %2860 = vst [vmem:[%s4222_s12 + $0x10] sm:$0xff] %v2844_v26  ;;  %v2845_v0 = vadd.f32 %v3780_v48, %v2829_v39 }
 0x1e5   : > { %v3803_v49 = vadd.f32 %v3802_v30, %v3747_v47  ;;  %v2731_v28 = vpop.f32.mrb[9].mxu1  ;;  %2858 = vst [vmem:[%s4222_s12] sm:$0xff] %v2842_v60  ;;  %v2843_v52 = vadd.f32 %v3784_v63, %v2827_v54 }
 0x1e6   : > { %v3806_v29 = vadd.f32 %v3805_v9, %v2731_v28  ;;  %v3748_v50 = vpop.f32.mrb[10].mxu1  ;;  %2861 = vst [vmem:[%s4222_s12 + $0x18] sm:$0xff] %v2845_v0 }
 0x1e7   : > { %v2852_v43 = vadd.f32 %v3803_v49, %v2836_v13  ;;  %v3809_v21 = vadd.f32 %v3808_v24, %v3748_v50  ;;  %v2734_v5 = vpop.f32.mrb[11].mxu1  ;;  %2859 = vst [vmem:[%s4222_s12 + $0x8] sm:$0xff] %v2843_v52  ;;  %v3743_v62 = vpop.f32.mrb[68].mxu0 }
 0x1e8   : > { %v2850_v9 = vadd.f32 %v3806_v29, %v2834_v37  ;;  %v3812_v57 = vadd.f32 %v5010_v40, %v2734_v5  ;;  %v3788_v40 = vadd.f32 %v5017_v14, %v3743_v62  ;;  %v2715_v11 = vpop.f32.mrb[69].mxu0 }
 0x1e9   : > { %2868 = vst [vmem:[%s4222_s12 + $0x50] sm:$0xff] %v2852_v43  ;;  %v2853_v55 = vadd.f32 %v3809_v21, %v2837_v33  ;;  %v3792_v1 = vadd.f32 %v5020_v12, %v2715_v11  ;;  %v3744_v24 = vpop.f32.mrb[70].mxu0 }
 0x1ea   : > { %2866 = vst [vmem:[%s4222_s12 + $0x40] sm:$0xff] %v2850_v9  ;;  %v2851_v35 = vadd.f32 %v3812_v57, %v2835_v38  ;;  %v2848_v19 = vadd.f32 %v3788_v40, %v2832_v7  ;;  %v3796_v14 = vadd.f32 %v5023_v16, %v3744_v24  ;;  %v2718_v2 = vpop.f32.mrb[71].mxu0  ;;  %v2839_v16 = vld [vmem:[%s4220_s24 + $0x68] sm:$0xff]  ;;  %s5162_s24 = sand.u32 1, %s4075_s19  }
 0x1eb   : > { %2869 = vst [vmem:[%s4222_s12 + $0x58] sm:$0xff] %v2853_v55  ;;  %v2846_v15 = vadd.f32 %v3792_v1, %v2830_v58  ;;  %v3800_v56 = vadd.f32 %v5025_v18, %v2718_v2  ;;  %s5089_s26 = scalar_lea.sflag [#allocation6], %s5162_s24 }
 0x1ec   : > { %2867 = vst [vmem:[%s4222_s12 + $0x48] sm:$0xff] %v2851_v35  ;;  %v3751_v59 = vpop.f32.mrb[12].mxu1  ;;  %2864 = vst [vmem:[%s4222_s12 + $0x30] sm:$0xff] %v2848_v19  ;;  %v2849_v41 = vadd.f32 %v3796_v14, %v2833_v27 }
 0x1ed   : > { %v3815_v31 = vadd.f32 %v3814_v45, %v3751_v59  ;;  %v2747_v30 = vpop.f32.mrb[13].mxu1  ;;  %2862 = vst [vmem:[%s4222_s12 + $0x20] sm:$0xff] %v2846_v15  ;;  %v2847_v23 = vadd.f32 %v3800_v56, %v2831_v10 }
 0x1ee   : > { %v3818_v25 = vadd.f32 %v5028_v4, %v2747_v30  ;;  %v3752_v6 = vpop.f32.mrb[14].mxu1  ;;  %2865 = vst [vmem:[%s4222_s12 + $0x38] sm:$0xff] %v2849_v41 }
 0x1ef   : > { %v2856_v12 = vadd.f32 %v3815_v31, %v2840_v46  ;;  %v3821_v17 = vadd.f32 %v5032_v20, %v3752_v6  ;;  %v2750_v4 = vpop.f32.mrb[15].mxu1  ;;  %2863 = vst [vmem:[%s4222_s12 + $0x28] sm:$0xff] %v2847_v23 }
 0x1f0   : > { %v2854_v61 = vadd.f32 %v3818_v25, %v2838_v42  ;;  %v3824_v45 = vadd.f32 %v5030_v44, %v2750_v4 }
 0x1f1   : > { %2872 = vst [vmem:[%s4222_s12 + $0x70] sm:$0xff] %v2856_v12  ;;  %v2857_v22 = vadd.f32 %v3821_v17, %v2841_v8 }
 0x1f2   : > { %2870 = vst [vmem:[%s4222_s12 + $0x60] sm:$0xff] %v2854_v61  ;;  %v2855_v18 = vadd.f32 %v3824_v45, %v2839_v16 }
 0x1f3   : > { %2873 = vst [vmem:[%s4222_s12 + $0x78] sm:$0xff] %v2857_v22 }
 0x1f4   : > { %2871 = vst [vmem:[%s4222_s12 + $0x68] sm:$0xff] %v2855_v18 }
 0x1f5   : > { %4018 = shalt.err (!%p4015_p9)
}
 0x1f6   : > { %s4019_s12 = scalar_lea.hbm %s5078_s17, 2048  ;;  %s4023_s28 = scalar_lea.hbm %s5146_s5, 8192 }
 0x1f7   : > { %p4020_p10 = scmp.ne.s32.totalorder %s5078_s17, %s4019_s12  ;;  %p4024_p13 = scmp.lt.u32.totalorder %s5078_s17, %s5146_s5 }
 0x1f8   : > { %p4025_p0 = scmp.lt.u32.totalorder %s4023_s28, %s4019_s12  ;;  %p4027_p2 = scmp.lt.u32.totalorder %s4019_s12, %s5078_s17 }
 0x1f9   : > { %p4021_p11 = pnand %p4020_p10, %p4186_p3 }
 0x1fa   : > { %p4026_p1 = por %p4025_p0, %p4024_p13 }
 0x1fb   : > { %p4022_p12 = pneg %p4021_p11 }
 0x1fc   : > { %p4028_p4 = por %p4027_p2, %p4026_p1 }
 0x1fe   : > { %p4029_p5 = pnand %p4028_p4, %p4022_p12 }
 0x200   : > { %4032 = shalt.err (!%p4029_p5)
}
 0x201   : > { %s4103_s21 = smov 128   ;;  %s4104_s15 = smov 8  }
 0x202   : > { %3849 = dma.vmem_to_hbm [thread:$0]  (%p4186_p3), %s5080_s22, 2048, %s5078_s17, %s5089_s26, %s4103_s21, %s4103_s21, %s4104_s15  }
 0x203 PF: > { %p3855_p6 = scmp.ge.s32.totalorder %s4099_s25, 2  ;;  %s2906_s16 = sand.u32 1, %s4071_s18  }
 0x204   : > { %s2907_s24 = scalar_lea.sflag [#allocation6], %s2906_s16 }
 0x205   : > { %p3852_p7 = pnand %p3855_p6, %p4195_p8 }
 0x207   : > { %4066 = dma.done.wait (!%p3852_p7), %s2907_s24, 2048  }
 0x208   : > { %4068 = vsyncadd (!%p3852_p7), %s2907_s24, 4294965248  ;;  %s18_s25 = sadd.s32 1, %s4099_s25   ;;  %s5163_s22 = sld [smem:[#allocation8_spill]] }
 0x209   : > { %p15_p9 = scmp.ge.s32.totalorder %s18_s25, 6   ;;  %s5164_s6 = sld [smem:[#allocation9_spill]] }
 0x20a   : > { %s5165_s24 = sld [smem:[#allocation10_spill]]  ;;  %s5166_s18 = smov %s4075_s19 }
 0x20b   : > { %s5167_s19 = smov %s4079_s20  ;;  %s5168_s20 = smov %s4204_s11 }
 0x20c   : > { %s5169_s21 = smov %s4091_s23  ;;  %17 = sbr.rel (!%p15_p9) target bundleno = 5 (0x5), region = 86 }
 0x20f   : > { %s5170_s23 = smov %s5164_s6 }
 0x213   :  { %2912 = vsyncpa [#allocation6], 1 }
 0x214   :  { %2914 = vsyncpa [#allocation6 + $0x1], 1 }

</bundles_post_ra>
